<compile_context>
chip_gen: v7x
topology: tpu7x:2x2x1
jax: 0.10.0
libtpu: 0.0.40
codegen_flags: <defaults>
</compile_context>

<pallas_src>
import math
import numpy as np
import jax
import jax.numpy as jnp
from jax import lax
from jax.experimental import pallas as pl
from jax.experimental.pallas import tpu as pltpu

DROPOUT_LAYERS = 2     # matches module-level `dropout_layers` in the reference
TM_ROWS = 256          # conv row tile: 512 total rows -> even 2-step grid (v7x megacore)


# --------------------------------------------------------------------------
# Pallas kernels
# --------------------------------------------------------------------------

def _conv_bnstats_kernel(p_ref, w_ref, y_ref, psum_ref, psumsq_ref):
    """im2col-matmul conv tile + fused per-tile BatchNorm statistics.

    p_ref: (TM, K) bf16 patches, w_ref: (K, Cout) bf16 weight,
    y_ref: (TM, Cout) f32 conv output (channels on the lane axis),
    psum_ref/psumsq_ref: (8, Cout) f32 per-tile partial sum / sum-of-squares,
    broadcast over the 8 sublanes so the stat blocks stay (8,128)-legal while the
    grid axis remains "parallel" (the wrapper reads row 0 of each tile).
    """
    y = jnp.dot(p_ref[...], w_ref[...], preferred_element_type=jnp.float32)
    y_ref[...] = y
    s = jnp.sum(y, axis=0, keepdims=True)            # (1, Cout)
    ss = jnp.sum(y * y, axis=0, keepdims=True)       # (1, Cout)
    psum_ref[...] = jnp.broadcast_to(s, psum_ref.shape)
    psumsq_ref[...] = jnp.broadcast_to(ss, psumsq_ref.shape)


def _bn_relu_pool_kernel(y_ref, scale_ref, shift_ref, o_ref, g_ref):
    """Fused BN affine + ReLU + MaxPool2d(kernel=3, stride=2, padding=1).

    y_ref: (1, H, W, C) conv output for one image, scale/shift: (1, 1, 1, C),
    o_ref: (1, PH, PW, C) pooled output, g_ref: (1, H, PW, C) VMEM scratch.
    The 3x3 max is done separably (columns then rows) with statically unrolled,
    window-clamped slices -- clamping reproduces MaxPool's ignore-the-padding exactly.
    """
    H, W = y_ref.shape[1], y_ref.shape[2]
    PH, PW = o_ref.shape[1], o_ref.shape[2]
    s = scale_ref[...]
    t = shift_ref[...]
    # column (W) stage: g[:, :, q, :] = max over the clamped 3-wide window at 2q-1..2q+1
    for q in range(PW):
        w0 = max(2 * q - 1, 0)
        w1 = min(2 * q + 2, W)
        f = jnp.maximum(y_ref[:, :, w0:w1, :] * s + t, 0.0)        # BN + ReLU
        g_ref[:, :, q:q + 1, :] = jnp.max(f, axis=2, keepdims=True)
    # row (H) stage
    for p in range(PH):
        h0 = max(2 * p - 1, 0)
        h1 = min(2 * p + 2, H)
        o_ref[:, p:p + 1, :, :] = jnp.max(g_ref[:, h0:h1, :, :], axis=1, keepdims=True)


def _mul_kernel(x_ref, m_ref, o_ref):
    o_ref[...] = x_ref[...] * m_ref[...]


# --------------------------------------------------------------------------
# wrappers
# --------------------------------------------------------------------------

def _im2col(x_nchw, ksize, stride, padding):
    p = padding
    x = jnp.pad(x_nchw, ((0, 0), (0, 0), (p, p), (p, p)))
    N, C, H, W = x.shape
    OH = (H - ksize) // stride + 1
    OW = (W - ksize) // stride + 1
    cols = []
    for i in range(ksize):
        for j in range(ksize):
            cols.append(x[:, :, i:i + stride * (OH - 1) + 1:stride,
                             j:j + stride * (OW - 1) + 1:stride])
    patches = jnp.stack(cols, axis=2)                               # (N, C, k*k, OH, OW)
    patches = patches.transpose(0, 3, 4, 1, 2).reshape(N * OH * OW, C * ksize * ksize)
    return patches, (N, OH, OW)


def conv2d_bnstats_pallas(x_nchw, weight, ksize, stride, padding):
    """conv1 (no bias) + fused BN batch statistics.  weight: (Cout, Cin, k, k)."""
    patches, (N, OH, OW) = _im2col(x_nchw, ksize, stride, padding)
    R, K = patches.shape
    Cout = weight.shape[0]
    wm = weight.reshape(Cout, K).T                                  # (K, Cout), matches patch order
    # bf16 MXU inputs (f32 accumulation) -- native on v6e/v7x, halves patch bytes.
    patches_b = patches.astype(jnp.bfloat16)
    wm_b = wm.astype(jnp.bfloat16)
    tm = TM_ROWS
    R_pad = ((R + tm - 1) // tm) * tm
    if R_pad != R:
        # zero rows contribute 0 to both partial sums -> statistics stay exact.
        patches_b = jnp.pad(patches_b, ((0, R_pad - R), (0, 0)))
    n_tiles = R_pad // tm

    y, psum, psumsq = pl.pallas_call(
        _conv_bnstats_kernel,
        out_shape=(jax.ShapeDtypeStruct((R_pad, Cout), jnp.float32),
                   jax.ShapeDtypeStruct((n_tiles * 8, Cout), jnp.float32),
                   jax.ShapeDtypeStruct((n_tiles * 8, Cout), jnp.float32)),
        grid=(n_tiles,),
        in_specs=[pl.BlockSpec((tm, K), lambda i: (i, 0)),
                  pl.BlockSpec((K, Cout), lambda i: (0, 0))],
        out_specs=(pl.BlockSpec((tm, Cout), lambda i: (i, 0)),
                   pl.BlockSpec((8, Cout), lambda i: (i, 0)),
                   pl.BlockSpec((8, Cout), lambda i: (i, 0))),
        compiler_params=pltpu.CompilerParams(dimension_semantics=("parallel",)),
    )(patches_b, wm_b)

    y = y[:R]
    total = psum.reshape(n_tiles, 8, Cout)[:, 0, :].sum(axis=0)
    total_sq = psumsq.reshape(n_tiles, 8, Cout)[:, 0, :].sum(axis=0)
    mean = total / R
    var = jnp.maximum(total_sq / R - mean * mean, 0.0)   # biased var, as F.batch_norm(training=True)
    return y, mean, var, (N, OH, OW, Cout)


def bn_relu_maxpool_pallas(y, dims, mean, var, gamma, beta, eps=1e-5):
    """Fused BN affine + ReLU + MaxPool2d(3, 2, 1).  y: (N*OH*OW, C) conv output."""
    N, OH, OW, C = dims
    inv = gamma / jnp.sqrt(var + eps)
    scale = inv.reshape(1, 1, 1, C).astype(jnp.float32)
    shift = (beta - mean * inv).reshape(1, 1, 1, C).astype(jnp.float32)
    y4 = y.reshape(N, OH, OW, C)                          # free reshape; channels stay on lanes
    PH = (OH - 1) // 2 + 1                                # floor((OH + 2 - 3)/2) + 1
    PW = (OW - 1) // 2 + 1
    out = pl.pallas_call(
        _bn_relu_pool_kernel,
        out_shape=jax.ShapeDtypeStruct((N, PH, PW, C), jnp.float32),
        grid=(N,),
        in_specs=[pl.BlockSpec((1, OH, OW, C), lambda n: (n, 0, 0, 0)),
                  pl.BlockSpec((1, 1, 1, C), lambda n: (0, 0, 0, 0)),
                  pl.BlockSpec((1, 1, 1, C), lambda n: (0, 0, 0, 0))],
        out_specs=pl.BlockSpec((1, PH, PW, C), lambda n: (n, 0, 0, 0)),
        scratch_shapes=[pltpu.VMEM((1, OH, PW, C), jnp.float32)],
        compiler_params=pltpu.CompilerParams(dimension_semantics=("parallel",)),
    )(y4, scale, shift)
    return out.transpose(0, 3, 1, 2)                      # tiny (32 KB) NHWC -> NCHW transpose


def apply_mask_pallas(x, mask):
    """Info_Dropout mask multiply, reshaped lane-dense (rows, 128)."""
    total = int(np.prod(x.shape))
    if total % 128 != 0 or (total // 128) % 8 != 0:
        return x * mask                                   # tiny; let XLA fuse it
    rows = total // 128
    xf = x.reshape(rows, 128)
    mf = mask.reshape(rows, 128).astype(x.dtype)
    out = pl.pallas_call(
        _mul_kernel,
        out_shape=jax.ShapeDtypeStruct((rows, 128), x.dtype),
    )(xf, mf)
    return out.reshape(x.shape)


def info_dropout_jax(key, np_seed, x_old, x, indim, outdim,
                     kernel_size, stride, padding, if_pool):
    """Info_Dropout.forward(x_old, x) (stem config: k=7, s=2, p=3, pool 3x3/2/1).
    The probability map runs under torch.no_grad in the reference and is RNG driven,
    so it stays in plain JAX glue; the mask multiply is a lane-dense Pallas kernel.
    RNG is numpy/JAX (distribution-equivalent, not bit-exact to torch).  Note the
    reference's random_sample() uses replacement=True, so categorical sampling matches.
    """
    radius = 3
    psn = 9
    drop_rate = 0.1
    temperature = 0.5
    band_width = 1.0

    rng = np.random.default_rng(np_seed)
    sampled_i = rng.integers(-radius, radius + 1, size=psn).tolist()
    sampled_j = rng.integers(-radius, radius + 1, size=psn).tolist()

    pL = padding + radius
    pR = padding + radius + 1
    padded = jnp.pad(x_old, ((0, 0), (0, 0), (pL, pR), (pL, pR)))
    B = x_old.shape[0]
    Hp, Wp = padded.shape[2], padded.shape[3]
    center = padded[:, :, radius:Hp - radius - 1, radius:Wp - radius - 1]
    dists = []
    for i, j in zip(sampled_i, sampled_j):
        shifted = padded[:, :, radius + i:Hp - radius - 1 + i, radius + j:Wp - radius - 1 + j]
        dists.append(center - shifted)
    distance = jnp.concatenate(dists, axis=1)                       # (B, 9*indim, Hs, Ws)
    Hs, Ws = distance.shape[2], distance.shape[3]
    distance = (distance ** 2).reshape(B * psn, indim, Hs, Ws).sum(axis=1)
    distance = distance.reshape(B, psn, Hs, Ws)

    # all_one_conv_indim_wise: depthwise all-ones conv, kernel=k, stride=s, pad=0
    acc = lax.reduce_window(distance, 0.0, lax.add,
                            (1, 1, kernel_size, kernel_size),
                            (1, 1, stride, stride), 'VALID')
    distance = jnp.exp(-acc / jnp.mean(acc) / 2.0 / band_width ** 2)

    # all_one_conv_radius_wise: 1x1 all-ones conv 9 -> outdim  == channel sum, broadcast
    prob = (jnp.sum(distance, axis=1, keepdims=True) / psn) ** (1.0 / temperature)
    prob = jnp.broadcast_to(prob, (B, outdim) + prob.shape[2:])
    if if_pool:
        # -MaxPool2d(3, 2, 1)(-prob): padded positions are -inf in the negated domain.
        prob = -lax.reduce_window(-prob, -jnp.inf, lax.max,
                                  (1, 1, 3, 3), (1, 1, 2, 2),
                                  ((0, 0), (0, 0), (1, 1), (1, 1)))
    prob = prob / jnp.sum(prob, axis=(-2, -1), keepdims=True)

    Bx, Cx, h, w = x.shape
    sampling_num = int(drop_rate * h * w)
    if sampling_num <= 0:
        return x
    logits = jnp.log(prob.reshape(Bx * Cx, h * w) + 1e-8)
    choice = jax.random.categorical(key, logits, axis=-1,
                                    shape=(sampling_num, Bx * Cx)).T   # (B*C, S), with replacement
    onehot = jax.nn.one_hot(choice, h * w, dtype=jnp.float32)          # (B*C, S, h*w)
    mask = 1.0 - jnp.clip(jnp.sum(onehot, axis=1), 0.0, 1.0)
    return apply_mask_pallas(x, mask.reshape(x.shape))


# --------------------------------------------------------------------------
# module params / forward
# --------------------------------------------------------------------------

class ResNetStemParams:
    """conv1 (7x7/2/3, 3->64, bias=False) with init_layer() normal(0, sqrt(2/n));
    bn1 with weight=1, bias=0."""
    def __init__(self, key):
        n = 7 * 7 * 64
        self.conv_w = jax.random.normal(key, (64, 3, 7, 7), jnp.float32) * math.sqrt(2.0 / n)
        self.gamma = jnp.ones((64,), jnp.float32)
        self.beta = jnp.zeros((64,), jnp.float32)


def resnet_forward(conv_w, gamma, beta, x, key):
    """ResNet.forward up to (and including) Info_Dropout, i.e. everything before self.trunk."""
    x_old = x
    y, mean, var, dims = conv2d_bnstats_pallas(x, conv_w, ksize=7, stride=2, padding=3)
    x = bn_relu_maxpool_pallas(y, dims, mean, var, gamma, beta)          # (N, 64, H/4, W/4) NCHW
    if DROPOUT_LAYERS > 0:
        x = info_dropout_jax(key, 1234, x_old, x, indim=3, outdim=64,
                             kernel_size=7, stride=2, padding=3, if_pool=True)
    # TODO(synk): the ResNet trunk (residual `block` stages, AvgPool2d(7), Flatten) cannot be
    # implemented because the `block` class is not part of the provided spec.
    return x


if __name__ == "__main__":
    key = jax.random.PRNGKey(0)
    key, kx, kw, kd = jax.random.split(key, 4)
    # NCHW input, 3 channels as required by conv1; small spatial size for the test.
    x = jax.random.normal(kx, (2, 3, 32, 32), jnp.float32)
    params = ResNetStemParams(kw)

    fwd = jax.jit(resnet_forward)
    out = fwd(params.conv_w, params.gamma, params.beta, x, kd)
    out = jax.block_until_ready(out)
    # 32 --conv1(7x7, s2, p3)--> 16 --maxpool(3, s2, p1)--> 8
    assert out.shape == (2, 64, 8, 8), out.shape
    assert bool(jnp.all(jnp.isfinite(out)))
    print("KERNEL_OK")
</pallas_src>

<mosaic_0001>
module attributes {stable_mosaic.version = 11 : i64} {
  func.func @_conv_bnstats_kernel(%arg0: i32, %arg1: memref<256x147xbf16, #tpu.memory_space<vmem>>, %arg2: memref<147x64xbf16, #tpu.memory_space<vmem>>, %arg3: memref<256x64xf32, #tpu.memory_space<vmem>>, %arg4: memref<8x64xf32, #tpu.memory_space<vmem>>, %arg5: memref<8x64xf32, #tpu.memory_space<vmem>>) attributes {dimension_semantics = [#tpu.dimension_semantics<parallel>], iteration_bounds = array<i64: 2>, scalar_prefetch = 0 : i64, scratch_operands = 0 : i64, tpu.core_type = #tpu.core_type<tc>, window_params = [{transform_indices = @transform_0, window_bounds = array<i64: 256, 147>}, {pipeline_mode = #tpu.pipeline_mode<synchronous>, transform_indices = @transform_1, window_bounds = array<i64: 147, 64>}, {transform_indices = @transform_2, window_bounds = array<i64: 256, 64>}, {transform_indices = @transform_3, window_bounds = array<i64: 8, 64>}, {transform_indices = @transform_4, window_bounds = array<i64: 8, 64>}]} {
    %c0 = arith.constant 0 : index
    %c0_0 = arith.constant 0 : index
    %0 = vector.load %arg1[%c0, %c0_0] : memref<256x147xbf16, #tpu.memory_space<vmem>>, vector<256x147xbf16>
    %c0_1 = arith.constant 0 : index
    %c0_2 = arith.constant 0 : index
    %1 = vector.load %arg2[%c0_1, %c0_2] : memref<147x64xbf16, #tpu.memory_space<vmem>>, vector<147x64xbf16>
    %cst = arith.constant dense<0.000000e+00> : vector<256x64xf32>
    %2 = tpu.matmul %0, %1, %cst {dimension_numbers = #tpu.dot_dimension_numbers<[1], [0], [0], [1], [0, 0, 1, 1], [], []>} : vector<256x147xbf16>, vector<147x64xbf16>, vector<256x64xf32> -> vector<256x64xf32>
    %c0_3 = arith.constant 0 : index
    %c0_4 = arith.constant 0 : index
    %3 = vector.load %arg3[%c0_3, %c0_4] : memref<256x64xf32, #tpu.memory_space<vmem>>, vector<256x64xf32>
    tpu.vector_store %arg3[%c0_3, %c0_4], %2 {strides = array<i32>} : memref<256x64xf32, #tpu.memory_space<vmem>>, vector<256x64xf32>,
    %cst_5 = arith.constant dense<0.000000e+00> : vector<64xf32>
    %4 = vector.multi_reduction <add>, %2, %cst_5 [0] : vector<256x64xf32> to vector<64xf32>
    %5 = vector.shape_cast %4 : vector<64xf32> to vector<1x64xf32>
    %6 = arith.mulf %2, %2 : vector<256x64xf32>
    %cst_6 = arith.constant dense<0.000000e+00> : vector<64xf32>
    %7 = vector.multi_reduction <add>, %6, %cst_6 [0] : vector<256x64xf32> to vector<64xf32>
    %8 = vector.shape_cast %7 : vector<64xf32> to vector<1x64xf32>
    %9 = vector.shape_cast %5 : vector<1x64xf32> to vector<1x64xf32>
    %10 = vector.broadcast %9 : vector<1x64xf32> to vector<8x64xf32>
    %c0_7 = arith.constant 0 : index
    %c0_8 = arith.constant 0 : index
    %11 = vector.load %arg4[%c0_7, %c0_8] : memref<8x64xf32, #tpu.memory_space<vmem>>, vector<8x64xf32>
    tpu.vector_store %arg4[%c0_7, %c0_8], %10 {strides = array<i32>} : memref<8x64xf32, #tpu.memory_space<vmem>>, vector<8x64xf32>,
    %12 = vector.shape_cast %8 : vector<1x64xf32> to vector<1x64xf32>
    %13 = vector.broadcast %12 : vector<1x64xf32> to vector<8x64xf32>
    %c0_9 = arith.constant 0 : index
    %c0_10 = arith.constant 0 : index
    %14 = vector.load %arg5[%c0_9, %c0_10] : memref<8x64xf32, #tpu.memory_space<vmem>>, vector<8x64xf32>
    tpu.vector_store %arg5[%c0_9, %c0_10], %13 {strides = array<i32>} : memref<8x64xf32, #tpu.memory_space<vmem>>, vector<8x64xf32>,
    return
  }
  func.func @transform_0(%arg0: i32) -> (i32, i32) {
    %c0_i32 = arith.constant 0 : i32
    %c0_i32_0 = arith.constant 0 : i32
    return %arg0, %c0_i32 : i32, i32
  }
  func.func @transform_1(%arg0: i32) -> (i32, i32) {
    %c0_i32 = arith.constant 0 : i32
    %c0_i32_0 = arith.constant 0 : i32
    %c0_i32_1 = arith.constant 0 : i32
    return %c0_i32, %c0_i32_0 : i32, i32
  }
  func.func @transform_2(%arg0: i32) -> (i32, i32) {
    %c0_i32 = arith.constant 0 : i32
    %c0_i32_0 = arith.constant 0 : i32
    return %arg0, %c0_i32 : i32, i32
  }
  func.func @transform_3(%arg0: i32) -> (i32, i32) {
    %c0_i32 = arith.constant 0 : i32
    %c0_i32_0 = arith.constant 0 : i32
    return %arg0, %c0_i32 : i32, i32
  }
  func.func @transform_4(%arg0: i32) -> (i32, i32) {
    %c0_i32 = arith.constant 0 : i32
    %c0_i32_0 = arith.constant 0 : i32
    return %arg0, %c0_i32 : i32, i32
  }
}

module attributes {stable_mosaic.version = 11 : i64} {
  func.func @_bn_relu_pool_kernel(%arg0: i32, %arg1: memref<1x16x16x64xf32, #tpu.memory_space<vmem>>, %arg2: memref<1x1x1x64xf32, #tpu.memory_space<vmem>>, %arg3: memref<1x1x1x64xf32, #tpu.memory_space<vmem>>, %arg4: memref<1x8x8x64xf32, #tpu.memory_space<vmem>>, %arg5: memref<1x16x8x64xf32, #tpu.memory_space<vmem>>) attributes {dimension_semantics = [#tpu.dimension_semantics<parallel>], iteration_bounds = array<i64: 2>, scalar_prefetch = 0 : i64, scratch_operands = 1 : i64, tpu.core_type = #tpu.core_type<tc>, window_params = [{transform_indices = @transform_0, window_bounds = array<i64: 1, 16, 16, 64>}, {pipeline_mode = #tpu.pipeline_mode<synchronous>, transform_indices = @transform_1, window_bounds = array<i64: 1, 1, 1, 64>}, {pipeline_mode = #tpu.pipeline_mode<synchronous>, transform_indices = @transform_2, window_bounds = array<i64: 1, 1, 1, 64>}, {transform_indices = @transform_3, window_bounds = array<i64: 1, 8, 8, 64>}]} {
    %c0 = arith.constant 0 : index
    %c0_0 = arith.constant 0 : index
    %c0_1 = arith.constant 0 : index
    %c0_2 = arith.constant 0 : index
    %0 = vector.load %arg2[%c0, %c0_0, %c0_1, %c0_2] : memref<1x1x1x64xf32, #tpu.memory_space<vmem>>, vector<1x1x1x64xf32>
    %c0_3 = arith.constant 0 : index
    %c0_4 = arith.constant 0 : index
    %c0_5 = arith.constant 0 : index
    %c0_6 = arith.constant 0 : index
    %1 = vector.load %arg3[%c0_3, %c0_4, %c0_5, %c0_6] : memref<1x1x1x64xf32, #tpu.memory_space<vmem>>, vector<1x1x1x64xf32>
    %c0_7 = arith.constant 0 : index
    %c0_8 = arith.constant 0 : index
    %c0_9 = arith.constant 0 : index
    %c0_10 = arith.constant 0 : index
    %2 = vector.load %arg1[%c0_7, %c0_8, %c0_9, %c0_10] : memref<1x16x16x64xf32, #tpu.memory_space<vmem>>, vector<1x16x2x64xf32>
    %3 = vector.broadcast %0 : vector<1x1x1x64xf32> to vector<1x16x2x64xf32>
    %4 = arith.mulf %2, %3 : vector<1x16x2x64xf32>
    %5 = vector.broadcast %1 : vector<1x1x1x64xf32> to vector<1x16x2x64xf32>
    %6 = arith.addf %4, %5 : vector<1x16x2x64xf32>
    %cst = arith.constant 0.000000e+00 : f32
    %7 = vector.broadcast %cst : f32 to vector<1x16x2x64xf32>
    %8 = arith.maximumf %6, %7 : vector<1x16x2x64xf32>
    %cst_11 = arith.constant dense<0xFF800000> : vector<1x16x64xf32>
    %9 = vector.multi_reduction <maximumf>, %8, %cst_11 [2] : vector<1x16x2x64xf32> to vector<1x16x64xf32>
    %10 = vector.shape_cast %9 : vector<1x16x64xf32> to vector<1x16x1x64xf32>
    %c0_12 = arith.constant 0 : index
    %c0_13 = arith.constant 0 : index
    %c0_14 = arith.constant 0 : index
    %c0_15 = arith.constant 0 : index
    %11 = vector.load %arg5[%c0_12, %c0_13, %c0_14, %c0_15] : memref<1x16x8x64xf32, #tpu.memory_space<vmem>>, vector<1x16x1x64xf32>
    tpu.vector_store %arg5[%c0_12, %c0_13, %c0_14, %c0_15], %10 {strides = array<i32>} : memref<1x16x8x64xf32, #tpu.memory_space<vmem>>, vector<1x16x1x64xf32>,
    %c0_16 = arith.constant 0 : index
    %c0_17 = arith.constant 0 : index
    %c1 = arith.constant 1 : index
    %c0_18 = arith.constant 0 : index
    %12 = vector.load %arg1[%c0_16, %c0_17, %c1, %c0_18] : memref<1x16x16x64xf32, #tpu.memory_space<vmem>>, vector<1x16x3x64xf32>
    %13 = vector.broadcast %0 : vector<1x1x1x64xf32> to vector<1x16x3x64xf32>
    %14 = arith.mulf %12, %13 : vector<1x16x3x64xf32>
    %15 = vector.broadcast %1 : vector<1x1x1x64xf32> to vector<1x16x3x64xf32>
    %16 = arith.addf %14, %15 : vector<1x16x3x64xf32>
    %cst_19 = arith.constant 0.000000e+00 : f32
    %17 = vector.broadcast %cst_19 : f32 to vector<1x16x3x64xf32>
    %18 = arith.maximumf %16, %17 : vector<1x16x3x64xf32>
    %cst_20 = arith.constant dense<0xFF800000> : vector<1x16x64xf32>
    %19 = vector.multi_reduction <maximumf>, %18, %cst_20 [2] : vector<1x16x3x64xf32> to vector<1x16x64xf32>
    %20 = vector.shape_cast %19 : vector<1x16x64xf32> to vector<1x16x1x64xf32>
    %c0_21 = arith.constant 0 : index
    %c0_22 = arith.constant 0 : index
    %c1_23 = arith.constant 1 : index
    %c0_24 = arith.constant 0 : index
    %21 = vector.load %arg5[%c0_21, %c0_22, %c1_23, %c0_24] : memref<1x16x8x64xf32, #tpu.memory_space<vmem>>, vector<1x16x1x64xf32>
    tpu.vector_store %arg5[%c0_21, %c0_22, %c1_23, %c0_24], %20 {strides = array<i32>} : memref<1x16x8x64xf32, #tpu.memory_space<vmem>>, vector<1x16x1x64xf32>,
    %c0_25 = arith.constant 0 : index
    %c0_26 = arith.constant 0 : index
    %c3 = arith.constant 3 : index
    %c0_27 = arith.constant 0 : index
    %22 = vector.load %arg1[%c0_25, %c0_26, %c3, %c0_27] : memref<1x16x16x64xf32, #tpu.memory_space<vmem>>, vector<1x16x3x64xf32>
    %23 = vector.broadcast %0 : vector<1x1x1x64xf32> to vector<1x16x3x64xf32>
    %24 = arith.mulf %22, %23 : vector<1x16x3x64xf32>
    %25 = vector.broadcast %1 : vector<1x1x1x64xf32> to vector<1x16x3x64xf32>
    %26 = arith.addf %24, %25 : vector<1x16x3x64xf32>
    %cst_28 = arith.constant 0.000000e+00 : f32
    %27 = vector.broadcast %cst_28 : f32 to vector<1x16x3x64xf32>
    %28 = arith.maximumf %26, %27 : vector<1x16x3x64xf32>
    %cst_29 = arith.constant dense<0xFF800000> : vector<1x16x64xf32>
    %29 = vector.multi_reduction <maximumf>, %28, %cst_29 [2] : vector<1x16x3x64xf32> to vector<1x16x64xf32>
    %30 = vector.shape_cast %29 : vector<1x16x64xf32> to vector<1x16x1x64xf32>
    %c0_30 = arith.constant 0 : index
    %c0_31 = arith.constant 0 : index
    %c2 = arith.constant 2 : index
    %c0_32 = arith.constant 0 : index
    %31 = vector.load %arg5[%c0_30, %c0_31, %c2, %c0_32] : memref<1x16x8x64xf32, #tpu.memory_space<vmem>>, vector<1x16x1x64xf32>
    tpu.vector_store %arg5[%c0_30, %c0_31, %c2, %c0_32], %30 {strides = array<i32>} : memref<1x16x8x64xf32, #tpu.memory_space<vmem>>, vector<1x16x1x64xf32>,
    %c0_33 = arith.constant 0 : index
    %c0_34 = arith.constant 0 : index
    %c5 = arith.constant 5 : index
    %c0_35 = arith.constant 0 : index
    %32 = vector.load %arg1[%c0_33, %c0_34, %c5, %c0_35] : memref<1x16x16x64xf32, #tpu.memory_space<vmem>>, vector<1x16x3x64xf32>
    %33 = vector.broadcast %0 : vector<1x1x1x64xf32> to vector<1x16x3x64xf32>
    %34 = arith.mulf %32, %33 : vector<1x16x3x64xf32>
    %35 = vector.broadcast %1 : vector<1x1x1x64xf32> to vector<1x16x3x64xf32>
    %36 = arith.addf %34, %35 : vector<1x16x3x64xf32>
    %cst_36 = arith.constant 0.000000e+00 : f32
    %37 = vector.broadcast %cst_36 : f32 to vector<1x16x3x64xf32>
    %38 = arith.maximumf %36, %37 : vector<1x16x3x64xf32>
    %cst_37 = arith.constant dense<0xFF800000> : vector<1x16x64xf32>
    %39 = vector.multi_reduction <maximumf>, %38, %cst_37 [2] : vector<1x16x3x64xf32> to vector<1x16x64xf32>
    %40 = vector.shape_cast %39 : vector<1x16x64xf32> to vector<1x16x1x64xf32>
    %c0_38 = arith.constant 0 : index
    %c0_39 = arith.constant 0 : index
    %c3_40 = arith.constant 3 : index
    %c0_41 = arith.constant 0 : index
    %41 = vector.load %arg5[%c0_38, %c0_39, %c3_40, %c0_41] : memref<1x16x8x64xf32, #tpu.memory_space<vmem>>, vector<1x16x1x64xf32>
    tpu.vector_store %arg5[%c0_38, %c0_39, %c3_40, %c0_41], %40 {strides = array<i32>} : memref<1x16x8x64xf32, #tpu.memory_space<vmem>>, vector<1x16x1x64xf32>,
    %c0_42 = arith.constant 0 : index
    %c0_43 = arith.constant 0 : index
    %c7 = arith.constant 7 : index
    %c0_44 = arith.constant 0 : index
    %42 = vector.load %arg1[%c0_42, %c0_43, %c7, %c0_44] : memref<1x16x16x64xf32, #tpu.memory_space<vmem>>, vector<1x16x3x64xf32>
    %43 = vector.broadcast %0 : vector<1x1x1x64xf32> to vector<1x16x3x64xf32>
    %44 = arith.mulf %42, %43 : vector<1x16x3x64xf32>
    %45 = vector.broadcast %1 : vector<1x1x1x64xf32> to vector<1x16x3x64xf32>
    %46 = arith.addf %44, %45 : vector<1x16x3x64xf32>
    %cst_45 = arith.constant 0.000000e+00 : f32
    %47 = vector.broadcast %cst_45 : f32 to vector<1x16x3x64xf32>
    %48 = arith.maximumf %46, %47 : vector<1x16x3x64xf32>
    %cst_46 = arith.constant dense<0xFF800000> : vector<1x16x64xf32>
    %49 = vector.multi_reduction <maximumf>, %48, %cst_46 [2] : vector<1x16x3x64xf32> to vector<1x16x64xf32>
    %50 = vector.shape_cast %49 : vector<1x16x64xf32> to vector<1x16x1x64xf32>
    %c0_47 = arith.constant 0 : index
    %c0_48 = arith.constant 0 : index
    %c4 = arith.constant 4 : index
    %c0_49 = arith.constant 0 : index
    %51 = vector.load %arg5[%c0_47, %c0_48, %c4, %c0_49] : memref<1x16x8x64xf32, #tpu.memory_space<vmem>>, vector<1x16x1x64xf32>
    tpu.vector_store %arg5[%c0_47, %c0_48, %c4, %c0_49], %50 {strides = array<i32>} : memref<1x16x8x64xf32, #tpu.memory_space<vmem>>, vector<1x16x1x64xf32>,
    %c0_50 = arith.constant 0 : index
    %c0_51 = arith.constant 0 : index
    %c9 = arith.constant 9 : index
    %c0_52 = arith.constant 0 : index
    %52 = vector.load %arg1[%c0_50, %c0_51, %c9, %c0_52] : memref<1x16x16x64xf32, #tpu.memory_space<vmem>>, vector<1x16x3x64xf32>
    %53 = vector.broadcast %0 : vector<1x1x1x64xf32> to vector<1x16x3x64xf32>
    %54 = arith.mulf %52, %53 : vector<1x16x3x64xf32>
    %55 = vector.broadcast %1 : vector<1x1x1x64xf32> to vector<1x16x3x64xf32>
    %56 = arith.addf %54, %55 : vector<1x16x3x64xf32>
    %cst_53 = arith.constant 0.000000e+00 : f32
    %57 = vector.broadcast %cst_53 : f32 to vector<1x16x3x64xf32>
    %58 = arith.maximumf %56, %57 : vector<1x16x3x64xf32>
    %cst_54 = arith.constant dense<0xFF800000> : vector<1x16x64xf32>
    %59 = vector.multi_reduction <maximumf>, %58, %cst_54 [2] : vector<1x16x3x64xf32> to vector<1x16x64xf32>
    %60 = vector.shape_cast %59 : vector<1x16x64xf32> to vector<1x16x1x64xf32>
    %c0_55 = arith.constant 0 : index
    %c0_56 = arith.constant 0 : index
    %c5_57 = arith.constant 5 : index
    %c0_58 = arith.constant 0 : index
    %61 = vector.load %arg5[%c0_55, %c0_56, %c5_57, %c0_58] : memref<1x16x8x64xf32, #tpu.memory_space<vmem>>, vector<1x16x1x64xf32>
    tpu.vector_store %arg5[%c0_55, %c0_56, %c5_57, %c0_58], %60 {strides = array<i32>} : memref<1x16x8x64xf32, #tpu.memory_space<vmem>>, vector<1x16x1x64xf32>,
    %c0_59 = arith.constant 0 : index
    %c0_60 = arith.constant 0 : index
    %c11 = arith.constant 11 : index
    %c0_61 = arith.constant 0 : index
    %62 = vector.load %arg1[%c0_59, %c0_60, %c11, %c0_61] : memref<1x16x16x64xf32, #tpu.memory_space<vmem>>, vector<1x16x3x64xf32>
    %63 = vector.broadcast %0 : vector<1x1x1x64xf32> to vector<1x16x3x64xf32>
    %64 = arith.mulf %62, %63 : vector<1x16x3x64xf32>
    %65 = vector.broadcast %1 : vector<1x1x1x64xf32> to vector<1x16x3x64xf32>
    %66 = arith.addf %64, %65 : vector<1x16x3x64xf32>
    %cst_62 = arith.constant 0.000000e+00 : f32
    %67 = vector.broadcast %cst_62 : f32 to vector<1x16x3x64xf32>
    %68 = arith.maximumf %66, %67 : vector<1x16x3x64xf32>
    %cst_63 = arith.constant dense<0xFF800000> : vector<1x16x64xf32>
    %69 = vector.multi_reduction <maximumf>, %68, %cst_63 [2] : vector<1x16x3x64xf32> to vector<1x16x64xf32>
    %70 = vector.shape_cast %69 : vector<1x16x64xf32> to vector<1x16x1x64xf32>
    %c0_64 = arith.constant 0 : index
    %c0_65 = arith.constant 0 : index
    %c6 = arith.constant 6 : index
    %c0_66 = arith.constant 0 : index
    %71 = vector.load %arg5[%c0_64, %c0_65, %c6, %c0_66] : memref<1x16x8x64xf32, #tpu.memory_space<vmem>>, vector<1x16x1x64xf32>
    tpu.vector_store %arg5[%c0_64, %c0_65, %c6, %c0_66], %70 {strides = array<i32>} : memref<1x16x8x64xf32, #tpu.memory_space<vmem>>, vector<1x16x1x64xf32>,
    %c0_67 = arith.constant 0 : index
    %c0_68 = arith.constant 0 : index
    %c13 = arith.constant 13 : index
    %c0_69 = arith.constant 0 : index
    %72 = vector.load %arg1[%c0_67, %c0_68, %c13, %c0_69] : memref<1x16x16x64xf32, #tpu.memory_space<vmem>>, vector<1x16x3x64xf32>
    %73 = vector.broadcast %0 : vector<1x1x1x64xf32> to vector<1x16x3x64xf32>
    %74 = arith.mulf %72, %73 : vector<1x16x3x64xf32>
    %75 = vector.broadcast %1 : vector<1x1x1x64xf32> to vector<1x16x3x64xf32>
    %76 = arith.addf %74, %75 : vector<1x16x3x64xf32>
    %cst_70 = arith.constant 0.000000e+00 : f32
    %77 = vector.broadcast %cst_70 : f32 to vector<1x16x3x64xf32>
    %78 = arith.maximumf %76, %77 : vector<1x16x3x64xf32>
    %cst_71 = arith.constant dense<0xFF800000> : vector<1x16x64xf32>
    %79 = vector.multi_reduction <maximumf>, %78, %cst_71 [2] : vector<1x16x3x64xf32> to vector<1x16x64xf32>
    %80 = vector.shape_cast %79 : vector<1x16x64xf32> to vector<1x16x1x64xf32>
    %c0_72 = arith.constant 0 : index
    %c0_73 = arith.constant 0 : index
    %c7_74 = arith.constant 7 : index
    %c0_75 = arith.constant 0 : index
    %81 = vector.load %arg5[%c0_72, %c0_73, %c7_74, %c0_75] : memref<1x16x8x64xf32, #tpu.memory_space<vmem>>, vector<1x16x1x64xf32>
    tpu.vector_store %arg5[%c0_72, %c0_73, %c7_74, %c0_75], %80 {strides = array<i32>} : memref<1x16x8x64xf32, #tpu.memory_space<vmem>>, vector<1x16x1x64xf32>,
    %c0_76 = arith.constant 0 : index
    %c0_77 = arith.constant 0 : index
    %c0_78 = arith.constant 0 : index
    %c0_79 = arith.constant 0 : index
    %82 = vector.load %arg5[%c0_76, %c0_77, %c0_78, %c0_79] : memref<1x16x8x64xf32, #tpu.memory_space<vmem>>, vector<1x2x8x64xf32>
    %cst_80 = arith.constant dense<0xFF800000> : vector<1x8x64xf32>
    %83 = vector.multi_reduction <maximumf>, %82, %cst_80 [1] : vector<1x2x8x64xf32> to vector<1x8x64xf32>
    %84 = vector.shape_cast %83 : vector<1x8x64xf32> to vector<1x1x8x64xf32>
    %c0_81 = arith.constant 0 : index
    %c0_82 = arith.constant 0 : index
    %c0_83 = arith.constant 0 : index
    %c0_84 = arith.constant 0 : index
    %85 = vector.load %arg4[%c0_81, %c0_82, %c0_83, %c0_84] : memref<1x8x8x64xf32, #tpu.memory_space<vmem>>, vector<1x1x8x64xf32>
    tpu.vector_store %arg4[%c0_81, %c0_82, %c0_83, %c0_84], %84 {strides = array<i32>} : memref<1x8x8x64xf32, #tpu.memory_space<vmem>>, vector<1x1x8x64xf32>,
    %c0_85 = arith.constant 0 : index
    %c1_86 = arith.constant 1 : index
    %c0_87 = arith.constant 0 : index
    %c0_88 = arith.constant 0 : index
    %86 = vector.load %arg5[%c0_85, %c1_86, %c0_87, %c0_88] : memref<1x16x8x64xf32, #tpu.memory_space<vmem>>, vector<1x3x8x64xf32>
    %cst_89 = arith.constant dense<0xFF800000> : vector<1x8x64xf32>
    %87 = vector.multi_reduction <maximumf>, %86, %cst_89 [1] : vector<1x3x8x64xf32> to vector<1x8x64xf32>
    %88 = vector.shape_cast %87 : vector<1x8x64xf32> to vector<1x1x8x64xf32>
    %c0_90 = arith.constant 0 : index
    %c1_91 = arith.constant 1 : index
    %c0_92 = arith.constant 0 : index
    %c0_93 = arith.constant 0 : index
    %89 = vector.load %arg4[%c0_90, %c1_91, %c0_92, %c0_93] : memref<1x8x8x64xf32, #tpu.memory_space<vmem>>, vector<1x1x8x64xf32>
    tpu.vector_store %arg4[%c0_90, %c1_91, %c0_92, %c0_93], %88 {strides = array<i32>} : memref<1x8x8x64xf32, #tpu.memory_space<vmem>>, vector<1x1x8x64xf32>,
    %c0_94 = arith.constant 0 : index
    %c3_95 = arith.constant 3 : index
    %c0_96 = arith.constant 0 : index
    %c0_97 = arith.constant 0 : index
    %90 = vector.load %arg5[%c0_94, %c3_95, %c0_96, %c0_97] : memref<1x16x8x64xf32, #tpu.memory_space<vmem>>, vector<1x3x8x64xf32>
    %cst_98 = arith.constant dense<0xFF800000> : vector<1x8x64xf32>
    %91 = vector.multi_reduction <maximumf>, %90, %cst_98 [1] : vector<1x3x8x64xf32> to vector<1x8x64xf32>
    %92 = vector.shape_cast %91 : vector<1x8x64xf32> to vector<1x1x8x64xf32>
    %c0_99 = arith.constant 0 : index
    %c2_100 = arith.constant 2 : index
    %c0_101 = arith.constant 0 : index
    %c0_102 = arith.constant 0 : index
    %93 = vector.load %arg4[%c0_99, %c2_100, %c0_101, %c0_102] : memref<1x8x8x64xf32, #tpu.memory_space<vmem>>, vector<1x1x8x64xf32>
    tpu.vector_store %arg4[%c0_99, %c2_100, %c0_101, %c0_102], %92 {strides = array<i32>} : memref<1x8x8x64xf32, #tpu.memory_space<vmem>>, vector<1x1x8x64xf32>,
    %c0_103 = arith.constant 0 : index
    %c5_104 = arith.constant 5 : index
    %c0_105 = arith.constant 0 : index
    %c0_106 = arith.constant 0 : index
    %94 = vector.load %arg5[%c0_103, %c5_104, %c0_105, %c0_106] : memref<1x16x8x64xf32, #tpu.memory_space<vmem>>, vector<1x3x8x64xf32>
    %cst_107 = arith.constant dense<0xFF800000> : vector<1x8x64xf32>
    %95 = vector.multi_reduction <maximumf>, %94, %cst_107 [1] : vector<1x3x8x64xf32> to vector<1x8x64xf32>
    %96 = vector.shape_cast %95 : vector<1x8x64xf32> to vector<1x1x8x64xf32>
    %c0_108 = arith.constant 0 : index
    %c3_109 = arith.constant 3 : index
    %c0_110 = arith.constant 0 : index
    %c0_111 = arith.constant 0 : index
    %97 = vector.load %arg4[%c0_108, %c3_109, %c0_110, %c0_111] : memref<1x8x8x64xf32, #tpu.memory_space<vmem>>, vector<1x1x8x64xf32>
    tpu.vector_store %arg4[%c0_108, %c3_109, %c0_110, %c0_111], %96 {strides = array<i32>} : memref<1x8x8x64xf32, #tpu.memory_space<vmem>>, vector<1x1x8x64xf32>,
    %c0_112 = arith.constant 0 : index
    %c7_113 = arith.constant 7 : index
    %c0_114 = arith.constant 0 : index
    %c0_115 = arith.constant 0 : index
    %98 = vector.load %arg5[%c0_112, %c7_113, %c0_114, %c0_115] : memref<1x16x8x64xf32, #tpu.memory_space<vmem>>, vector<1x3x8x64xf32>
    %cst_116 = arith.constant dense<0xFF800000> : vector<1x8x64xf32>
    %99 = vector.multi_reduction <maximumf>, %98, %cst_116 [1] : vector<1x3x8x64xf32> to vector<1x8x64xf32>
    %100 = vector.shape_cast %99 : vector<1x8x64xf32> to vector<1x1x8x64xf32>
    %c0_117 = arith.constant 0 : index
    %c4_118 = arith.constant 4 : index
    %c0_119 = arith.constant 0 : index
    %c0_120 = arith.constant 0 : index
    %101 = vector.load %arg4[%c0_117, %c4_118, %c0_119, %c0_120] : memref<1x8x8x64xf32, #tpu.memory_space<vmem>>, vector<1x1x8x64xf32>
    tpu.vector_store %arg4[%c0_117, %c4_118, %c0_119, %c0_120], %100 {strides = array<i32>} : memref<1x8x8x64xf32, #tpu.memory_space<vmem>>, vector<1x1x8x64xf32>,
    %c0_121 = arith.constant 0 : index
    %c9_122 = arith.constant 9 : index
    %c0_123 = arith.constant 0 : index
    %c0_124 = arith.constant 0 : index
    %102 = vector.load %arg5[%c0_121, %c9_122, %c0_123, %c0_124] : memref<1x16x8x64xf32, #tpu.memory_space<vmem>>, vector<1x3x8x64xf32>
    %cst_125 = arith.constant dense<0xFF800000> : vector<1x8x64xf32>
    %103 = vector.multi_reduction <maximumf>, %102, %cst_125 [1] : vector<1x3x8x64xf32> to vector<1x8x64xf32>
    %104 = vector.shape_cast %103 : vector<1x8x64xf32> to vector<1x1x8x64xf32>
    %c0_126 = arith.constant 0 : index
    %c5_127 = arith.constant 5 : index
    %c0_128 = arith.constant 0 : index
    %c0_129 = arith.constant 0 : index
    %105 = vector.load %arg4[%c0_126, %c5_127, %c0_128, %c0_129] : memref<1x8x8x64xf32, #tpu.memory_space<vmem>>, vector<1x1x8x64xf32>
    tpu.vector_store %arg4[%c0_126, %c5_127, %c0_128, %c0_129], %104 {strides = array<i32>} : memref<1x8x8x64xf32, #tpu.memory_space<vmem>>, vector<1x1x8x64xf32>,
    %c0_130 = arith.constant 0 : index
    %c11_131 = arith.constant 11 : index
    %c0_132 = arith.constant 0 : index
    %c0_133 = arith.constant 0 : index
    %106 = vector.load %arg5[%c0_130, %c11_131, %c0_132, %c0_133] : memref<1x16x8x64xf32, #tpu.memory_space<vmem>>, vector<1x3x8x64xf32>
    %cst_134 = arith.constant dense<0xFF800000> : vector<1x8x64xf32>
    %107 = vector.multi_reduction <maximumf>, %106, %cst_134 [1] : vector<1x3x8x64xf32> to vector<1x8x64xf32>
    %108 = vector.shape_cast %107 : vector<1x8x64xf32> to vector<1x1x8x64xf32>
    %c0_135 = arith.constant 0 : index
    %c6_136 = arith.constant 6 : index
    %c0_137 = arith.constant 0 : index
    %c0_138 = arith.constant 0 : index
    %109 = vector.load %arg4[%c0_135, %c6_136, %c0_137, %c0_138] : memref<1x8x8x64xf32, #tpu.memory_space<vmem>>, vector<1x1x8x64xf32>
    tpu.vector_store %arg4[%c0_135, %c6_136, %c0_137, %c0_138], %108 {strides = array<i32>} : memref<1x8x8x64xf32, #tpu.memory_space<vmem>>, vector<1x1x8x64xf32>,
    %c0_139 = arith.constant 0 : index
    %c13_140 = arith.constant 13 : index
    %c0_141 = arith.constant 0 : index
    %c0_142 = arith.constant 0 : index
    %110 = vector.load %arg5[%c0_139, %c13_140, %c0_141, %c0_142] : memref<1x16x8x64xf32, #tpu.memory_space<vmem>>, vector<1x3x8x64xf32>
    %cst_143 = arith.constant dense<0xFF800000> : vector<1x8x64xf32>
    %111 = vector.multi_reduction <maximumf>, %110, %cst_143 [1] : vector<1x3x8x64xf32> to vector<1x8x64xf32>
    %112 = vector.shape_cast %111 : vector<1x8x64xf32> to vector<1x1x8x64xf32>
    %c0_144 = arith.constant 0 : index
    %c7_145 = arith.constant 7 : index
    %c0_146 = arith.constant 0 : index
    %c0_147 = arith.constant 0 : index
    %113 = vector.load %arg4[%c0_144, %c7_145, %c0_146, %c0_147] : memref<1x8x8x64xf32, #tpu.memory_space<vmem>>, vector<1x1x8x64xf32>
    tpu.vector_store %arg4[%c0_144, %c7_145, %c0_146, %c0_147], %112 {strides = array<i32>} : memref<1x8x8x64xf32, #tpu.memory_space<vmem>>, vector<1x1x8x64xf32>,
    return
  }
  func.func @transform_0(%arg0: i32) -> (i32, i32, i32, i32) {
    %c0_i32 = arith.constant 0 : i32
    %c0_i32_0 = arith.constant 0 : i32
    %c0_i32_1 = arith.constant 0 : i32
    %c0_i32_2 = arith.constant 0 : i32
    return %arg0, %c0_i32, %c0_i32_0, %c0_i32_1 : i32, i32, i32, i32
  }
  func.func @transform_1(%arg0: i32) -> (i32, i32, i32, i32) {
    %c0_i32 = arith.constant 0 : i32
    %c0_i32_0 = arith.constant 0 : i32
    %c0_i32_1 = arith.constant 0 : i32
    %c0_i32_2 = arith.constant 0 : i32
    %c0_i32_3 = arith.constant 0 : i32
    return %c0_i32, %c0_i32_0, %c0_i32_1, %c0_i32_2 : i32, i32, i32, i32
  }
  func.func @transform_2(%arg0: i32) -> (i32, i32, i32, i32) {
    %c0_i32 = arith.constant 0 : i32
    %c0_i32_0 = arith.constant 0 : i32
    %c0_i32_1 = arith.constant 0 : i32
    %c0_i32_2 = arith.constant 0 : i32
    %c0_i32_3 = arith.constant 0 : i32
    return %c0_i32, %c0_i32_0, %c0_i32_1, %c0_i32_2 : i32, i32, i32, i32
  }
  func.func @transform_3(%arg0: i32) -> (i32, i32, i32, i32) {
    %c0_i32 = arith.constant 0 : i32
    %c0_i32_0 = arith.constant 0 : i32
    %c0_i32_1 = arith.constant 0 : i32
    %c0_i32_2 = arith.constant 0 : i32
    return %arg0, %c0_i32, %c0_i32_0, %c0_i32_1 : i32, i32, i32, i32
  }
}

module attributes {stable_mosaic.version = 11 : i64} {
  func.func @_mul_kernel(%arg0: memref<64x128xf32, #tpu.memory_space<vmem>>, %arg1: memref<64x128xf32, #tpu.memory_space<vmem>>, %arg2: memref<64x128xf32, #tpu.memory_space<vmem>>) attributes {dimension_semantics = [], scalar_prefetch = 0 : i64, scratch_operands = 0 : i64, tpu.core_type = #tpu.core_type<tc>} {
    %c0 = arith.constant 0 : index
    %c0_0 = arith.constant 0 : index
    %0 = vector.load %arg0[%c0, %c0_0] : memref<64x128xf32, #tpu.memory_space<vmem>>, vector<64x128xf32>
    %c0_1 = arith.constant 0 : index
    %c0_2 = arith.constant 0 : index
    %1 = vector.load %arg1[%c0_1, %c0_2] : memref<64x128xf32, #tpu.memory_space<vmem>>, vector<64x128xf32>
    %2 = arith.mulf %0, %1 : vector<64x128xf32>
    %c0_3 = arith.constant 0 : index
    %c0_4 = arith.constant 0 : index
    %3 = vector.load %arg2[%c0_3, %c0_4] : memref<64x128xf32, #tpu.memory_space<vmem>>, vector<64x128xf32>
    tpu.vector_store %arg2[%c0_3, %c0_4], %2 {strides = array<i32>} : memref<64x128xf32, #tpu.memory_space<vmem>>, vector<64x128xf32>,
    return
  }
}

</mosaic_0001>

<bundles_post_ra>
// kernel: resnet_forward.3
= control target key start
LH: loop header
LB: loop body
LE: loop exit
PB: predicated region body
PF: predicated region fallthrough
CT: control target
= control target key end

     0   :  { %s1214_s15 = smov 0   ;;  %s1557_s0 = inlined_call_operand.vmem [shape: bf16[512,147], index: 0, kind: input, shape index: {}]   ;;  %s1558_s1 = inlined_call_operand.vmem [shape: bf16[147,64], index: 1, kind: input, shape index: {}]   ;;  %s1559_s2 = inlined_call_operand.vmem [shape: f32[512,64], index: 2, kind: output, shape index: {0}]   ;;  %s1560_s3 = inlined_call_operand.vmem [shape: f32[16,64], index: 3, kind: output, shape index: {1}]   ;;  %s1561_s4 = inlined_call_operand.vmem [shape: f32[16,64], index: 4, kind: output, shape index: {2}]  }
   0x1 LB: > { %s1220_s16 = sadd.s32 4294967295, %s1185_s15   ;;  %p1022_p0 = scmp.ge.s32.totalorder %s1185_s15, 1  ;;  %s1185_s15 = sphi %s1214_s15, %s15_s15  }
   0x2   : > { %p169_p1 = scmp.lt.s32.totalorder %s1185_s15, 3 }
   0x4   : > { %p170_p2 = pnand %p1022_p0, %p169_p1 }
   0x5   : > { %v1121_v0 = vld [vmem:[%s1558_s1] sm:$0xff] (!%p170_p2)   ;;  %v1187_v1 = vmov (!%p170_p2), 0   ;;  %v1122_v2 = vld [vmem:[%s1558_s1 + $0x8] sm:$0xff] (!%p170_p2)   ;;  %v1123_v3 = vld [vmem:[%s1558_s1 + $0x10] sm:$0xff] (!%p170_p2)   ;;  %s1023_s23 = sshll.u32 (!%p170_p2), %s1220_s16, 5  ;;  %vm478_vm0 = vcmask (!%p170_p2), 154624  }
   0x6   : > { %173 = sbr.rel (%p170_p2) target bundleno = 366 (0x16e), region = 28  ;;  %534 = vmatprep.subr.bf16.mxu0 (!%p170_p2), %v1187_v1  ;;  %1091 = vmatprep.subr.bf16.mxu1 (!%p170_p2), %v1187_v1  ;;  %p205_p3 = scmp.lt.s32.totalorder (!%p170_p2), %s1023_s23, 63  ;;  %v1124_v4 = vld [vmem:[%s1558_s1 + $0x18] sm:$0xff] (!%p170_p2)   ;;  %v1125_v5 = vld [vmem:[%s1558_s1 + $0x20] sm:$0xff] (!%p170_p2)   ;;  %v1126_v7 = vld [vmem:[%s1558_s1 + $0x28] sm:$0xff] (!%p170_p2)   ;;  %vm527_vm1 = vcmask (!%p170_p2), 1040384  }
   0x7   : > { %535 = vmatpush1.bf16.msra.mxu0 (!%p170_p2), %v1121_v0  ;;  %1101 = vmatpush1.bf16.msra.mxu1 (!%p170_p2), %v1121_v0  ;;  %v1127_v9 = vld [vmem:[%s1558_s1 + $0x30] sm:$0xff] (!%p170_p2)   ;;  %v1128_v10 = vld [vmem:[%s1558_s1 + $0x38] sm:$0xff] (!%p170_p2)   ;;  %vm528_vm2 = vcmask (!%p170_p2), 1041408   ;;  %v1188_v11 = vmov (!%p170_p2), 65535   ;;  %v1129_v13 = vld [vmem:[%s1558_s1 + $0x40] sm:$0xff] (!%p170_p2)   ;;  %vm695_vm3 = vcmask (!%p170_p2), 523264  }
   0x8   : > { %536 = vmatprep.subr.bf16.mxu0 (!%p170_p2), %v1187_v1  ;;  %1092 = vmatprep.subr.bf16.mxu1 (!%p170_p2), %v1187_v1  ;;  %v529_v12 = vsel (!%p170_p2), %vm527_vm1, 4294967295, %v1188_v11  ;;  %v1130_v14 = vld [vmem:[%s1558_s1 + $0x48] ss:$0 sps:$4 sm:$0x33] (!%p170_p2)   ;;  %p217_p4 = scmp.lt.s32.totalorder (!%p170_p2), %s1220_s16, 1 }
   0x9   : > { %v530_v15 = vsel (!%p170_p2), %vm528_vm2, %v529_v12, 0 }
   0xa   : > { %v532_v16 = vand.u32 (!%p170_p2), %v1130_v14, %v530_v15 }
   0xb   : > { %537 = vmatpush1.bf16.msra.mxu0 (!%p170_p2), %v1122_v2  ;;  %1102 = vmatpush1.bf16.msra.mxu1 (!%p170_p2), %v1122_v2 }
   0xc   : > { %538 = vmatprep.subr.bf16.mxu0 (!%p170_p2), %v1187_v1  ;;  %1093 = vmatprep.subr.bf16.mxu1 (!%p170_p2), %v1187_v1 }
   0xd   : > { %s1563_s23 = smov (!%p205_p3, %s1023_s23), 63  ;;  %s1565_s16 = smov (!%p217_p4, %s1220_s16), 1 }
   0xe   : > { %s1090_s26 = sshll.u32 %s1563_s23, 3  ;;  %s1028_s21 = sshll.u32 %s1565_s16, 3 }
   0xf   : > { %539 = vmatpush1.bf16.msra.mxu0 %v1123_v3  ;;  %1103 = vmatpush1.bf16.msra.mxu1 %v1123_v3  ;;  %s1245_s29 = scalar_lea.vmem %s1557_s0, %s1090_s26  ;;  %s1318_s20 = scalar_lea.vmem %s1559_s2, %s1090_s26 }
  0x10   : > { %540 = vmatprep.subr.bf16.mxu0 %v1187_v1  ;;  %1094 = vmatprep.subr.bf16.mxu1 %v1187_v1  ;;  %v1133_v6 = vld [vmem:[%s1245_s29 + $0x4] ss:$8 sps:$4 sm:$0xff]   ;;  %v1131_v17 = vld [vmem:[%s1245_s29] ss:$8 sps:$4 sm:$0xff]   ;;  %v1134_v19 = vld [vmem:[%s1245_s29 + $0x14] ss:$8 sps:$4 sm:$0xff]   ;;  %s220_s24 = scalar_lea.vmem %s1560_s3, %s1028_s21  ;;  %s224_s27 = scalar_lea.vmem %s1561_s4, %s1028_s21 }
  0x11   : > { %1072 = vmatprep.mubr.msk.bf16.mxu0 %vm478_vm0, %v1133_v6  ;;  %v1145_v8 = vld [vmem:[%s1245_s29 + $0x84] ss:$8 sps:$4 sm:$0xff]   ;;  %v1143_v18 = vld [vmem:[%s1245_s29 + $0x80] ss:$8 sps:$4 sm:$0xff]   ;;  %v1149_v20 = vld [vmem:[%s1245_s29 + $0x94] ss:$8 sps:$4 sm:$0xff]  }
  0x12   : > { %1080 = vmatprep.mubr.msk.bf16.mxu1 %vm478_vm0, %v1145_v8  ;;  %v1136_v21 = vld [vmem:[%s1245_s29 + $0x10] ss:$8 sps:$4 sm:$0xff]   ;;  %v1137_v23 = vld [vmem:[%s1245_s29 + $0x24] ss:$8 sps:$4 sm:$0xff]   ;;  %v1139_v25 = vld [vmem:[%s1245_s29 + $0x20] ss:$8 sps:$4 sm:$0xff]  }
  0x13   : > { %541 = vmatpush1.bf16.msra.mxu0 %v1124_v4  ;;  %1104 = vmatpush1.bf16.msra.mxu1 %v1124_v4  ;;  %v1151_v22 = vld [vmem:[%s1245_s29 + $0x90] ss:$8 sps:$4 sm:$0xff]   ;;  %v1155_v24 = vld [vmem:[%s1245_s29 + $0xa4] ss:$8 sps:$4 sm:$0xff]   ;;  %v1157_v26 = vld [vmem:[%s1245_s29 + $0xa0] ss:$8 sps:$4 sm:$0xff]  }
  0x14   : > { %542 = vmatprep.subr.bf16.mxu0 %v1187_v1  ;;  %1095 = vmatprep.subr.bf16.mxu1 %v1187_v1  ;;  %v1140_v27 = vld [vmem:[%s1245_s29 + $0x34] ss:$8 sps:$4 sm:$0xff]   ;;  %v1142_v29 = vld [vmem:[%s1245_s29 + $0x30] ss:$8 sps:$4 sm:$0xff]   ;;  %v1146_v31 = vld [vmem:[%s1245_s29 + $0x44] ss:$8 sps:$4 sm:$0xff]  }
  0x15   : > { %v1161_v28 = vld [vmem:[%s1245_s29 + $0xb4] ss:$8 sps:$4 sm:$0xff]   ;;  %v1163_v30 = vld [vmem:[%s1245_s29 + $0xb0] ss:$8 sps:$4 sm:$0xff]   ;;  %v1167_v32 = vld [vmem:[%s1245_s29 + $0xc4] ss:$8 sps:$4 sm:$0xff]  }
  0x16   : > { %v1148_v33 = vld [vmem:[%s1245_s29 + $0x40] ss:$8 sps:$4 sm:$0xff]   ;;  %v1152_v35 = vld [vmem:[%s1245_s29 + $0x54] ss:$8 sps:$4 sm:$0xff]   ;;  %v1154_v37 = vld [vmem:[%s1245_s29 + $0x50] ss:$8 sps:$4 sm:$0xff]  }
  0x17   : > { %543 = vmatpush1.bf16.msra.mxu0 %v1125_v5  ;;  %1105 = vmatpush1.bf16.msra.mxu1 %v1125_v5  ;;  %v1169_v34 = vld [vmem:[%s1245_s29 + $0xc0] ss:$8 sps:$4 sm:$0xff]   ;;  %v1170_v36 = vld [vmem:[%s1245_s29 + $0xd4] ss:$8 sps:$4 sm:$0xff]   ;;  %v1172_v38 = vld [vmem:[%s1245_s29 + $0xd0] ss:$8 sps:$4 sm:$0xff]  }
  0x18   : > { %544 = vmatprep.subr.bf16.mxu0 %v1187_v1  ;;  %1096 = vmatprep.subr.bf16.mxu1 %v1187_v1  ;;  %v1158_v39 = vld [vmem:[%s1245_s29 + $0x64] ss:$8 sps:$4 sm:$0xff]   ;;  %v1160_v41 = vld [vmem:[%s1245_s29 + $0x60] ss:$8 sps:$4 sm:$0xff]   ;;  %v1164_v43 = vld [vmem:[%s1245_s29 + $0x74] ss:$8 sps:$4 sm:$0xff]  }
  0x19   : > { %v1173_v40 = vld [vmem:[%s1245_s29 + $0xe4] ss:$8 sps:$4 sm:$0xff]   ;;  %v1175_v42 = vld [vmem:[%s1245_s29 + $0xe0] ss:$8 sps:$4 sm:$0xff]   ;;  %v1176_v44 = vld [vmem:[%s1245_s29 + $0xf4] ss:$8 sps:$4 sm:$0xff]  }
  0x1a   : > { %v1166_v45 = vld [vmem:[%s1245_s29 + $0x70] ss:$8 sps:$4 sm:$0xff]  }
  0x1b   : > { %545 = vmatpush1.bf16.msra.mxu0 %v1126_v7  ;;  %1106 = vmatpush1.bf16.msra.mxu1 %v1126_v7  ;;  %v1178_v46 = vld [vmem:[%s1245_s29 + $0xf0] ss:$8 sps:$4 sm:$0xff]  }
  0x1c   : > { %546 = vmatprep.subr.bf16.mxu0 %v1187_v1  ;;  %1097 = vmatprep.subr.bf16.mxu1 %v1187_v1 }
  0x1f   : > { %547 = vmatpush1.bf16.msra.mxu0 %v1127_v9  ;;  %1107 = vmatpush1.bf16.msra.mxu1 %v1127_v9 }
  0x20   : > { %548 = vmatprep.subr.bf16.mxu0 %v1187_v1  ;;  %1098 = vmatprep.subr.bf16.mxu1 %v1187_v1 }
  0x23   : > { %549 = vmatpush1.bf16.msra.mxu0 %v1128_v10  ;;  %1108 = vmatpush1.bf16.msra.mxu1 %v1128_v10 }
  0x24   : > { %550 = vmatprep.subr.bf16.mxu0 %v1187_v1  ;;  %1099 = vmatprep.subr.bf16.mxu1 %v1187_v1 }
  0x27   : > { %551 = vmatpush1.bf16.msra.mxu0 %v1129_v13  ;;  %1109 = vmatpush1.bf16.msra.mxu1 %v1129_v13 }
  0x28   : > { %552 = vmatprep.subr.bf16.mxu0 %v1187_v1  ;;  %1100 = vmatprep.subr.bf16.mxu1 %v1187_v1 }
  0x2b   : > { %553 = vmatpush1.bf16.msra.mxu0 %v532_v16  ;;  %1110 = vmatpush1.bf16.msra.mxu1 %v532_v16 }
  0x2e   : > { %567 = vmatmul.mubr.bf16.vlgmr.msra.gmra.mrb[0].mxu0 %v1131_v17  ;;  %631 = vmatmul.mubr.bf16.vlgmr.msra.gmra.mrb[0].mxu1 %v1143_v18 }
  0x2f   : > { %1073 = vmatprep.mubr.msk.bf16.mxu0 %vm478_vm0, %v1134_v19  ;;  %1081 = vmatprep.mubr.msk.bf16.mxu1 %vm478_vm0, %v1149_v20 }
  0x36   : > { %575 = vmatmul.mubr.bf16.gmra.mrb[4].mxu0 %v1136_v21  ;;  %639 = vmatmul.mubr.bf16.gmra.mrb[4].mxu1 %v1151_v22 }
  0x37   : > { %1074 = vmatprep.mubr.msk.bf16.mxu0 %vm478_vm0, %v1137_v23  ;;  %1082 = vmatprep.mubr.msk.bf16.mxu1 %vm478_vm0, %v1155_v24 }
  0x3e   : > { %583 = vmatmul.mubr.bf16.gmra.mrb[8].mxu0 %v1139_v25  ;;  %647 = vmatmul.mubr.bf16.gmra.mrb[8].mxu1 %v1157_v26 }
  0x3f   : > { %1075 = vmatprep.mubr.msk.bf16.mxu0 %vm478_vm0, %v1140_v27  ;;  %1083 = vmatprep.mubr.msk.bf16.mxu1 %vm478_vm0, %v1161_v28 }
  0x46   : > { %591 = vmatmul.mubr.bf16.gmra.mrb[12].mxu0 %v1142_v29  ;;  %655 = vmatmul.mubr.bf16.gmra.mrb[12].mxu1 %v1163_v30 }
  0x47   : > { %1076 = vmatprep.mubr.msk.bf16.mxu0 %vm478_vm0, %v1146_v31  ;;  %1084 = vmatprep.mubr.msk.bf16.mxu1 %vm478_vm0, %v1167_v32 }
  0x4e   : > { %599 = vmatmul.mubr.bf16.gmra.mrb[16].mxu0 %v1148_v33  ;;  %663 = vmatmul.mubr.bf16.gmra.mrb[16].mxu1 %v1169_v34 }
  0x4f   : > { %1077 = vmatprep.mubr.msk.bf16.mxu0 %vm478_vm0, %v1152_v35  ;;  %1085 = vmatprep.mubr.msk.bf16.mxu1 %vm478_vm0, %v1170_v36 }
  0x56   : > { %607 = vmatmul.mubr.bf16.gmra.mrb[20].mxu0 %v1154_v37  ;;  %671 = vmatmul.mubr.bf16.gmra.mrb[20].mxu1 %v1172_v38 }
  0x57   : > { %1078 = vmatprep.mubr.msk.bf16.mxu0 %vm478_vm0, %v1158_v39  ;;  %1086 = vmatprep.mubr.msk.bf16.mxu1 %vm478_vm0, %v1173_v40 }
  0x5e   : > { %615 = vmatmul.mubr.bf16.gmra.mrb[24].mxu0 %v1160_v41  ;;  %679 = vmatmul.mubr.bf16.gmra.mrb[24].mxu1 %v1175_v42 }
  0x5f   : > { %1079 = vmatprep.mubr.msk.bf16.mxu0 %vm478_vm0, %v1164_v43  ;;  %1087 = vmatprep.mubr.msk.bf16.mxu1 %vm478_vm0, %v1176_v44 }
  0x66   : > { %623 = vmatmul.mubr.bf16.gmra.mrb[28].mxu0 %v1166_v45  ;;  %687 = vmatmul.mubr.bf16.gmra.mrb[28].mxu1 %v1178_v46 }
 0x101   : > { %v568_v47 = vpop.f32.mrb[0].mxu0  ;;  %v1320_v48 = vpop.f32.mrb[0].mxu1 }
 0x102   : > { %696 = vst.msk [vmem:[%s1318_s20] sm:$0xff] %vm695_vm3, %v568_v47  ;;  %v797_v49 = vmul.f32 %v568_v47, %v568_v47  ;;  %v570_v50 = vpop.f32.mrb[1].mxu0  ;;  %712 = vst.msk [vmem:[%s1318_s20 + $0x80] sm:$0xff] %vm695_vm3, %v1320_v48  ;;  %v634_v51 = vpop.f32.mrb[1].mxu1  ;;  %v728_v54 = vsel %vm695_vm3, %v568_v47, 0.0 }
 0x103   : > { %v571_v52 = vpop.f32.mrb[2].mxu0  ;;  %v1327_v53 = vpop.f32.mrb[2].mxu1 }
 0x104   : > { %697 = vst.msk [vmem:[%s1318_s20 + $0x8] sm:$0xff] %vm695_vm3, %v571_v52  ;;  %v729_v55 = vsel %vm695_vm3, %v571_v52, 0.0  ;;  %v798_v56 = vmul.f32 %v571_v52, %v571_v52  ;;  %v573_v57 = vpop.f32.mrb[3].mxu0  ;;  %713 = vst.msk [vmem:[%s1318_s20 + $0x88] sm:$0xff] %vm695_vm3, %v1327_v53  ;;  %v637_v58 = vpop.f32.mrb[3].mxu1  ;;  %v829_v60 = vsel %vm695_vm3, %v797_v49, 0.0 }
 0x105   : > { %v730_v59 = vadd.f32 %v729_v55, %v728_v54 }
 0x106   : > { %v830_v61 = vsel %vm695_vm3, %v798_v56, 0.0 }
 0x107   : > { %v831_v62 = vadd.f32 %v830_v61, %v829_v60 }
 0x109   : > { %v576_v63 = vpop.f32.mrb[4].mxu0  ;;  %v1338_v0 = vpop.f32.mrb[4].mxu1 }
 0x10a   : > { %698 = vst.msk [vmem:[%s1318_s20 + $0x10] sm:$0xff] %vm695_vm3, %v576_v63  ;;  %v731_v1 = vsel %vm695_vm3, %v576_v63, 0.0  ;;  %v799_v2 = vmul.f32 %v576_v63, %v576_v63  ;;  %v578_v3 = vpop.f32.mrb[5].mxu0  ;;  %714 = vst.msk [vmem:[%s1318_s20 + $0x90] sm:$0xff] %vm695_vm3, %v1338_v0  ;;  %v642_v4 = vpop.f32.mrb[5].mxu1 }
 0x10b   : > { %v732_v5 = vadd.f32 %v731_v1, %v730_v59  ;;  %v579_v6 = vpop.f32.mrb[6].mxu0  ;;  %v1346_v7 = vpop.f32.mrb[6].mxu1 }
 0x10c   : > { %v832_v8 = vsel %vm695_vm3, %v799_v2, 0.0  ;;  %699 = vst.msk [vmem:[%s1318_s20 + $0x18] sm:$0xff] %vm695_vm3, %v579_v6  ;;  %v733_v9 = vsel %vm695_vm3, %v579_v6, 0.0  ;;  %v800_v10 = vmul.f32 %v579_v6, %v579_v6  ;;  %v581_v11 = vpop.f32.mrb[7].mxu0  ;;  %715 = vst.msk [vmem:[%s1318_s20 + $0x98] sm:$0xff] %vm695_vm3, %v1346_v7  ;;  %v645_v12 = vpop.f32.mrb[7].mxu1 }
 0x10d   : > { %v833_v13 = vadd.f32 %v832_v8, %v831_v62  ;;  %v734_v14 = vadd.f32 %v733_v9, %v732_v5 }
 0x10e   : > { %v834_v15 = vsel %vm695_vm3, %v800_v10, 0.0 }
 0x10f   : > { %v835_v16 = vadd.f32 %v834_v15, %v833_v13 }
 0x111   : > { %v584_v17 = vpop.f32.mrb[8].mxu0  ;;  %v1356_v18 = vpop.f32.mrb[8].mxu1 }
 0x112   : > { %700 = vst.msk [vmem:[%s1318_s20 + $0x20] sm:$0xff] %vm695_vm3, %v584_v17  ;;  %v735_v19 = vsel %vm695_vm3, %v584_v17, 0.0  ;;  %v801_v20 = vmul.f32 %v584_v17, %v584_v17  ;;  %v586_v21 = vpop.f32.mrb[9].mxu0  ;;  %716 = vst.msk [vmem:[%s1318_s20 + $0xa0] sm:$0xff] %vm695_vm3, %v1356_v18  ;;  %v650_v22 = vpop.f32.mrb[9].mxu1 }
 0x113   : > { %v736_v23 = vadd.f32 %v735_v19, %v734_v14  ;;  %v587_v24 = vpop.f32.mrb[10].mxu0  ;;  %v1364_v25 = vpop.f32.mrb[10].mxu1 }
 0x114   : > { %v836_v26 = vsel %vm695_vm3, %v801_v20, 0.0  ;;  %701 = vst.msk [vmem:[%s1318_s20 + $0x28] sm:$0xff] %vm695_vm3, %v587_v24  ;;  %v737_v27 = vsel %vm695_vm3, %v587_v24, 0.0  ;;  %v802_v28 = vmul.f32 %v587_v24, %v587_v24  ;;  %v589_v29 = vpop.f32.mrb[11].mxu0  ;;  %717 = vst.msk [vmem:[%s1318_s20 + $0xa8] sm:$0xff] %vm695_vm3, %v1364_v25  ;;  %v653_v30 = vpop.f32.mrb[11].mxu1 }
 0x115   : > { %v837_v31 = vadd.f32 %v836_v26, %v835_v16  ;;  %v738_v32 = vadd.f32 %v737_v27, %v736_v23 }
 0x116   : > { %v838_v33 = vsel %vm695_vm3, %v802_v28, 0.0 }
 0x117   : > { %v839_v34 = vadd.f32 %v838_v33, %v837_v31 }
 0x119   : > { %v592_v35 = vpop.f32.mrb[12].mxu0  ;;  %v1374_v36 = vpop.f32.mrb[12].mxu1 }
 0x11a   : > { %702 = vst.msk [vmem:[%s1318_s20 + $0x30] sm:$0xff] %vm695_vm3, %v592_v35  ;;  %v739_v37 = vsel %vm695_vm3, %v592_v35, 0.0  ;;  %v803_v38 = vmul.f32 %v592_v35, %v592_v35  ;;  %v594_v39 = vpop.f32.mrb[13].mxu0  ;;  %718 = vst.msk [vmem:[%s1318_s20 + $0xb0] sm:$0xff] %vm695_vm3, %v1374_v36  ;;  %v658_v40 = vpop.f32.mrb[13].mxu1 }
 0x11b   : > { %v740_v41 = vadd.f32 %v739_v37, %v738_v32  ;;  %v595_v42 = vpop.f32.mrb[14].mxu0  ;;  %v1382_v43 = vpop.f32.mrb[14].mxu1 }
 0x11c   : > { %v840_v44 = vsel %vm695_vm3, %v803_v38, 0.0  ;;  %703 = vst.msk [vmem:[%s1318_s20 + $0x38] sm:$0xff] %vm695_vm3, %v595_v42  ;;  %v741_v45 = vsel %vm695_vm3, %v595_v42, 0.0  ;;  %v804_v46 = vmul.f32 %v595_v42, %v595_v42  ;;  %v597_v47 = vpop.f32.mrb[15].mxu0  ;;  %719 = vst.msk [vmem:[%s1318_s20 + $0xb8] sm:$0xff] %vm695_vm3, %v1382_v43  ;;  %v661_v49 = vpop.f32.mrb[15].mxu1 }
 0x11d   : > { %v841_v50 = vadd.f32 %v840_v44, %v839_v34  ;;  %v742_v51 = vadd.f32 %v741_v45, %v740_v41 }
 0x11e   : > { %v842_v52 = vsel %vm695_vm3, %v804_v46, 0.0 }
 0x11f   : > { %v843_v54 = vadd.f32 %v842_v52, %v841_v50 }
 0x121   : > { %v600_v55 = vpop.f32.mrb[16].mxu0  ;;  %v1392_v56 = vpop.f32.mrb[16].mxu1 }
 0x122   : > { %704 = vst.msk [vmem:[%s1318_s20 + $0x40] sm:$0xff] %vm695_vm3, %v600_v55  ;;  %v743_v57 = vsel %vm695_vm3, %v600_v55, 0.0  ;;  %v805_v58 = vmul.f32 %v600_v55, %v600_v55  ;;  %v602_v59 = vpop.f32.mrb[17].mxu0  ;;  %720 = vst.msk [vmem:[%s1318_s20 + $0xc0] sm:$0xff] %vm695_vm3, %v1392_v56  ;;  %v666_v60 = vpop.f32.mrb[17].mxu1 }
 0x123   : > { %v744_v61 = vadd.f32 %v743_v57, %v742_v51  ;;  %v603_v62 = vpop.f32.mrb[18].mxu0  ;;  %v1400_v63 = vpop.f32.mrb[18].mxu1 }
 0x124   : > { %v844_v1 = vsel %vm695_vm3, %v805_v58, 0.0  ;;  %705 = vst.msk [vmem:[%s1318_s20 + $0x48] sm:$0xff] %vm695_vm3, %v603_v62  ;;  %v745_v2 = vsel %vm695_vm3, %v603_v62, 0.0  ;;  %v806_v3 = vmul.f32 %v603_v62, %v603_v62  ;;  %v605_v4 = vpop.f32.mrb[19].mxu0  ;;  %721 = vst.msk [vmem:[%s1318_s20 + $0xc8] sm:$0xff] %vm695_vm3, %v1400_v63  ;;  %v669_v5 = vpop.f32.mrb[19].mxu1 }
 0x125   : > { %v845_v6 = vadd.f32 %v844_v1, %v843_v54  ;;  %v746_v8 = vadd.f32 %v745_v2, %v744_v61  ;;  %v813_v1 = vmul.f32 %v1320_v48, %v1320_v48 }
 0x126   : > { %v846_v9 = vsel %vm695_vm3, %v806_v3, 0.0 }
 0x127   : > { %v847_v10 = vadd.f32 %v846_v9, %v845_v6 }
 0x129   : > { %v608_v11 = vpop.f32.mrb[20].mxu0  ;;  %v1410_v12 = vpop.f32.mrb[20].mxu1 }
 0x12a   : > { %706 = vst.msk [vmem:[%s1318_s20 + $0x50] sm:$0xff] %vm695_vm3, %v608_v11  ;;  %v747_v13 = vsel %vm695_vm3, %v608_v11, 0.0  ;;  %v807_v14 = vmul.f32 %v608_v11, %v608_v11  ;;  %v610_v15 = vpop.f32.mrb[21].mxu0  ;;  %722 = vst.msk [vmem:[%s1318_s20 + $0xd0] sm:$0xff] %vm695_vm3, %v1410_v12  ;;  %v674_v16 = vpop.f32.mrb[21].mxu1  ;;  %v814_v11 = vmul.f32 %v1327_v53, %v1327_v53 }
 0x12b   : > { %v748_v17 = vadd.f32 %v747_v13, %v746_v8  ;;  %v611_v19 = vpop.f32.mrb[22].mxu0  ;;  %v1418_v20 = vpop.f32.mrb[22].mxu1  ;;  %v860_v16 = vsel %vm695_vm3, %v813_v1, 0.0 }
 0x12c   : > { %v848_v21 = vsel %vm695_vm3, %v807_v14, 0.0  ;;  %707 = vst.msk [vmem:[%s1318_s20 + $0x58] sm:$0xff] %vm695_vm3, %v611_v19  ;;  %v749_v22 = vsel %vm695_vm3, %v611_v19, 0.0  ;;  %v808_v23 = vmul.f32 %v611_v19, %v611_v19  ;;  %v613_v24 = vpop.f32.mrb[23].mxu0  ;;  %723 = vst.msk [vmem:[%s1318_s20 + $0xd8] sm:$0xff] %vm695_vm3, %v1418_v20  ;;  %v677_v26 = vpop.f32.mrb[23].mxu1  ;;  %v815_v19 = vmul.f32 %v1338_v0, %v1338_v0 }
 0x12d   : > { %v849_v27 = vadd.f32 %v848_v21, %v847_v10  ;;  %v750_v28 = vadd.f32 %v749_v22, %v748_v17  ;;  %v759_v10 = vsel %vm695_vm3, %v1320_v48, 0.0  ;;  %v761_v17 = vsel %vm695_vm3, %v1327_v53, 0.0 }
 0x12e   : > { %v850_v29 = vsel %vm695_vm3, %v808_v23, 0.0  ;;  %v862_v23 = vsel %vm695_vm3, %v814_v11, 0.0  ;;  %v763_v48 = vsel %vm695_vm3, %v1338_v0, 0.0  ;;  %v816_v24 = vmul.f32 %v1346_v7, %v1346_v7 }
 0x12f   : > { %v851_v30 = vadd.f32 %v850_v29, %v849_v27  ;;  %v765_v53 = vsel %vm695_vm3, %v1346_v7, 0.0  ;;  %v817_v29 = vmul.f32 %v1356_v18, %v1356_v18  ;;  %v767_v0 = vsel %vm695_vm3, %v1356_v18, 0.0 }
 0x130   : > { %v769_v7 = vsel %vm695_vm3, %v1364_v25, 0.0  ;;  %v771_v18 = vsel %vm695_vm3, %v1374_v36, 0.0 }
 0x131   : > { %v616_v31 = vpop.f32.mrb[24].mxu0  ;;  %v1428_v32 = vpop.f32.mrb[24].mxu1 }
 0x132   : > { %708 = vst.msk [vmem:[%s1318_s20 + $0x60] sm:$0xff] %vm695_vm3, %v616_v31  ;;  %v751_v33 = vsel %vm695_vm3, %v616_v31, 0.0  ;;  %v809_v34 = vmul.f32 %v616_v31, %v616_v31  ;;  %v618_v35 = vpop.f32.mrb[25].mxu0  ;;  %724 = vst.msk [vmem:[%s1318_s20 + $0xe0] sm:$0xff] %vm695_vm3, %v1428_v32  ;;  %v682_v37 = vpop.f32.mrb[25].mxu1 }
 0x133   : > { %v752_v38 = vadd.f32 %v751_v33, %v750_v28  ;;  %v619_v39 = vpop.f32.mrb[26].mxu0  ;;  %v1436_v40 = vpop.f32.mrb[26].mxu1  ;;  %v864_v28 = vsel %vm695_vm3, %v815_v19, 0.0  ;;  %v866_v33 = vsel %vm695_vm3, %v816_v24, 0.0 }
 0x134   : > { %v852_v41 = vsel %vm695_vm3, %v809_v34, 0.0  ;;  %709 = vst.msk [vmem:[%s1318_s20 + $0x68] sm:$0xff] %vm695_vm3, %v619_v39  ;;  %v753_v42 = vsel %vm695_vm3, %v619_v39, 0.0  ;;  %v810_v44 = vmul.f32 %v619_v39, %v619_v39  ;;  %v621_v45 = vpop.f32.mrb[27].mxu0  ;;  %725 = vst.msk [vmem:[%s1318_s20 + $0xe8] sm:$0xff] %vm695_vm3, %v1436_v40  ;;  %v685_v46 = vpop.f32.mrb[27].mxu1  ;;  %v818_v34 = vmul.f32 %v1364_v25, %v1364_v25 }
 0x135   : > { %v853_v47 = vadd.f32 %v852_v41, %v851_v30  ;;  %v754_v49 = vadd.f32 %v753_v42, %v752_v38  ;;  %v868_v38 = vsel %vm695_vm3, %v817_v29, 0.0  ;;  %v819_v39 = vmul.f32 %v1374_v36, %v1374_v36 }
 0x136   : > { %v854_v50 = vsel %vm695_vm3, %v810_v44, 0.0  ;;  %v870_v44 = vsel %vm695_vm3, %v818_v34, 0.0  ;;  %v820_v45 = vmul.f32 %v1382_v43, %v1382_v43  ;;  %v773_v25 = vsel %vm695_vm3, %v1382_v43, 0.0 }
 0x137   : > { %v855_v51 = vadd.f32 %v854_v50, %v853_v47  ;;  %v821_v50 = vmul.f32 %v1392_v56, %v1392_v56  ;;  %v775_v36 = vsel %vm695_vm3, %v1392_v56, 0.0  ;;  %v777_v43 = vsel %vm695_vm3, %v1400_v63, 0.0 }
 0x138   : > { %v779_v56 = vsel %vm695_vm3, %v1410_v12, 0.0  ;;  %v785_v19 = vsel %vm695_vm3, %v1436_v40, 0.0 }
 0x139   : > { %v624_v52 = vpop.f32.mrb[28].mxu0  ;;  %v1446_v54 = vpop.f32.mrb[28].mxu1 }
 0x13a   : > { %710 = vst.msk [vmem:[%s1318_s20 + $0x70] sm:$0xff] %vm695_vm3, %v624_v52  ;;  %v755_v55 = vsel %vm695_vm3, %v624_v52, 0.0  ;;  %v811_v57 = vmul.f32 %v624_v52, %v624_v52  ;;  %v626_v58 = vpop.f32.mrb[29].mxu0  ;;  %726 = vst.msk [vmem:[%s1318_s20 + $0xf0] sm:$0xff] %vm695_vm3, %v1446_v54  ;;  %v690_v59 = vpop.f32.mrb[29].mxu1 }
 0x13b   : > { %v756_v60 = vadd.f32 %v755_v55, %v754_v49  ;;  %v627_v61 = vpop.f32.mrb[30].mxu0  ;;  %v1454_v62 = vpop.f32.mrb[30].mxu1  ;;  %v872_v49 = vsel %vm695_vm3, %v819_v39, 0.0  ;;  %v874_v55 = vsel %vm695_vm3, %v820_v45, 0.0 }
 0x13c   : > { %v856_v2 = vsel %vm695_vm3, %v811_v57, 0.0  ;;  %711 = vst.msk [vmem:[%s1318_s20 + $0x78] sm:$0xff] %vm695_vm3, %v627_v61  ;;  %v757_v3 = vsel %vm695_vm3, %v627_v61, 0.0  ;;  %v812_v4 = vmul.f32 %v627_v61, %v627_v61  ;;  %v629_v5 = vpop.f32.mrb[31].mxu0  ;;  %727 = vst.msk [vmem:[%s1318_s20 + $0xf8] sm:$0xff] %vm695_vm3, %v1454_v62  ;;  %v693_v6 = vpop.f32.mrb[31].mxu1  ;;  %v822_v57 = vmul.f32 %v1400_v63, %v1400_v63 }
 0x13d   : > { %v857_v8 = vadd.f32 %v856_v2, %v855_v51  ;;  %v758_v9 = vadd.f32 %v757_v3, %v756_v60  ;;  %v876_v60 = vsel %vm695_vm3, %v821_v50, 0.0  ;;  %v823_v61 = vmul.f32 %v1410_v12, %v1410_v12 }
 0x13e   : > { %v858_v13 = vsel %vm695_vm3, %v812_v4, 0.0  ;;  %v878_v3 = vsel %vm695_vm3, %v822_v57, 0.0  ;;  %v824_v4 = vmul.f32 %v1418_v20, %v1418_v20  ;;  %v781_v63 = vsel %vm695_vm3, %v1418_v20, 0.0 }
 0x13f   : > { %v760_v14 = vadd.f32 %v759_v10, %v758_v9  ;;  %v859_v15 = vadd.f32 %v858_v13, %v857_v8  ;;  %v880_v8 = vsel %vm695_vm3, %v823_v61, 0.0  ;;  %v825_v9 = vmul.f32 %v1428_v32, %v1428_v32 }
 0x140   : > { %v882_v13 = vsel %vm695_vm3, %v824_v4, 0.0  ;;  %v783_v12 = vsel %vm695_vm3, %v1428_v32, 0.0  ;;  %v828_v24 = vmul.f32 %v1454_v62, %v1454_v62 }
 0x141   : > { %v762_v21 = vadd.f32 %v761_v17, %v760_v14  ;;  %v861_v22 = vadd.f32 %v860_v16, %v859_v15  ;;  %v826_v14 = vmul.f32 %v1436_v40, %v1436_v40  ;;  %v827_v15 = vmul.f32 %v1446_v54, %v1446_v54 }
 0x142   : > { %v884_v20 = vsel %vm695_vm3, %v825_v9, 0.0  ;;  %v890_v29 = vsel %vm695_vm3, %v828_v24, 0.0 }
 0x143   : > { %v764_v26 = vadd.f32 %v763_v48, %v762_v21  ;;  %v863_v27 = vadd.f32 %v862_v23, %v861_v22  ;;  %v787_v21 = vsel %vm695_vm3, %v1446_v54, 0.0  ;;  %v886_v23 = vsel %vm695_vm3, %v826_v14, 0.0 }
 0x144   : > { %v888_v48 = vsel %vm695_vm3, %v827_v15, 0.0 }
 0x145   : > { %v766_v30 = vadd.f32 %v765_v53, %v764_v26  ;;  %v865_v31 = vadd.f32 %v864_v28, %v863_v27  ;;  %v789_v28 = vsel %vm695_vm3, %v1454_v62, 0.0 }
 0x147   : > { %v867_v35 = vadd.f32 %v866_v33, %v865_v31  ;;  %v768_v37 = vadd.f32 %v767_v0, %v766_v30 }
 0x149   : > { %v770_v41 = vadd.f32 %v769_v7, %v768_v37  ;;  %v869_v42 = vadd.f32 %v868_v38, %v867_v35 }
 0x14b   : > { %v772_v46 = vadd.f32 %v771_v18, %v770_v41  ;;  %v871_v47 = vadd.f32 %v870_v44, %v869_v42 }
 0x14d   : > { %v774_v51 = vadd.f32 %v773_v25, %v772_v46  ;;  %v873_v52 = vadd.f32 %v872_v49, %v871_v47 }
 0x14f   : > { %v776_v58 = vadd.f32 %v775_v36, %v774_v51  ;;  %v875_v59 = vadd.f32 %v874_v55, %v873_v52 }
 0x151   : > { %v877_v1 = vadd.f32 %v876_v60, %v875_v59  ;;  %v778_v2 = vadd.f32 %v777_v43, %v776_v58 }
 0x153   : > { %v879_v5 = vadd.f32 %v878_v3, %v877_v1  ;;  %v780_v6 = vadd.f32 %v779_v56, %v778_v2 }
 0x155   : > { %v881_v10 = vadd.f32 %v880_v8, %v879_v5  ;;  %v782_v11 = vadd.f32 %v781_v63, %v780_v6 }
 0x157   : > { %v883_v16 = vadd.f32 %v882_v13, %v881_v10  ;;  %v784_v17 = vadd.f32 %v783_v12, %v782_v11 }
 0x159   : > { %v885_v22 = vadd.f32 %v884_v20, %v883_v16  ;;  %v786_v32 = vadd.f32 %v785_v19, %v784_v17 }
 0x15b   : > { %v887_v26 = vadd.f32 %v886_v23, %v885_v22  ;;  %v788_v27 = vadd.f32 %v787_v21, %v786_v32 }
 0x15d   : > { %v889_v53 = vadd.f32 %v888_v48, %v887_v26  ;;  %v790_v40 = vadd.f32 %v789_v28, %v788_v27 }
 0x15f   : > { %v791_v54 = vrot.slane %v790_v40, 4  ;;  %v891_v30 = vadd.f32 %v890_v29, %v889_v53 }
 0x161   : > { %v792_v31 = vadd.f32 %v791_v54, %v790_v40  ;;  %v892_v33 = vrot.slane %v891_v30, 4 }
 0x163   : > { %v793_v0 = vrot.slane %v792_v31, 2  ;;  %v893_v34 = vadd.f32 %v892_v33, %v891_v30 }
 0x165   : > { %v794_v35 = vadd.f32 %v793_v0, %v792_v31  ;;  %v894_v37 = vrot.slane %v893_v34, 2 }
 0x167   : > { %v795_v38 = vrot.slane %v794_v35, 1  ;;  %v895_v7 = vadd.f32 %v894_v37, %v893_v34 }
 0x169   : > { %v796_v62 = vadd.f32 %v795_v38, %v794_v35  ;;  %v896_v39 = vrot.slane %v895_v7, 1 }
 0x16b   : > { %v897_v41 = vadd.f32 %v896_v39, %v895_v7  ;;  %898 = vst.msk [vmem:[%s220_s24] sm:$0xff] %vm695_vm3, %v796_v62 }
 0x16d   : > { %899 = vst.msk [vmem:[%s224_s27] sm:$0xff] %vm695_vm3, %v897_v41 }
 0x16e PF: > { %s15_s15 = sadd.s32 1, %s1185_s15  }
 0x16f   : > { %p12_p5 = scmp.ge.s32.totalorder %s15_s15, 4  }
 0x171   :  { %14 = sbr.rel (!%p12_p5) target bundleno = 1 (0x1), region = 82 }

// kernel: resnet_forward.4
= control target key start
LH: loop header
LB: loop body
LE: loop exit
PB: predicated region body
PF: predicated region fallthrough
CT: control target
= control target key end

     0   :  { %s1925_s12 = smov 0   ;;  %s2652_s0 = inlined_call_operand.vmem [shape: f32[2,16,16,64], index: 0, kind: input, shape index: {}]   ;;  %s2653_s1 = inlined_call_operand.vmem [shape: f32[1,1,1,64], index: 1, kind: input, shape index: {}]   ;;  %s2654_s2 = inlined_call_operand.vmem [shape: f32[1,1,1,64], index: 2, kind: input, shape index: {}]   ;;  %s2655_s3 = inlined_call_operand.vmem [shape: f32[2,8,8,64], index: 3, kind: output, shape index: {}]  }
   0x1 LB: > { %s1863_s13 = sadd.s32 4294967295, %s1903_s12   ;;  %p1867_p0 = scmp.ge.s32.totalorder %s1903_s12, 1  ;;  %s1903_s12 = sphi %s1925_s12, %s13_s12  }
   0x2   : > { %p137_p1 = scmp.lt.s32.totalorder %s1903_s12, 3 }
   0x4   : > { %p138_p2 = pnand %p1867_p0, %p137_p1 }
   0x5   : > { %p161_p3 = scmp.lt.s32.totalorder (!%p138_p2), %s1863_s13, 1  ;;  %v1939_v0 = vld [vmem:[%s2653_s1] ss:$0 sm:$0xff] (!%p138_p2)  ;;  %vm249_vm0 = vcmask (!%p138_p2), 517120   ;;  %vm362_vm1 = vcmask (!%p138_p2), 516096   ;;  %vm443_vm2 = vcmask (!%p138_p2), 518144  }
   0x6   : > { %141 = sbr.rel (%p138_p2) target bundleno = 360 (0x168), region = 32  ;;  %v1949_v1 = vld [vmem:[%s2654_s2] ss:$0 sm:$0xff] (!%p138_p2)  ;;  %vm1726_vm3 = vcmask (!%p138_p2), 523264  }
   0xd   : > { %s2657_s13 = smov (!%p161_p3, %s1863_s13), 1 }
   0xe   : > { %s1883_s14 = sshll.u32 %s2657_s13, 8  ;;  %s1884_s30 = sshll.u32 %s2657_s13, 6 }
   0xf   : > { %s1944_s19 = scalar_lea.vmem %s2652_s0, %s1883_s14  ;;  %s2608_s6 = scalar_lea.vmem %s2655_s3, %s1884_s30 }
  0x10   : > { %v173_v2 = vld [vmem:[%s1944_s19] sm:$0x3]  ;;  %v174_v3 = vld [vmem:[%s1944_s19 + $0x10] sm:$0x3] }
  0x11   : > { %v175_v4 = vld [vmem:[%s1944_s19 + $0x20] sm:$0x3]  ;;  %v195_v5 = vmul.f32 %v1939_v0, %v173_v2  ;;  %v196_v6 = vmul.f32 %v1939_v0, %v174_v3  ;;  %v176_v8 = vld [vmem:[%s1944_s19 + $0x30] sm:$0x3] }
  0x12   : > { %v197_v7 = vmul.f32 %v1939_v0, %v175_v4  ;;  %v177_v9 = vld [vmem:[%s1944_s19 + $0x40] sm:$0x3]  ;;  %v178_v10 = vld [vmem:[%s1944_s19 + $0x50] sm:$0x3]  ;;  %v198_v11 = vmul.f32 %v1939_v0, %v176_v8 }
  0x13   : > { %v199_v12 = vmul.f32 %v1939_v0, %v177_v9  ;;  %v200_v13 = vmul.f32 %v1939_v0, %v178_v10  ;;  %v179_v14 = vld [vmem:[%s1944_s19 + $0x60] sm:$0x3]  ;;  %v180_v15 = vld [vmem:[%s1944_s19 + $0x70] sm:$0x3]  ;;  %v217_v16 = vadd.f32 %v1949_v1, %v195_v5  ;;  %v218_v17 = vadd.f32 %v1949_v1, %v196_v6 }
  0x14   : > { %v219_v18 = vadd.f32 %v1949_v1, %v197_v7  ;;  %v201_v19 = vmul.f32 %v1939_v0, %v179_v14  ;;  %v220_v20 = vadd.f32 %v1949_v1, %v198_v11  ;;  %v202_v23 = vmul.f32 %v1939_v0, %v180_v15  ;;  %v181_v10 = vld [vmem:[%s1944_s19 + $0x80] sm:$0x3]  ;;  %v182_v15 = vld [vmem:[%s1944_s19 + $0x90] sm:$0x3] }
  0x15   : > { %v221_v21 = vadd.f32 %v1949_v1, %v199_v12  ;;  %v222_v22 = vadd.f32 %v1949_v1, %v200_v13  ;;  %v233_v24 = vmax.f32 %v217_v16, 0.0  ;;  %v234_v25 = vmax.f32 %v218_v17, 0.0  ;;  %v183_v16 = vld [vmem:[%s1944_s19 + $0xa0] sm:$0x3] }
  0x16   : > { %v235_v26 = vmax.f32 %v219_v18, 0.0  ;;  %v223_v27 = vadd.f32 %v1949_v1, %v201_v19  ;;  %v236_v28 = vmax.f32 %v220_v20, 0.0  ;;  %v224_v31 = vadd.f32 %v1949_v1, %v202_v23 }
  0x17   : > { %v237_v29 = vmax.f32 %v221_v21, 0.0  ;;  %v238_v30 = vmax.f32 %v222_v22, 0.0  ;;  %v250_v32 = vsel %vm249_vm0, %v233_v24, -inf  ;;  %v257_v33 = vsel %vm249_vm0, %v234_v25, -inf  ;;  %v184_v21 = vld [vmem:[%s1944_s19 + $0xb0] sm:$0x3] }
  0x18   : > { %v264_v34 = vsel %vm249_vm0, %v235_v26, -inf  ;;  %v239_v35 = vmax.f32 %v223_v27, 0.0  ;;  %v251_v36 = vrot.slane %v250_v32, 4  ;;  %v258_v37 = vrot.slane %v257_v33, 4  ;;  %v185_v26 = vld [vmem:[%s1944_s19 + $0xc0] sm:$0x3] }
  0x19   : > { %v265_v38 = vrot.slane %v264_v34, 4  ;;  %v271_v39 = vsel %vm249_vm0, %v236_v28, -inf  ;;  %v278_v41 = vsel %vm249_vm0, %v237_v29, -inf  ;;  %v285_v42 = vsel %vm249_vm0, %v238_v30, -inf }
  0x1a   : > { %v272_v40 = vrot.slane %v271_v39, 4  ;;  %v292_v43 = vsel %vm249_vm0, %v239_v35, -inf  ;;  %v252_v44 = vmax.f32 %v250_v32, %v251_v36  ;;  %v259_v45 = vmax.f32 %v257_v33, %v258_v37  ;;  %v187_v32 = vld [vmem:[%s1944_s19 + $0xe0] sm:$0x3] }
  0x1b   : > { %v266_v46 = vmax.f32 %v264_v34, %v265_v38  ;;  %v279_v47 = vrot.slane %v278_v41, 4  ;;  %v286_v49 = vrot.slane %v285_v42, 4  ;;  %v293_v50 = vrot.slane %v292_v43, 4 }
  0x1c   : > { %v273_v48 = vmax.f32 %v271_v39, %v272_v40  ;;  %v240_v51 = vmax.f32 %v224_v31, 0.0  ;;  %v253_v52 = vrot.slane %v252_v44, 2  ;;  %v260_v53 = vrot.slane %v259_v45, 2  ;;  %v186_v31 = vld [vmem:[%s1944_s19 + $0xd0] sm:$0x3] }
  0x1d   : > { %v267_v54 = vrot.slane %v266_v46, 2  ;;  %v280_v55 = vmax.f32 %v278_v41, %v279_v47  ;;  %v287_v57 = vmax.f32 %v285_v42, %v286_v49  ;;  %v294_v58 = vmax.f32 %v292_v43, %v293_v50 }
  0x1e   : > { %v274_v56 = vrot.slane %v273_v48, 2  ;;  %v299_v59 = vsel %vm249_vm0, %v240_v51, -inf  ;;  %v254_v60 = vmax.f32 %v252_v44, %v253_v52  ;;  %v261_v61 = vmax.f32 %v259_v45, %v260_v53 }
  0x1f   : > { %v268_v62 = vmax.f32 %v266_v46, %v267_v54  ;;  %v281_v63 = vrot.slane %v280_v55, 2  ;;  %v288_v3 = vrot.slane %v287_v57, 2  ;;  %v295_v4 = vrot.slane %v294_v58, 2 }
  0x20   : > { %v275_v2 = vmax.f32 %v273_v48, %v274_v56  ;;  %v300_v5 = vrot.slane %v299_v59, 4  ;;  %v255_v6 = vrot.slane %v254_v60, 1  ;;  %v262_v7 = vrot.slane %v261_v61, 1 }
  0x21   : > { %v269_v8 = vrot.slane %v268_v62, 1  ;;  %v282_v9 = vmax.f32 %v280_v55, %v281_v63  ;;  %v289_v12 = vmax.f32 %v287_v57, %v288_v3  ;;  %v296_v13 = vmax.f32 %v294_v58, %v295_v4 }
  0x22   : > { %v276_v11 = vrot.slane %v275_v2, 1  ;;  %v301_v14 = vmax.f32 %v299_v59, %v300_v5  ;;  %v256_v17 = vmax.f32 %v254_v60, %v255_v6  ;;  %v263_v18 = vmax.f32 %v261_v61, %v262_v7  ;;  %v379_v61 = vld [vmem:[%s1944_s19 + $0x1] sm:$0x7] }
  0x23   : > { %v270_v19 = vmax.f32 %v268_v62, %v269_v8  ;;  %v283_v20 = vrot.slane %v282_v9, 1  ;;  %v290_v23 = vrot.slane %v289_v12, 1  ;;  %v297_v24 = vrot.slane %v296_v13, 1 }
  0x24   : > { %v277_v22 = vmax.f32 %v275_v2, %v276_v11  ;;  %v302_v25 = vrot.slane %v301_v14, 2  ;;  %363 = vst.msk [vmem:[#allocation2] sm:$0x1] %vm362_vm1, %v256_v17  ;;  %364 = vst.msk [vmem:[#allocation2 + $0x8] sm:$0x1] %vm362_vm1, %v263_v18  ;;  %v203_v28 = vmul.f32 %v1939_v0, %v181_v10  ;;  %v204_v29 = vmul.f32 %v1939_v0, %v182_v15 }
  0x25   : > { %365 = vst.msk [vmem:[#allocation2 + $0x10] sm:$0x1] %vm362_vm1, %v270_v19  ;;  %v284_v27 = vmax.f32 %v282_v9, %v283_v20  ;;  %v205_v30 = vmul.f32 %v1939_v0, %v183_v16  ;;  %v291_v33 = vmax.f32 %v289_v12, %v290_v23  ;;  %v298_v34 = vmax.f32 %v296_v13, %v297_v24 }
  0x26   : > { %366 = vst.msk [vmem:[#allocation2 + $0x18] sm:$0x1] %vm362_vm1, %v277_v22  ;;  %v303_v35 = vmax.f32 %v301_v14, %v302_v25  ;;  %v206_v36 = vmul.f32 %v1939_v0, %v184_v21  ;;  %v225_v37 = vadd.f32 %v1949_v1, %v203_v28  ;;  %v226_v38 = vadd.f32 %v1949_v1, %v204_v29  ;;  %v380_v28 = vld [vmem:[%s1944_s19 + $0x11] sm:$0x7] }
  0x27   : > { %367 = vst.msk [vmem:[#allocation2 + $0x20] sm:$0x1] %vm362_vm1, %v284_v27  ;;  %v227_v39 = vadd.f32 %v1949_v1, %v205_v30  ;;  %v207_v40 = vmul.f32 %v1939_v0, %v185_v26  ;;  %368 = vst.msk [vmem:[#allocation2 + $0x28] sm:$0x1] %vm362_vm1, %v291_v33  ;;  %v208_v43 = vmul.f32 %v1939_v0, %v186_v31  ;;  %v381_v33 = vld [vmem:[%s1944_s19 + $0x21] sm:$0x7] }
  0x28   : > { %369 = vst.msk [vmem:[#allocation2 + $0x30] sm:$0x1] %vm362_vm1, %v298_v34  ;;  %v304_v41 = vrot.slane %v303_v35, 1  ;;  %v228_v42 = vadd.f32 %v1949_v1, %v206_v36  ;;  %v209_v44 = vmul.f32 %v1939_v0, %v187_v32  ;;  %v241_v45 = vmax.f32 %v225_v37, 0.0 }
  0x29   : > { %v242_v46 = vmax.f32 %v226_v38, 0.0  ;;  %v243_v47 = vmax.f32 %v227_v39, 0.0  ;;  %v229_v48 = vadd.f32 %v1949_v1, %v207_v40  ;;  %v230_v51 = vadd.f32 %v1949_v1, %v208_v43  ;;  %v382_v38 = vld [vmem:[%s1944_s19 + $0x31] sm:$0x7]  ;;  %v383_v43 = vld [vmem:[%s1944_s19 + $0x41] sm:$0x7] }
  0x2a   : > { %v305_v49 = vmax.f32 %v303_v35, %v304_v41  ;;  %v244_v50 = vmax.f32 %v228_v42, 0.0  ;;  %v231_v52 = vadd.f32 %v1949_v1, %v209_v44  ;;  %v306_v53 = vsel %vm249_vm0, %v241_v45, -inf }
  0x2b   : > { %v313_v54 = vsel %vm249_vm0, %v242_v46, -inf  ;;  %v320_v55 = vsel %vm249_vm0, %v243_v47, -inf  ;;  %v245_v56 = vmax.f32 %v229_v48, 0.0  ;;  %v307_v57 = vrot.slane %v306_v53, 4  ;;  %v384_v48 = vld [vmem:[%s1944_s19 + $0x51] sm:$0x7] }
  0x2c   : > { %370 = vst.msk [vmem:[#allocation2 + $0x38] sm:$0x1] %vm362_vm1, %v305_v49  ;;  %v314_v58 = vrot.slane %v313_v54, 4  ;;  %v321_v59 = vrot.slane %v320_v55, 4  ;;  %v327_v60 = vsel %vm249_vm0, %v244_v50, -inf  ;;  %v246_v2 = vmax.f32 %v230_v51, 0.0 }
  0x2d   : > { %v328_v62 = vrot.slane %v327_v60, 4  ;;  %v334_v63 = vsel %vm249_vm0, %v245_v56, -inf  ;;  %v247_v3 = vmax.f32 %v231_v52, 0.0  ;;  %v308_v4 = vmax.f32 %v306_v53, %v307_v57 }
  0x2e   : > { %v315_v5 = vmax.f32 %v313_v54, %v314_v58  ;;  %v322_v6 = vmax.f32 %v320_v55, %v321_v59  ;;  %v335_v7 = vrot.slane %v334_v63, 4  ;;  %v341_v9 = vsel %vm249_vm0, %v246_v2, -inf }
  0x2f   : > { %v329_v8 = vmax.f32 %v327_v60, %v328_v62  ;;  %v348_v10 = vsel %vm249_vm0, %v247_v3, -inf  ;;  %v395_v11 = vmul.f32 %v1939_v0, %v379_v61  ;;  %v309_v12 = vrot.slane %v308_v4, 2  ;;  %v385_v61 = vld [vmem:[%s1944_s19 + $0x61] sm:$0x7]  ;;  %v386_v62 = vld [vmem:[%s1944_s19 + $0x71] sm:$0x7] }
  0x30   : > { %v316_v13 = vrot.slane %v315_v5, 2  ;;  %v323_v14 = vrot.slane %v322_v6, 2  ;;  %v336_v15 = vmax.f32 %v334_v63, %v335_v7  ;;  %v342_v17 = vrot.slane %v341_v9, 4 }
  0x31   : > { %v330_v16 = vrot.slane %v329_v8, 2  ;;  %v349_v18 = vrot.slane %v348_v10, 4  ;;  %v411_v19 = vadd.f32 %v1949_v1, %v395_v11  ;;  %v310_v20 = vmax.f32 %v308_v4, %v309_v12 }
  0x32   : > { %v317_v21 = vmax.f32 %v315_v5, %v316_v13  ;;  %v324_v22 = vmax.f32 %v322_v6, %v323_v14  ;;  %v337_v23 = vrot.slane %v336_v15, 2  ;;  %v343_v25 = vmax.f32 %v341_v9, %v342_v17 }
  0x33   : > { %v331_v24 = vmax.f32 %v329_v8, %v330_v16  ;;  %v350_v26 = vmax.f32 %v348_v10, %v349_v18  ;;  %v427_v27 = vmax.f32 %v411_v19, 0.0  ;;  %v311_v29 = vrot.slane %v310_v20, 1 }
  0x34   : > { %v318_v30 = vrot.slane %v317_v21, 1  ;;  %v325_v31 = vrot.slane %v324_v22, 1  ;;  %v338_v32 = vmax.f32 %v336_v15, %v337_v23  ;;  %v344_v35 = vrot.slane %v343_v25, 2 }
  0x35   : > { %v332_v34 = vrot.slane %v331_v24, 1  ;;  %v351_v36 = vrot.slane %v350_v26, 2  ;;  %v444_v37 = vsel %vm443_vm2, %v427_v27, -inf  ;;  %v312_v39 = vmax.f32 %v310_v20, %v311_v29 }
  0x36   : > { %v319_v40 = vmax.f32 %v317_v21, %v318_v30  ;;  %v326_v41 = vmax.f32 %v324_v22, %v325_v31  ;;  %v339_v42 = vrot.slane %v338_v32, 1  ;;  %v345_v45 = vmax.f32 %v343_v25, %v344_v35  ;;  %v387_v25 = vld [vmem:[%s1944_s19 + $0x81] sm:$0x7] }
  0x37   : > { %v333_v44 = vmax.f32 %v331_v24, %v332_v34  ;;  %v352_v46 = vmax.f32 %v350_v26, %v351_v36  ;;  %v445_v47 = vrot.slane %v444_v37, 4  ;;  %371 = vst.msk [vmem:[#allocation2 + $0x40] sm:$0x1] %vm362_vm1, %v312_v39  ;;  %v396_v50 = vmul.f32 %v1939_v0, %v380_v28 }
  0x38   : > { %372 = vst.msk [vmem:[#allocation2 + $0x48] sm:$0x1] %vm362_vm1, %v319_v40  ;;  %373 = vst.msk [vmem:[#allocation2 + $0x50] sm:$0x1] %vm362_vm1, %v326_v41  ;;  %v340_v49 = vmax.f32 %v338_v32, %v339_v42  ;;  %v397_v51 = vmul.f32 %v1939_v0, %v381_v33  ;;  %v398_v52 = vmul.f32 %v1939_v0, %v382_v38  ;;  %v346_v53 = vrot.slane %v345_v45, 1 }
  0x39   : > { %374 = vst.msk [vmem:[#allocation2 + $0x58] sm:$0x1] %vm362_vm1, %v333_v44  ;;  %v353_v54 = vrot.slane %v352_v46, 1  ;;  %v446_v55 = vmax.f32 %v444_v37, %v445_v47  ;;  %v399_v56 = vmul.f32 %v1939_v0, %v383_v43  ;;  %v412_v57 = vadd.f32 %v1949_v1, %v396_v50 }
  0x3a   : > { %375 = vst.msk [vmem:[#allocation2 + $0x60] sm:$0x1] %vm362_vm1, %v340_v49  ;;  %v413_v58 = vadd.f32 %v1949_v1, %v397_v51  ;;  %v414_v59 = vadd.f32 %v1949_v1, %v398_v52  ;;  %v400_v60 = vmul.f32 %v1939_v0, %v384_v48  ;;  %v347_v63 = vmax.f32 %v345_v45, %v346_v53 }
  0x3b   : > { %v354_v2 = vmax.f32 %v352_v46, %v353_v54  ;;  %v447_v3 = vrot.slane %v446_v55, 2  ;;  %v415_v4 = vadd.f32 %v1949_v1, %v399_v56  ;;  %v428_v5 = vmax.f32 %v412_v57, 0.0 }
  0x3c   : > { %v429_v6 = vmax.f32 %v413_v58, 0.0  ;;  %v430_v7 = vmax.f32 %v414_v59, 0.0  ;;  %v416_v8 = vadd.f32 %v1949_v1, %v400_v60  ;;  %376 = vst.msk [vmem:[#allocation2 + $0x68] sm:$0x1] %vm362_vm1, %v347_v63  ;;  %v401_v11 = vmul.f32 %v1939_v0, %v385_v61  ;;  %v388_v58 = vld [vmem:[%s1944_s19 + $0x91] sm:$0x7] }
  0x3d   : > { %377 = vst.msk [vmem:[#allocation2 + $0x70] sm:$0x1] %vm362_vm1, %v354_v2  ;;  %v448_v9 = vmax.f32 %v446_v55, %v447_v3  ;;  %v431_v10 = vmax.f32 %v415_v4, 0.0  ;;  %v402_v12 = vmul.f32 %v1939_v0, %v386_v62  ;;  %v451_v13 = vsel %vm443_vm2, %v428_v5, -inf  ;;  %v389_v59 = vld [vmem:[%s1944_s19 + $0xa1] sm:$0x7] }
  0x3e   : > { %v458_v14 = vsel %vm443_vm2, %v429_v6, -inf  ;;  %v465_v15 = vsel %vm443_vm2, %v430_v7, -inf  ;;  %v432_v16 = vmax.f32 %v416_v8, 0.0  ;;  %v452_v18 = vrot.slane %v451_v13, 4  ;;  %v390_v2 = vld [vmem:[%s1944_s19 + $0xb1] sm:$0x7] }
  0x3f   : > { %v449_v17 = vrot.slane %v448_v9, 1  ;;  %v459_v19 = vrot.slane %v458_v14, 4  ;;  %v466_v20 = vrot.slane %v465_v15, 4  ;;  %v472_v21 = vsel %vm443_vm2, %v431_v10, -inf }
  0x40   : > { %v479_v22 = vsel %vm443_vm2, %v432_v16, -inf  ;;  %v417_v23 = vadd.f32 %v1949_v1, %v401_v11  ;;  %v418_v24 = vadd.f32 %v1949_v1, %v402_v12  ;;  %v453_v27 = vmax.f32 %v451_v13, %v452_v18  ;;  %v391_v11 = vld [vmem:[%s1944_s19 + $0xc1] sm:$0x7]  ;;  %v392_v12 = vld [vmem:[%s1944_s19 + $0xd1] sm:$0x7] }
  0x41   : > { %v450_v26 = vmax.f32 %v448_v9, %v449_v17  ;;  %v460_v28 = vmax.f32 %v458_v14, %v459_v19  ;;  %v467_v29 = vmax.f32 %v465_v15, %v466_v20  ;;  %v473_v30 = vrot.slane %v472_v21, 4 }
  0x42   : > { %v480_v31 = vrot.slane %v479_v22, 4  ;;  %v433_v32 = vmax.f32 %v417_v23, 0.0  ;;  %v434_v33 = vmax.f32 %v418_v24, 0.0  ;;  %v454_v34 = vrot.slane %v453_v27, 2 }
  0x43   : > { %556 = vst.msk [vmem:[#allocation2 + $0x1] sm:$0x1] %vm362_vm1, %v450_v26  ;;  %v461_v35 = vrot.slane %v460_v28, 2  ;;  %v468_v36 = vrot.slane %v467_v29, 2  ;;  %v403_v37 = vmul.f32 %v1939_v0, %v387_v25  ;;  %v474_v38 = vmax.f32 %v472_v21, %v473_v30  ;;  %v393_v25 = vld [vmem:[%s1944_s19 + $0xe1] sm:$0x7] }
  0x44   : > { %v481_v39 = vmax.f32 %v479_v22, %v480_v31  ;;  %v486_v40 = vsel %vm443_vm2, %v433_v32, -inf  ;;  %v493_v41 = vsel %vm443_vm2, %v434_v33, -inf  ;;  %v455_v42 = vmax.f32 %v453_v27, %v454_v34 }
  0x45   : > { %v462_v43 = vmax.f32 %v460_v28, %v461_v35  ;;  %v469_v44 = vmax.f32 %v467_v29, %v468_v36  ;;  %v487_v45 = vrot.slane %v486_v40, 4  ;;  %v475_v46 = vrot.slane %v474_v38, 2 }
  0x46   : > { %v482_v47 = vrot.slane %v481_v39, 2  ;;  %v494_v48 = vrot.slane %v493_v41, 4  ;;  %v419_v49 = vadd.f32 %v1949_v1, %v403_v37  ;;  %v456_v50 = vrot.slane %v455_v42, 1 }
  0x47   : > { %v463_v51 = vrot.slane %v462_v43, 1  ;;  %v470_v52 = vrot.slane %v469_v44, 1  ;;  %v488_v53 = vmax.f32 %v486_v40, %v487_v45  ;;  %v476_v54 = vmax.f32 %v474_v38, %v475_v46  ;;  %v572_v38 = vld [vmem:[%s1944_s19 + $0x3] sm:$0x7] }
  0x48   : > { %v483_v55 = vmax.f32 %v481_v39, %v482_v47  ;;  %v495_v56 = vmax.f32 %v493_v41, %v494_v48  ;;  %v435_v57 = vmax.f32 %v419_v49, 0.0  ;;  %v457_v60 = vmax.f32 %v455_v42, %v456_v50 }
  0x49   : > { %v464_v61 = vmax.f32 %v462_v43, %v463_v51  ;;  %v471_v62 = vmax.f32 %v469_v44, %v470_v52  ;;  %v489_v63 = vrot.slane %v488_v53, 2  ;;  %v477_v3 = vrot.slane %v476_v54, 1  ;;  %v573_v51 = vld [vmem:[%s1944_s19 + $0x13] sm:$0x7] }
  0x4a   : > { %v484_v4 = vrot.slane %v483_v55, 1  ;;  %v496_v5 = vrot.slane %v495_v56, 2  ;;  %v500_v6 = vsel %vm443_vm2, %v435_v57, -inf  ;;  %557 = vst.msk [vmem:[#allocation2 + $0x9] sm:$0x1] %vm362_vm1, %v457_v60  ;;  %v404_v9 = vmul.f32 %v1939_v0, %v388_v58 }
  0x4b   : > { %558 = vst.msk [vmem:[#allocation2 + $0x11] sm:$0x1] %vm362_vm1, %v464_v61  ;;  %559 = vst.msk [vmem:[#allocation2 + $0x19] sm:$0x1] %vm362_vm1, %v471_v62  ;;  %v490_v7 = vmax.f32 %v488_v53, %v489_v63  ;;  %v501_v8 = vrot.slane %v500_v6, 4  ;;  %v405_v10 = vmul.f32 %v1939_v0, %v389_v59  ;;  %v478_v13 = vmax.f32 %v476_v54, %v477_v3 }
  0x4c   : > { %v485_v14 = vmax.f32 %v483_v55, %v484_v4  ;;  %v497_v15 = vmax.f32 %v495_v56, %v496_v5  ;;  %v406_v16 = vmul.f32 %v1939_v0, %v390_v2  ;;  %v420_v19 = vadd.f32 %v1949_v1, %v404_v9 }
  0x4d   : > { %v491_v17 = vrot.slane %v490_v7, 1  ;;  %v502_v18 = vmax.f32 %v500_v6, %v501_v8  ;;  %v421_v20 = vadd.f32 %v1949_v1, %v405_v10  ;;  %560 = vst.msk [vmem:[#allocation2 + $0x21] sm:$0x1] %vm362_vm1, %v478_v13  ;;  %v407_v23 = vmul.f32 %v1939_v0, %v391_v11 }
  0x4e   : > { %561 = vst.msk [vmem:[#allocation2 + $0x29] sm:$0x1] %vm362_vm1, %v485_v14  ;;  %v498_v21 = vrot.slane %v497_v15, 1  ;;  %v422_v22 = vadd.f32 %v1949_v1, %v406_v16  ;;  %v408_v24 = vmul.f32 %v1939_v0, %v392_v12  ;;  %v436_v28 = vmax.f32 %v420_v19, 0.0  ;;  %v575_v19 = vld [vmem:[%s1944_s19 + $0x33] sm:$0x7] }
  0x4f   : > { %v492_v26 = vmax.f32 %v490_v7, %v491_v17  ;;  %v503_v27 = vrot.slane %v502_v18, 2  ;;  %v437_v29 = vmax.f32 %v421_v20, 0.0  ;;  %v423_v32 = vadd.f32 %v1949_v1, %v407_v23 }
  0x50   : > { %v499_v30 = vmax.f32 %v497_v15, %v498_v21  ;;  %v438_v31 = vmax.f32 %v422_v22, 0.0  ;;  %v424_v33 = vadd.f32 %v1949_v1, %v408_v24  ;;  %v507_v35 = vsel %vm443_vm2, %v436_v28, -inf  ;;  %v576_v24 = vld [vmem:[%s1944_s19 + $0x43] sm:$0x7] }
  0x51   : > { %562 = vst.msk [vmem:[#allocation2 + $0x31] sm:$0x1] %vm362_vm1, %v492_v26  ;;  %v504_v34 = vmax.f32 %v502_v18, %v503_v27  ;;  %v514_v36 = vsel %vm443_vm2, %v437_v29, -inf  ;;  %v409_v37 = vmul.f32 %v1939_v0, %v393_v25  ;;  %v508_v39 = vrot.slane %v507_v35, 4  ;;  %v574_v18 = vld [vmem:[%s1944_s19 + $0x23] sm:$0x7] }
  0x52   : > { %563 = vst.msk [vmem:[#allocation2 + $0x39] sm:$0x1] %vm362_vm1, %v499_v30  ;;  %v515_v40 = vrot.slane %v514_v36, 4  ;;  %v521_v41 = vsel %vm443_vm2, %v438_v31, -inf  ;;  %v439_v42 = vmax.f32 %v423_v32, 0.0  ;;  %v440_v45 = vmax.f32 %v424_v33, 0.0 }
  0x53   : > { %v505_v43 = vrot.slane %v504_v34, 1  ;;  %v522_v44 = vrot.slane %v521_v41, 4  ;;  %v425_v46 = vadd.f32 %v1949_v1, %v409_v37  ;;  %v509_v47 = vmax.f32 %v507_v35, %v508_v39  ;;  %v577_v33 = vld [vmem:[%s1944_s19 + $0x53] sm:$0x7] }
  0x54   : > { %v516_v48 = vmax.f32 %v514_v36, %v515_v40  ;;  %v528_v49 = vsel %vm443_vm2, %v439_v42, -inf  ;;  %v588_v50 = vmul.f32 %v1939_v0, %v572_v38  ;;  %v535_v55 = vsel %vm443_vm2, %v440_v45, -inf  ;;  %v578_v38 = vld [vmem:[%s1944_s19 + $0x63] sm:$0x7] }
  0x55   : > { %v506_v52 = vmax.f32 %v504_v34, %v505_v43  ;;  %v523_v53 = vmax.f32 %v521_v41, %v522_v44  ;;  %v529_v54 = vrot.slane %v528_v49, 4  ;;  %v510_v56 = vrot.slane %v509_v47, 2 }
  0x56   : > { %v517_v57 = vrot.slane %v516_v48, 2  ;;  %v536_v58 = vrot.slane %v535_v55, 4  ;;  %v441_v59 = vmax.f32 %v425_v46, 0.0  ;;  %v604_v62 = vadd.f32 %v1949_v1, %v588_v50 }
  0x57   : > { %564 = vst.msk [vmem:[#allocation2 + $0x41] sm:$0x1] %vm362_vm1, %v506_v52  ;;  %v524_v60 = vrot.slane %v523_v53, 2  ;;  %v530_v61 = vmax.f32 %v528_v49, %v529_v54  ;;  %v589_v63 = vmul.f32 %v1939_v0, %v573_v51  ;;  %v511_v2 = vmax.f32 %v509_v47, %v510_v56 }
  0x58   : > { %v518_v3 = vmax.f32 %v516_v48, %v517_v57  ;;  %v537_v4 = vmax.f32 %v535_v55, %v536_v58  ;;  %v542_v5 = vsel %vm443_vm2, %v441_v59, -inf  ;;  %v620_v9 = vmax.f32 %v604_v62, 0.0  ;;  %v579_v59 = vld [vmem:[%s1944_s19 + $0x73] sm:$0x7] }
  0x59   : > { %v525_v6 = vmax.f32 %v523_v53, %v524_v60  ;;  %v531_v7 = vrot.slane %v530_v61, 2  ;;  %v543_v8 = vrot.slane %v542_v5, 4  ;;  %v512_v10 = vrot.slane %v511_v2, 1 }
  0x5a   : > { %v519_v11 = vrot.slane %v518_v3, 1  ;;  %v538_v12 = vrot.slane %v537_v4, 2  ;;  %v605_v13 = vadd.f32 %v1949_v1, %v589_v63  ;;  %v636_v17 = vsel %vm443_vm2, %v620_v9, -inf }
  0x5b   : > { %v526_v14 = vrot.slane %v525_v6, 1  ;;  %v532_v15 = vmax.f32 %v530_v61, %v531_v7  ;;  %v544_v16 = vmax.f32 %v542_v5, %v543_v8  ;;  %v513_v20 = vmax.f32 %v511_v2, %v512_v10 }
  0x5c   : > { %v520_v21 = vmax.f32 %v518_v3, %v519_v11  ;;  %v539_v22 = vmax.f32 %v537_v4, %v538_v12  ;;  %v637_v23 = vrot.slane %v636_v17, 4  ;;  %v621_v28 = vmax.f32 %v605_v13, 0.0 }
  0x5d   : > { %v527_v25 = vmax.f32 %v525_v6, %v526_v14  ;;  %v533_v26 = vrot.slane %v532_v15, 1  ;;  %v545_v27 = vrot.slane %v544_v16, 2  ;;  %565 = vst.msk [vmem:[#allocation2 + $0x49] sm:$0x1] %vm362_vm1, %v513_v20  ;;  %v590_v31 = vmul.f32 %v1939_v0, %v574_v18  ;;  %v580_v6 = vld [vmem:[%s1944_s19 + $0x83] sm:$0x7] }
  0x5e   : > { %566 = vst.msk [vmem:[#allocation2 + $0x51] sm:$0x1] %vm362_vm1, %v520_v21  ;;  %v540_v29 = vrot.slane %v539_v22, 1  ;;  %v638_v30 = vmax.f32 %v636_v17, %v637_v23  ;;  %v591_v32 = vmul.f32 %v1939_v0, %v575_v19  ;;  %v643_v36 = vsel %vm443_vm2, %v621_v28, -inf  ;;  %v581_v19 = vld [vmem:[%s1944_s19 + $0x93] sm:$0x7] }
  0x5f   : > { %567 = vst.msk [vmem:[#allocation2 + $0x59] sm:$0x1] %vm362_vm1, %v527_v25  ;;  %v534_v34 = vmax.f32 %v532_v15, %v533_v26  ;;  %v546_v35 = vmax.f32 %v544_v16, %v545_v27  ;;  %v592_v37 = vmul.f32 %v1939_v0, %v576_v24  ;;  %v644_v41 = vrot.slane %v643_v36, 4 }
  0x60   : > { %v541_v39 = vmax.f32 %v539_v22, %v540_v29  ;;  %v639_v40 = vrot.slane %v638_v30, 2  ;;  %v606_v42 = vadd.f32 %v1949_v1, %v590_v31  ;;  %v607_v44 = vadd.f32 %v1949_v1, %v591_v32 }
  0x61   : > { %568 = vst.msk [vmem:[#allocation2 + $0x61] sm:$0x1] %vm362_vm1, %v534_v34  ;;  %v547_v43 = vrot.slane %v546_v35, 1  ;;  %v608_v45 = vadd.f32 %v1949_v1, %v592_v37  ;;  %v593_v46 = vmul.f32 %v1939_v0, %v577_v33  ;;  %v645_v48 = vmax.f32 %v643_v36, %v644_v41 }
  0x62   : > { %569 = vst.msk [vmem:[#allocation2 + $0x69] sm:$0x1] %vm362_vm1, %v541_v39  ;;  %v640_v47 = vmax.f32 %v638_v30, %v639_v40  ;;  %v622_v49 = vmax.f32 %v606_v42, 0.0  ;;  %v594_v50 = vmul.f32 %v1939_v0, %v578_v38  ;;  %v623_v52 = vmax.f32 %v607_v44, 0.0  ;;  %v582_v40 = vld [vmem:[%s1944_s19 + $0xa3] sm:$0x7] }
  0x63   : > { %v548_v51 = vmax.f32 %v546_v35, %v547_v43  ;;  %v624_v53 = vmax.f32 %v608_v45, 0.0  ;;  %v609_v54 = vadd.f32 %v1949_v1, %v593_v46  ;;  %v646_v56 = vrot.slane %v645_v48, 2  ;;  %v583_v45 = vld [vmem:[%s1944_s19 + $0xb3] sm:$0x7]  ;;  %v584_v46 = vld [vmem:[%s1944_s19 + $0xc3] sm:$0x7] }
  0x64   : > { %v641_v55 = vrot.slane %v640_v47, 1  ;;  %v650_v57 = vsel %vm443_vm2, %v622_v49, -inf  ;;  %v610_v58 = vadd.f32 %v1949_v1, %v594_v50  ;;  %v657_v61 = vsel %vm443_vm2, %v623_v52, -inf }
  0x65   : > { %570 = vst.msk [vmem:[#allocation2 + $0x71] sm:$0x1] %vm362_vm1, %v548_v51  ;;  %v651_v60 = vrot.slane %v650_v57, 4  ;;  %v664_v62 = vsel %vm443_vm2, %v624_v53, -inf  ;;  %v625_v63 = vmax.f32 %v609_v54, 0.0  ;;  %v647_v3 = vmax.f32 %v645_v48, %v646_v56 }
  0x66   : > { %v642_v2 = vmax.f32 %v640_v47, %v641_v55  ;;  %v658_v4 = vrot.slane %v657_v61, 4  ;;  %v665_v5 = vrot.slane %v664_v62, 4  ;;  %v626_v9 = vmax.f32 %v610_v58, 0.0 }
  0x67   : > { %v652_v7 = vmax.f32 %v650_v57, %v651_v60  ;;  %v671_v8 = vsel %vm443_vm2, %v625_v63, -inf  ;;  %v595_v10 = vmul.f32 %v1939_v0, %v579_v59  ;;  %v648_v11 = vrot.slane %v647_v3, 1  ;;  %v585_v59 = vld [vmem:[%s1944_s19 + $0xd3] sm:$0x7] }
  0x68   : > { %748 = vst.msk [vmem:[#allocation2 + $0x2] sm:$0x1] %vm362_vm1, %v642_v2  ;;  %v659_v12 = vmax.f32 %v657_v61, %v658_v4  ;;  %v666_v13 = vmax.f32 %v664_v62, %v665_v5  ;;  %v672_v14 = vrot.slane %v671_v8, 4  ;;  %v678_v16 = vsel %vm443_vm2, %v626_v9, -inf }
  0x69   : > { %v653_v15 = vrot.slane %v652_v7, 2  ;;  %v611_v17 = vadd.f32 %v1949_v1, %v595_v10  ;;  %v596_v18 = vmul.f32 %v1939_v0, %v580_v6  ;;  %v649_v20 = vmax.f32 %v647_v3, %v648_v11  ;;  %v586_v6 = vld [vmem:[%s1944_s19 + $0xe3] sm:$0x7] }
  0x6a   : > { %v660_v21 = vrot.slane %v659_v12, 2  ;;  %v667_v22 = vrot.slane %v666_v13, 2  ;;  %v673_v23 = vmax.f32 %v671_v8, %v672_v14  ;;  %v679_v25 = vrot.slane %v678_v16, 4 }
  0x6b   : > { %v654_v24 = vmax.f32 %v652_v7, %v653_v15  ;;  %v627_v26 = vmax.f32 %v611_v17, 0.0  ;;  %v612_v27 = vadd.f32 %v1949_v1, %v596_v18  ;;  %749 = vst.msk [vmem:[#allocation2 + $0xa] sm:$0x1] %vm362_vm1, %v649_v20  ;;  %v597_v31 = vmul.f32 %v1939_v0, %v581_v19 }
  0x6c   : > { %v661_v28 = vmax.f32 %v659_v12, %v660_v21  ;;  %v668_v29 = vmax.f32 %v666_v13, %v667_v22  ;;  %v674_v30 = vrot.slane %v673_v23, 2  ;;  %v680_v33 = vmax.f32 %v678_v16, %v679_v25 }
  0x6d   : > { %v655_v32 = vrot.slane %v654_v24, 1  ;;  %v685_v34 = vsel %vm443_vm2, %v627_v26, -inf  ;;  %v628_v35 = vmax.f32 %v612_v27, 0.0  ;;  %v613_v44 = vadd.f32 %v1949_v1, %v597_v31 }
  0x6e   : > { %v662_v36 = vrot.slane %v661_v28, 1  ;;  %v669_v37 = vrot.slane %v668_v29, 1  ;;  %v675_v38 = vmax.f32 %v673_v23, %v674_v30  ;;  %v686_v39 = vrot.slane %v685_v34, 4  ;;  %v764_v23 = vld [vmem:[%s1944_s19 + $0x5] sm:$0x7] }
  0x6f   : > { %v656_v41 = vmax.f32 %v654_v24, %v655_v32  ;;  %v681_v42 = vrot.slane %v680_v33, 2  ;;  %v692_v43 = vsel %vm443_vm2, %v628_v35, -inf  ;;  %v629_v53 = vmax.f32 %v613_v44, 0.0  ;;  %v765_v32 = vld [vmem:[%s1944_s19 + $0x15] sm:$0x7] }
  0x70   : > { %v663_v47 = vmax.f32 %v661_v28, %v662_v36  ;;  %v670_v48 = vmax.f32 %v668_v29, %v669_v37  ;;  %v676_v49 = vrot.slane %v675_v38, 1  ;;  %v687_v50 = vmax.f32 %v685_v34, %v686_v39  ;;  %v2173_v35 = vld [vmem:[%s2653_s1] ss:$0 sm:$0xff] }
  0x71   : > { %750 = vst.msk [vmem:[#allocation2 + $0x12] sm:$0x1] %vm362_vm1, %v656_v41  ;;  %v682_v51 = vmax.f32 %v680_v33, %v681_v42  ;;  %v693_v52 = vrot.slane %v692_v43, 4  ;;  %v598_v54 = vmul.f32 %v1939_v0, %v582_v40  ;;  %v599_v57 = vmul.f32 %v1939_v0, %v583_v45  ;;  %v2180_v42 = vld [vmem:[%s2654_s2] ss:$0 sm:$0xff] }
  0x72   : > { %751 = vst.msk [vmem:[#allocation2 + $0x1a] sm:$0x1] %vm362_vm1, %v663_v47  ;;  %752 = vst.msk [vmem:[#allocation2 + $0x22] sm:$0x1] %vm362_vm1, %v670_v48  ;;  %v677_v55 = vmax.f32 %v675_v38, %v676_v49  ;;  %v688_v56 = vrot.slane %v687_v50, 2  ;;  %v600_v58 = vmul.f32 %v1939_v0, %v584_v46  ;;  %v699_v62 = vsel %vm443_vm2, %v629_v53, -inf }
  0x73   : > { %v683_v60 = vrot.slane %v682_v51, 1  ;;  %v694_v61 = vmax.f32 %v692_v43, %v693_v52  ;;  %v614_v63 = vadd.f32 %v1949_v1, %v598_v54  ;;  %v700_v3 = vrot.slane %v699_v62, 4  ;;  %v766_v49 = vld [vmem:[%s1944_s19 + $0x25] sm:$0x7] }
  0x74   : > { %753 = vst.msk [vmem:[#allocation2 + $0x2a] sm:$0x1] %vm362_vm1, %v677_v55  ;;  %v689_v2 = vmax.f32 %v687_v50, %v688_v56  ;;  %v615_v4 = vadd.f32 %v1949_v1, %v599_v57  ;;  %v616_v5 = vadd.f32 %v1949_v1, %v600_v58  ;;  %v601_v10 = vmul.f32 %v1939_v0, %v585_v59 }
  0x75   : > { %v684_v7 = vmax.f32 %v682_v51, %v683_v60  ;;  %v695_v8 = vrot.slane %v694_v61, 2  ;;  %v630_v9 = vmax.f32 %v614_v63, 0.0  ;;  %v701_v12 = vmax.f32 %v699_v62, %v700_v3 }
  0x76   : > { %v690_v11 = vrot.slane %v689_v2, 1  ;;  %v631_v13 = vmax.f32 %v615_v4, 0.0  ;;  %v632_v14 = vmax.f32 %v616_v5, 0.0  ;;  %v617_v17 = vadd.f32 %v1949_v1, %v601_v10  ;;  %v767_v4 = vld [vmem:[%s1944_s19 + $0x35] sm:$0x7] }
  0x77   : > { %754 = vst.msk [vmem:[#allocation2 + $0x32] sm:$0x1] %vm362_vm1, %v684_v7  ;;  %v696_v15 = vmax.f32 %v694_v61, %v695_v8  ;;  %v706_v16 = vsel %vm443_vm2, %v630_v9, -inf  ;;  %v602_v18 = vmul.f32 %v1939_v0, %v586_v6  ;;  %v702_v20 = vrot.slane %v701_v12, 2  ;;  %v768_v5 = vld [vmem:[%s1944_s19 + $0x45] sm:$0x7] }
  0x78   : > { %v691_v19 = vmax.f32 %v689_v2, %v690_v11  ;;  %v707_v21 = vrot.slane %v706_v16, 4  ;;  %v713_v22 = vsel %vm443_vm2, %v631_v13, -inf  ;;  %v720_v26 = vsel %vm443_vm2, %v632_v14, -inf  ;;  %v769_v10 = vld [vmem:[%s1944_s19 + $0x55] sm:$0x7] }
  0x79   : > { %v697_v24 = vrot.slane %v696_v15, 1  ;;  %v714_v25 = vrot.slane %v713_v22, 4  ;;  %v633_v27 = vmax.f32 %v617_v17, 0.0  ;;  %v703_v28 = vmax.f32 %v701_v12, %v702_v20 }
  0x7a   : > { %755 = vst.msk [vmem:[#allocation2 + $0x3a] sm:$0x1] %vm362_vm1, %v691_v19  ;;  %v708_v29 = vmax.f32 %v706_v16, %v707_v21  ;;  %v721_v30 = vrot.slane %v720_v26, 4  ;;  %v618_v31 = vadd.f32 %v1949_v1, %v602_v18  ;;  %v780_v36 = vmul.f32 %v2173_v35, %v764_v23  ;;  %v770_v23 = vld [vmem:[%s1944_s19 + $0x65] sm:$0x7] }
  0x7b   : > { %v698_v0 = vmax.f32 %v696_v15, %v697_v24  ;;  %v715_v33 = vmax.f32 %v713_v22, %v714_v25  ;;  %v727_v34 = vsel %vm443_vm2, %v633_v27, -inf  ;;  %v704_v37 = vrot.slane %v703_v28, 1 }
  0x7c   : > { %v709_v38 = vrot.slane %v708_v29, 2  ;;  %v722_v39 = vmax.f32 %v720_v26, %v721_v30  ;;  %v728_v40 = vrot.slane %v727_v34, 4  ;;  %v634_v41 = vmax.f32 %v618_v31, 0.0 }
  0x7d   : > { %756 = vst.msk [vmem:[#allocation2 + $0x42] sm:$0x1] %vm362_vm1, %v698_v0  ;;  %v716_v1 = vrot.slane %v715_v33, 2  ;;  %v796_v43 = vadd.f32 %v2180_v42, %v780_v36  ;;  %v781_v44 = vmul.f32 %v2173_v35, %v765_v32  ;;  %v705_v45 = vmax.f32 %v703_v28, %v704_v37 }
  0x7e   : > { %v710_v46 = vmax.f32 %v708_v29, %v709_v38  ;;  %v723_v47 = vrot.slane %v722_v39, 2  ;;  %v729_v48 = vmax.f32 %v727_v34, %v728_v40  ;;  %v734_v51 = vsel %vm443_vm2, %v634_v41, -inf  ;;  %v771_v40 = vld [vmem:[%s1944_s19 + $0x75] sm:$0x7] }
  0x7f   : > { %v717_v50 = vmax.f32 %v715_v33, %v716_v1  ;;  %v812_v52 = vmax.f32 %v796_v43, 0.0  ;;  %v797_v53 = vadd.f32 %v2180_v42, %v781_v44  ;;  %757 = vst.msk [vmem:[#allocation2 + $0x4a] sm:$0x1] %vm362_vm1, %v705_v45  ;;  %v735_v57 = vrot.slane %v734_v51, 4 }
  0x80   : > { %v711_v54 = vrot.slane %v710_v46, 1  ;;  %v724_v55 = vmax.f32 %v722_v39, %v723_v47  ;;  %v730_v56 = vrot.slane %v729_v48, 2  ;;  %v782_v61 = vmul.f32 %v2173_v35, %v766_v49  ;;  %v772_v49 = vld [vmem:[%s1944_s19 + $0x85] sm:$0x7] }
  0x81   : > { %v718_v58 = vrot.slane %v717_v50, 1  ;;  %v828_v59 = vsel %vm443_vm2, %v812_v52, -inf  ;;  %v813_v60 = vmax.f32 %v797_v53, 0.0  ;;  %v736_v3 = vmax.f32 %v734_v51, %v735_v57 }
  0x82   : > { %v712_v62 = vmax.f32 %v710_v46, %v711_v54  ;;  %v725_v63 = vrot.slane %v724_v55, 1  ;;  %v731_v2 = vmax.f32 %v729_v48, %v730_v56  ;;  %v829_v7 = vrot.slane %v828_v59, 4 }
  0x83   : > { %v719_v6 = vmax.f32 %v717_v50, %v718_v58  ;;  %v835_v8 = vsel %vm443_vm2, %v813_v60, -inf  ;;  %v798_v9 = vadd.f32 %v2180_v42, %v782_v61  ;;  %v737_v13 = vrot.slane %v736_v3, 2  ;;  %v773_v58 = vld [vmem:[%s1944_s19 + $0x95] sm:$0x7] }
  0x84   : > { %758 = vst.msk [vmem:[#allocation2 + $0x52] sm:$0x1] %vm362_vm1, %v712_v62  ;;  %v726_v11 = vmax.f32 %v724_v55, %v725_v63  ;;  %v732_v12 = vrot.slane %v731_v2, 1  ;;  %v836_v14 = vrot.slane %v835_v8, 4  ;;  %v830_v15 = vmax.f32 %v828_v59, %v829_v7 }
  0x85   : > { %759 = vst.msk [vmem:[#allocation2 + $0x5a] sm:$0x1] %vm362_vm1, %v719_v6  ;;  %v814_v16 = vmax.f32 %v798_v9, 0.0  ;;  %v783_v17 = vmul.f32 %v2173_v35, %v767_v4  ;;  %v784_v18 = vmul.f32 %v2173_v35, %v768_v5  ;;  %v738_v20 = vmax.f32 %v736_v3, %v737_v13  ;;  %v774_v13 = vld [vmem:[%s1944_s19 + $0xa5] sm:$0x7] }
  0x86   : > { %760 = vst.msk [vmem:[#allocation2 + $0x62] sm:$0x1] %vm362_vm1, %v726_v11  ;;  %v733_v19 = vmax.f32 %v731_v2, %v732_v12  ;;  %v837_v21 = vmax.f32 %v835_v8, %v836_v14  ;;  %v785_v22 = vmul.f32 %v2173_v35, %v769_v10  ;;  %v831_v24 = vrot.slane %v830_v15, 2 }
  0x87   : > { %v842_v25 = vsel %vm443_vm2, %v814_v16, -inf  ;;  %v799_v26 = vadd.f32 %v2180_v42, %v783_v17  ;;  %v800_v27 = vadd.f32 %v2180_v42, %v784_v18  ;;  %v739_v28 = vrot.slane %v738_v20, 1 }
  0x88   : > { %761 = vst.msk [vmem:[#allocation2 + $0x6a] sm:$0x1] %vm362_vm1, %v733_v19  ;;  %v838_v29 = vrot.slane %v837_v21, 2  ;;  %v843_v30 = vrot.slane %v842_v25, 4  ;;  %v801_v31 = vadd.f32 %v2180_v42, %v785_v22  ;;  %v832_v32 = vmax.f32 %v830_v15, %v831_v24 }
  0x89   : > { %v815_v0 = vmax.f32 %v799_v26, 0.0  ;;  %v816_v33 = vmax.f32 %v800_v27, 0.0  ;;  %v786_v34 = vmul.f32 %v2173_v35, %v770_v23  ;;  %v740_v36 = vmax.f32 %v738_v20, %v739_v28  ;;  %v775_v26 = vld [vmem:[%s1944_s19 + $0xb5] sm:$0x7] }
  0x8a   : > { %v839_v37 = vmax.f32 %v837_v21, %v838_v29  ;;  %v844_v38 = vmax.f32 %v842_v25, %v843_v30  ;;  %v817_v39 = vmax.f32 %v801_v31, 0.0  ;;  %v833_v1 = vrot.slane %v832_v32, 1  ;;  %v776_v31 = vld [vmem:[%s1944_s19 + $0xc5] sm:$0x7] }
  0x8b   : > { %v849_v41 = vsel %vm443_vm2, %v815_v0, -inf  ;;  %v856_v43 = vsel %vm443_vm2, %v816_v33, -inf  ;;  %v802_v44 = vadd.f32 %v2180_v42, %v786_v34  ;;  %762 = vst.msk [vmem:[#allocation2 + $0x72] sm:$0x1] %vm362_vm1, %v740_v36  ;;  %v787_v53 = vmul.f32 %v2173_v35, %v771_v40  ;;  %v777_v40 = vld [vmem:[%s1944_s19 + $0xd5] sm:$0x7] }
  0x8c   : > { %v840_v45 = vrot.slane %v839_v37, 1  ;;  %v845_v46 = vrot.slane %v844_v38, 2  ;;  %v850_v47 = vrot.slane %v849_v41, 4  ;;  %v857_v48 = vrot.slane %v856_v43, 4 }
  0x8d   : > { %v834_v50 = vmax.f32 %v832_v32, %v833_v1  ;;  %v863_v51 = vsel %vm443_vm2, %v817_v39, -inf  ;;  %v818_v52 = vmax.f32 %v802_v44, 0.0  ;;  %v803_v61 = vadd.f32 %v2180_v42, %v787_v53 }
  0x8e   : > { %v841_v54 = vmax.f32 %v839_v37, %v840_v45  ;;  %v846_v55 = vmax.f32 %v844_v38, %v845_v46  ;;  %v851_v56 = vmax.f32 %v849_v41, %v850_v47  ;;  %v858_v57 = vmax.f32 %v856_v43, %v857_v48 }
  0x8f   : > { %940 = vst.msk [vmem:[#allocation2 + $0x3] sm:$0x1] %vm362_vm1, %v834_v50  ;;  %v864_v59 = vrot.slane %v863_v51, 4  ;;  %v870_v60 = vsel %vm443_vm2, %v818_v52, -inf  ;;  %v788_v62 = vmul.f32 %v2173_v35, %v772_v49  ;;  %v819_v6 = vmax.f32 %v803_v61, 0.0 }
  0x90   : > { %941 = vst.msk [vmem:[#allocation2 + $0xb] sm:$0x1] %vm362_vm1, %v841_v54  ;;  %v847_v63 = vrot.slane %v846_v55, 1  ;;  %v852_v2 = vrot.slane %v851_v56, 2  ;;  %v859_v3 = vrot.slane %v858_v57, 2  ;;  %v871_v4 = vrot.slane %v870_v60, 4 }
  0x91   : > { %v865_v5 = vmax.f32 %v863_v51, %v864_v59  ;;  %v804_v7 = vadd.f32 %v2180_v42, %v788_v62  ;;  %v789_v8 = vmul.f32 %v2173_v35, %v773_v58  ;;  %v877_v15 = vsel %vm443_vm2, %v819_v6, -inf  ;;  %v778_v49 = vld [vmem:[%s1944_s19 + $0xe5] sm:$0x7] }
  0x92   : > { %v848_v9 = vmax.f32 %v846_v55, %v847_v63  ;;  %v853_v10 = vmax.f32 %v851_v56, %v852_v2  ;;  %v860_v11 = vmax.f32 %v858_v57, %v859_v3  ;;  %v872_v12 = vmax.f32 %v870_v60, %v871_v4  ;;  %v956_v4 = vld [vmem:[%s1944_s19 + $0x7] sm:$0x7] }
  0x93   : > { %v866_v14 = vrot.slane %v865_v5, 2  ;;  %v820_v16 = vmax.f32 %v804_v7, 0.0  ;;  %v805_v17 = vadd.f32 %v2180_v42, %v789_v8  ;;  %v878_v21 = vrot.slane %v877_v15, 4 }
  0x94   : > { %942 = vst.msk [vmem:[#allocation2 + $0x13] sm:$0x1] %vm362_vm1, %v848_v9  ;;  %v854_v18 = vrot.slane %v853_v10, 1  ;;  %v861_v19 = vrot.slane %v860_v11, 1  ;;  %v873_v20 = vrot.slane %v872_v12, 2  ;;  %v790_v25 = vmul.f32 %v2173_v35, %v774_v13 }
  0x95   : > { %v867_v22 = vmax.f32 %v865_v5, %v866_v14  ;;  %v884_v23 = vsel %vm443_vm2, %v820_v16, -inf  ;;  %v821_v24 = vmax.f32 %v805_v17, 0.0  ;;  %v879_v30 = vmax.f32 %v877_v15, %v878_v21  ;;  %v957_v13 = vld [vmem:[%s1944_s19 + $0x17] sm:$0x7] }
  0x96   : > { %v855_v27 = vmax.f32 %v853_v10, %v854_v18  ;;  %v862_v28 = vmax.f32 %v860_v11, %v861_v19  ;;  %v874_v29 = vmax.f32 %v872_v12, %v873_v20  ;;  %v885_v0 = vrot.slane %v884_v23, 4  ;;  %v958_v18 = vld [vmem:[%s1944_s19 + $0x27] sm:$0x7] }
  0x97   : > { %v868_v32 = vrot.slane %v867_v22, 1  ;;  %v891_v33 = vsel %vm443_vm2, %v821_v24, -inf  ;;  %v806_v34 = vadd.f32 %v2180_v42, %v790_v25  ;;  %v880_v37 = vrot.slane %v879_v30, 2 }
  0x98   : > { %943 = vst.msk [vmem:[#allocation2 + $0x1b] sm:$0x1] %vm362_vm1, %v855_v27  ;;  %944 = vst.msk [vmem:[#allocation2 + $0x23] sm:$0x1] %vm362_vm1, %v862_v28  ;;  %v875_v36 = vrot.slane %v874_v29, 1  ;;  %v892_v38 = vrot.slane %v891_v33, 4  ;;  %v791_v39 = vmul.f32 %v2173_v35, %v775_v26  ;;  %v886_v41 = vmax.f32 %v884_v23, %v885_v0 }
  0x99   : > { %v869_v1 = vmax.f32 %v867_v22, %v868_v32  ;;  %v822_v43 = vmax.f32 %v806_v34, 0.0  ;;  %v792_v44 = vmul.f32 %v2173_v35, %v776_v31  ;;  %v881_v46 = vmax.f32 %v879_v30, %v880_v37 }
  0x9a   : > { %v876_v45 = vmax.f32 %v874_v29, %v875_v36  ;;  %v893_v47 = vmax.f32 %v891_v33, %v892_v38  ;;  %v807_v48 = vadd.f32 %v2180_v42, %v791_v39  ;;  %v887_v50 = vrot.slane %v886_v41, 2  ;;  %v959_v39 = vld [vmem:[%s1944_s19 + $0x37] sm:$0x7] }
  0x9b   : > { %945 = vst.msk [vmem:[#allocation2 + $0x2b] sm:$0x1] %vm362_vm1, %v869_v1  ;;  %v898_v51 = vsel %vm443_vm2, %v822_v43, -inf  ;;  %v808_v52 = vadd.f32 %v2180_v42, %v792_v44  ;;  %v793_v53 = vmul.f32 %v2173_v35, %v777_v40  ;;  %v882_v54 = vrot.slane %v881_v46, 1 }
  0x9c   : > { %946 = vst.msk [vmem:[#allocation2 + $0x33] sm:$0x1] %vm362_vm1, %v876_v45  ;;  %v894_v55 = vrot.slane %v893_v47, 2  ;;  %v899_v56 = vrot.slane %v898_v51, 4  ;;  %v823_v57 = vmax.f32 %v807_v48, 0.0  ;;  %v888_v58 = vmax.f32 %v886_v41, %v887_v50 }
  0x9d   : > { %v824_v59 = vmax.f32 %v808_v52, 0.0  ;;  %v809_v60 = vadd.f32 %v2180_v42, %v793_v53  ;;  %v794_v61 = vmul.f32 %v2173_v35, %v778_v49  ;;  %v883_v62 = vmax.f32 %v881_v46, %v882_v54  ;;  %v960_v48 = vld [vmem:[%s1944_s19 + $0x47] sm:$0x7] }
  0x9e   : > { %v895_v63 = vmax.f32 %v893_v47, %v894_v55  ;;  %v900_v2 = vmax.f32 %v898_v51, %v899_v56  ;;  %v905_v3 = vsel %vm443_vm2, %v823_v57, -inf  ;;  %v889_v5 = vrot.slane %v888_v58, 1  ;;  %v961_v57 = vld [vmem:[%s1944_s19 + $0x57] sm:$0x7] }
  0x9f   : > { %v906_v6 = vrot.slane %v905_v3, 4  ;;  %v912_v7 = vsel %vm443_vm2, %v824_v59, -inf  ;;  %v825_v8 = vmax.f32 %v809_v60, 0.0  ;;  %947 = vst.msk [vmem:[#allocation2 + $0x3b] sm:$0x1] %vm362_vm1, %v883_v62  ;;  %v810_v12 = vadd.f32 %v2180_v42, %v794_v61 }
  0xa0   : > { %v896_v9 = vrot.slane %v895_v63, 1  ;;  %v901_v10 = vrot.slane %v900_v2, 2  ;;  %v913_v11 = vrot.slane %v912_v7, 4  ;;  %v890_v14 = vmax.f32 %v888_v58, %v889_v5  ;;  %v962_v62 = vld [vmem:[%s1944_s19 + $0x67] sm:$0x7] }
  0xa1   : > { %v907_v15 = vmax.f32 %v905_v3, %v906_v6  ;;  %v919_v16 = vsel %vm443_vm2, %v825_v8, -inf  ;;  %v972_v17 = vmul.f32 %v2173_v35, %v956_v4  ;;  %v826_v24 = vmax.f32 %v810_v12, 0.0 }
  0xa2   : > { %v897_v19 = vmax.f32 %v895_v63, %v896_v9  ;;  %v902_v20 = vmax.f32 %v900_v2, %v901_v10  ;;  %v914_v21 = vmax.f32 %v912_v7, %v913_v11  ;;  %v920_v22 = vrot.slane %v919_v16, 4  ;;  %948 = vst.msk [vmem:[#allocation2 + $0x43] sm:$0x1] %vm362_vm1, %v890_v14 }
  0xa3   : > { %v908_v23 = vrot.slane %v907_v15, 2  ;;  %v988_v25 = vadd.f32 %v2180_v42, %v972_v17  ;;  %v973_v26 = vmul.f32 %v2173_v35, %v957_v13  ;;  %v974_v30 = vmul.f32 %v2173_v35, %v958_v18 }
  0xa4   : > { %949 = vst.msk [vmem:[#allocation2 + $0x4b] sm:$0x1] %vm362_vm1, %v897_v19  ;;  %v903_v27 = vrot.slane %v902_v20, 1  ;;  %v915_v28 = vrot.slane %v914_v21, 2  ;;  %v921_v29 = vmax.f32 %v919_v16, %v920_v22  ;;  %v926_v32 = vsel %vm443_vm2, %v826_v24, -inf }
  0xa5   : > { %v909_v31 = vmax.f32 %v907_v15, %v908_v23  ;;  %v1004_v0 = vmax.f32 %v988_v25, 0.0  ;;  %v989_v33 = vadd.f32 %v2180_v42, %v973_v26  ;;  %v927_v38 = vrot.slane %v926_v32, 4 }
  0xa6   : > { %v904_v34 = vmax.f32 %v902_v20, %v903_v27  ;;  %v916_v36 = vmax.f32 %v914_v21, %v915_v28  ;;  %v922_v37 = vrot.slane %v921_v29, 2  ;;  %v990_v43 = vadd.f32 %v2180_v42, %v974_v30  ;;  %v963_v21 = vld [vmem:[%s1944_s19 + $0x77] sm:$0x7]  ;;  %v964_v30 = vld [vmem:[%s1944_s19 + $0x87] sm:$0x7] }
  0xa7   : > { %v910_v40 = vrot.slane %v909_v31, 1  ;;  %v1020_v1 = vsel %vm443_vm2, %v1004_v0, -inf  ;;  %v1005_v41 = vmax.f32 %v989_v33, 0.0  ;;  %v928_v46 = vmax.f32 %v926_v32, %v927_v38 }
  0xa8   : > { %950 = vst.msk [vmem:[#allocation2 + $0x53] sm:$0x1] %vm362_vm1, %v904_v34  ;;  %v917_v44 = vrot.slane %v916_v36, 1  ;;  %v923_v45 = vmax.f32 %v921_v29, %v922_v37  ;;  %v1021_v47 = vrot.slane %v1020_v1, 4  ;;  %v1006_v51 = vmax.f32 %v990_v43, 0.0 }
  0xa9   : > { %v911_v49 = vmax.f32 %v909_v31, %v910_v40  ;;  %v1027_v50 = vsel %vm443_vm2, %v1005_v41, -inf  ;;  %v975_v52 = vmul.f32 %v2173_v35, %v959_v39  ;;  %v929_v55 = vrot.slane %v928_v46, 2  ;;  %v965_v39 = vld [vmem:[%s1944_s19 + $0x97] sm:$0x7] }
  0xaa   : > { %v918_v53 = vmax.f32 %v916_v36, %v917_v44  ;;  %v924_v54 = vrot.slane %v923_v45, 1  ;;  %v1022_v56 = vmax.f32 %v1020_v1, %v1021_v47  ;;  %v1028_v58 = vrot.slane %v1027_v50, 4  ;;  %v966_v44 = vld [vmem:[%s1944_s19 + $0xa7] sm:$0x7] }
  0xab   : > { %951 = vst.msk [vmem:[#allocation2 + $0x5b] sm:$0x1] %vm362_vm1, %v911_v49  ;;  %v1034_v59 = vsel %vm443_vm2, %v1006_v51, -inf  ;;  %v991_v60 = vadd.f32 %v2180_v42, %v975_v52  ;;  %v976_v61 = vmul.f32 %v2173_v35, %v960_v48  ;;  %v930_v2 = vmax.f32 %v928_v46, %v929_v55 }
  0xac   : > { %952 = vst.msk [vmem:[#allocation2 + $0x63] sm:$0x1] %vm362_vm1, %v918_v53  ;;  %v925_v63 = vmax.f32 %v923_v45, %v924_v54  ;;  %v1023_v3 = vrot.slane %v1022_v56, 2  ;;  %v1035_v4 = vrot.slane %v1034_v59, 4  ;;  %v1029_v5 = vmax.f32 %v1027_v50, %v1028_v58 }
  0xad   : > { %v1007_v6 = vmax.f32 %v991_v60, 0.0  ;;  %v992_v7 = vadd.f32 %v2180_v42, %v976_v61  ;;  %v977_v8 = vmul.f32 %v2173_v35, %v961_v57  ;;  %v931_v9 = vrot.slane %v930_v2, 1 }
  0xae   : > { %953 = vst.msk [vmem:[#allocation2 + $0x6b] sm:$0x1] %vm362_vm1, %v925_v63  ;;  %v1024_v10 = vmax.f32 %v1022_v56, %v1023_v3  ;;  %v1036_v11 = vmax.f32 %v1034_v59, %v1035_v4  ;;  %v978_v12 = vmul.f32 %v2173_v35, %v962_v62  ;;  %v1030_v13 = vrot.slane %v1029_v5, 2  ;;  %v967_v3 = vld [vmem:[%s1944_s19 + $0xb7] sm:$0x7] }
  0xaf   : > { %v1041_v14 = vsel %vm443_vm2, %v1007_v6, -inf  ;;  %v1008_v15 = vmax.f32 %v992_v7, 0.0  ;;  %v993_v16 = vadd.f32 %v2180_v42, %v977_v8  ;;  %v932_v17 = vmax.f32 %v930_v2, %v931_v9 }
  0xb0   : > { %v1025_v18 = vrot.slane %v1024_v10, 1  ;;  %v1037_v19 = vrot.slane %v1036_v11, 2  ;;  %v1042_v20 = vrot.slane %v1041_v14, 4  ;;  %v1031_v22 = vmax.f32 %v1029_v5, %v1030_v13 }
  0xb1   : > { %v1048_v23 = vsel %vm443_vm2, %v1008_v15, -inf  ;;  %v1009_v24 = vmax.f32 %v993_v16, 0.0  ;;  %v994_v25 = vadd.f32 %v2180_v42, %v978_v12  ;;  %954 = vst.msk [vmem:[#allocation2 + $0x73] sm:$0x1] %vm362_vm1, %v932_v17  ;;  %v979_v33 = vmul.f32 %v2173_v35, %v963_v21  ;;  %v968_v12 = vld [vmem:[%s1944_s19 + $0xc7] sm:$0x7] }
  0xb2   : > { %v1026_v26 = vmax.f32 %v1024_v10, %v1025_v18  ;;  %v1038_v27 = vmax.f32 %v1036_v11, %v1037_v19  ;;  %v1043_v28 = vmax.f32 %v1041_v14, %v1042_v20  ;;  %v1049_v29 = vrot.slane %v1048_v23, 4  ;;  %v969_v21 = vld [vmem:[%s1944_s19 + $0xd7] sm:$0x7] }
  0xb3   : > { %v1032_v31 = vrot.slane %v1031_v22, 1  ;;  %v1055_v32 = vsel %vm443_vm2, %v1009_v24, -inf  ;;  %v1010_v0 = vmax.f32 %v994_v25, 0.0  ;;  %v995_v41 = vadd.f32 %v2180_v42, %v979_v33 }
  0xb4   : > { %1132 = vst.msk [vmem:[#allocation2 + $0x4] sm:$0x1] %vm362_vm1, %v1026_v26  ;;  %v1039_v34 = vrot.slane %v1038_v27, 1  ;;  %v1044_v36 = vrot.slane %v1043_v28, 2  ;;  %v1050_v37 = vmax.f32 %v1048_v23, %v1049_v29  ;;  %v1056_v38 = vrot.slane %v1055_v32, 4 }
  0xb5   : > { %v1033_v40 = vmax.f32 %v1031_v22, %v1032_v31  ;;  %v1062_v1 = vsel %vm443_vm2, %v1010_v0, -inf  ;;  %v980_v43 = vmul.f32 %v2173_v35, %v964_v30  ;;  %v1011_v50 = vmax.f32 %v995_v41, 0.0  ;;  %v970_v30 = vld [vmem:[%s1944_s19 + $0xe7] sm:$0x7] }
  0xb6   : > { %v1040_v45 = vmax.f32 %v1038_v27, %v1039_v34  ;;  %v1045_v46 = vmax.f32 %v1043_v28, %v1044_v36  ;;  %v1051_v47 = vrot.slane %v1050_v37, 2  ;;  %v1057_v48 = vmax.f32 %v1055_v32, %v1056_v38 }
  0xb7   : > { %1133 = vst.msk [vmem:[#allocation2 + $0xc] sm:$0x1] %vm362_vm1, %v1033_v40  ;;  %v1063_v49 = vrot.slane %v1062_v1, 4  ;;  %v996_v51 = vadd.f32 %v2180_v42, %v980_v43  ;;  %v981_v52 = vmul.f32 %v2173_v35, %v965_v39  ;;  %v982_v56 = vmul.f32 %v2173_v35, %v966_v44 }
  0xb8   : > { %1134 = vst.msk [vmem:[#allocation2 + $0x14] sm:$0x1] %vm362_vm1, %v1040_v45  ;;  %v1046_v53 = vrot.slane %v1045_v46, 1  ;;  %v1052_v54 = vmax.f32 %v1050_v37, %v1051_v47  ;;  %v1058_v55 = vrot.slane %v1057_v48, 2  ;;  %v1069_v58 = vsel %vm443_vm2, %v1011_v50, -inf }
  0xb9   : > { %v1064_v57 = vmax.f32 %v1062_v1, %v1063_v49  ;;  %v1012_v59 = vmax.f32 %v996_v51, 0.0  ;;  %v997_v60 = vadd.f32 %v2180_v42, %v981_v52  ;;  %v1070_v2 = vrot.slane %v1069_v58, 4  ;;  %v1148_v47 = vld [vmem:[%s1944_s19 + $0x9] sm:$0x7] }
  0xba   : > { %v1047_v61 = vmax.f32 %v1045_v46, %v1046_v53  ;;  %v1053_v62 = vrot.slane %v1052_v54, 1  ;;  %v1059_v63 = vmax.f32 %v1057_v48, %v1058_v55  ;;  %v998_v7 = vadd.f32 %v2180_v42, %v982_v56  ;;  %v1149_v56 = vld [vmem:[%s1944_s19 + $0x19] sm:$0x7] }
  0xbb   : > { %v1065_v4 = vrot.slane %v1064_v57, 2  ;;  %v1076_v5 = vsel %vm443_vm2, %v1012_v59, -inf  ;;  %v1013_v6 = vmax.f32 %v997_v60, 0.0  ;;  %v1071_v10 = vmax.f32 %v1069_v58, %v1070_v2 }
  0xbc   : > { %1135 = vst.msk [vmem:[#allocation2 + $0x1c] sm:$0x1] %vm362_vm1, %v1047_v61  ;;  %v1054_v8 = vmax.f32 %v1052_v54, %v1053_v62  ;;  %v1060_v9 = vrot.slane %v1059_v63, 1  ;;  %v1077_v11 = vrot.slane %v1076_v5, 4  ;;  %v1014_v15 = vmax.f32 %v998_v7, 0.0 }
  0xbd   : > { %v1066_v13 = vmax.f32 %v1064_v57, %v1065_v4  ;;  %v1083_v14 = vsel %vm443_vm2, %v1013_v6, -inf  ;;  %v983_v16 = vmul.f32 %v2173_v35, %v967_v3  ;;  %v1072_v18 = vrot.slane %v1071_v10, 2  ;;  %v1150_v3 = vld [vmem:[%s1944_s19 + $0x29] sm:$0x7] }
  0xbe   : > { %1136 = vst.msk [vmem:[#allocation2 + $0x24] sm:$0x1] %vm362_vm1, %v1054_v8  ;;  %v1061_v17 = vmax.f32 %v1059_v63, %v1060_v9  ;;  %v1078_v19 = vmax.f32 %v1076_v5, %v1077_v11  ;;  %v1084_v20 = vrot.slane %v1083_v14, 4  ;;  %v1090_v23 = vsel %vm443_vm2, %v1014_v15, -inf  ;;  %v1151_v8 = vld [vmem:[%s1944_s19 + $0x39] sm:$0x7] }
  0xbf   : > { %v1067_v22 = vrot.slane %v1066_v13, 1  ;;  %v999_v24 = vadd.f32 %v2180_v42, %v983_v16  ;;  %v984_v25 = vmul.f32 %v2173_v35, %v968_v12  ;;  %v1073_v26 = vmax.f32 %v1071_v10, %v1072_v18 }
  0xc0   : > { %1137 = vst.msk [vmem:[#allocation2 + $0x2c] sm:$0x1] %vm362_vm1, %v1061_v17  ;;  %v1079_v27 = vrot.slane %v1078_v19, 2  ;;  %v1085_v28 = vmax.f32 %v1083_v14, %v1084_v20  ;;  %v1091_v29 = vrot.slane %v1090_v23, 4  ;;  %v985_v33 = vmul.f32 %v2173_v35, %v969_v21 }
  0xc1   : > { %v1068_v31 = vmax.f32 %v1066_v13, %v1067_v22  ;;  %v1015_v32 = vmax.f32 %v999_v24, 0.0  ;;  %v1000_v0 = vadd.f32 %v2180_v42, %v984_v25  ;;  %v1074_v34 = vrot.slane %v1073_v26, 1 }
  0xc2   : > { %v1080_v36 = vmax.f32 %v1078_v19, %v1079_v27  ;;  %v1086_v37 = vrot.slane %v1085_v28, 2  ;;  %v1092_v38 = vmax.f32 %v1090_v23, %v1091_v29  ;;  %v1001_v1 = vadd.f32 %v2180_v42, %v985_v33  ;;  %v1152_v29 = vld [vmem:[%s1944_s19 + $0x49] sm:$0x7] }
  0xc3   : > { %1138 = vst.msk [vmem:[#allocation2 + $0x34] sm:$0x1] %vm362_vm1, %v1068_v31  ;;  %v1097_v39 = vsel %vm443_vm2, %v1015_v32, -inf  ;;  %v1016_v40 = vmax.f32 %v1000_v0, 0.0  ;;  %v986_v41 = vmul.f32 %v2173_v35, %v970_v30  ;;  %v1075_v43 = vmax.f32 %v1073_v26, %v1074_v34 }
  0xc4   : > { %v1081_v44 = vrot.slane %v1080_v36, 1  ;;  %v1087_v45 = vmax.f32 %v1085_v28, %v1086_v37  ;;  %v1093_v46 = vrot.slane %v1092_v38, 2  ;;  %v1098_v48 = vrot.slane %v1097_v39, 4 }
  0xc5   : > { %v1104_v49 = vsel %vm443_vm2, %v1016_v40, -inf  ;;  %v1017_v50 = vmax.f32 %v1001_v1, 0.0  ;;  %v1002_v51 = vadd.f32 %v2180_v42, %v986_v41  ;;  %1139 = vst.msk [vmem:[#allocation2 + $0x3c] sm:$0x1] %vm362_vm1, %v1075_v43  ;;  %v1164_v60 = vmul.f32 %v2173_v35, %v1148_v47  ;;  %v1154_v47 = vld [vmem:[%s1944_s19 + $0x69] sm:$0x7] }
  0xc6   : > { %v1082_v52 = vmax.f32 %v1080_v36, %v1081_v44  ;;  %v1088_v53 = vrot.slane %v1087_v45, 1  ;;  %v1094_v54 = vmax.f32 %v1092_v38, %v1093_v46  ;;  %v1105_v55 = vrot.slane %v1104_v49, 4  ;;  %v1153_v38 = vld [vmem:[%s1944_s19 + $0x59] sm:$0x7] }
  0xc7   : > { %v1099_v57 = vmax.f32 %v1097_v39, %v1098_v48  ;;  %v1111_v58 = vsel %vm443_vm2, %v1017_v50, -inf  ;;  %v1018_v59 = vmax.f32 %v1002_v51, 0.0  ;;  %v1180_v6 = vadd.f32 %v2180_v42, %v1164_v60 }
  0xc8   : > { %1140 = vst.msk [vmem:[#allocation2 + $0x44] sm:$0x1] %vm362_vm1, %v1082_v52  ;;  %v1089_v61 = vmax.f32 %v1087_v45, %v1088_v53  ;;  %v1095_v62 = vrot.slane %v1094_v54, 1  ;;  %v1106_v63 = vmax.f32 %v1104_v49, %v1105_v55  ;;  %v1112_v2 = vrot.slane %v1111_v58, 4  ;;  %v1155_v52 = vld [vmem:[%s1944_s19 + $0x79] sm:$0x7] }
  0xc9   : > { %v1100_v4 = vrot.slane %v1099_v57, 2  ;;  %v1118_v5 = vsel %vm443_vm2, %v1018_v59, -inf  ;;  %v1165_v7 = vmul.f32 %v2173_v35, %v1149_v56  ;;  %v1196_v14 = vmax.f32 %v1180_v6, 0.0 }
  0xca   : > { %1141 = vst.msk [vmem:[#allocation2 + $0x4c] sm:$0x1] %vm362_vm1, %v1089_v61  ;;  %v1096_v9 = vmax.f32 %v1094_v54, %v1095_v62  ;;  %v1107_v10 = vrot.slane %v1106_v63, 2  ;;  %v1113_v11 = vmax.f32 %v1111_v58, %v1112_v2  ;;  %v1119_v12 = vrot.slane %v1118_v5, 4 }
  0xcb   : > { %v1101_v13 = vmax.f32 %v1099_v57, %v1100_v4  ;;  %v1181_v15 = vadd.f32 %v2180_v42, %v1165_v7  ;;  %v1166_v16 = vmul.f32 %v2173_v35, %v1150_v3  ;;  %v1167_v20 = vmul.f32 %v2173_v35, %v1151_v8 }
  0xcc   : > { %1142 = vst.msk [vmem:[#allocation2 + $0x54] sm:$0x1] %vm362_vm1, %v1096_v9  ;;  %v1108_v17 = vmax.f32 %v1106_v63, %v1107_v10  ;;  %v1114_v18 = vrot.slane %v1113_v11, 2  ;;  %v1120_v19 = vmax.f32 %v1118_v5, %v1119_v12  ;;  %v1212_v22 = vsel %vm443_vm2, %v1196_v14, -inf }
  0xcd   : > { %v1102_v21 = vrot.slane %v1101_v13, 1  ;;  %v1197_v23 = vmax.f32 %v1181_v15, 0.0  ;;  %v1182_v24 = vadd.f32 %v2180_v42, %v1166_v16  ;;  %v1213_v28 = vrot.slane %v1212_v22, 4 }
  0xce   : > { %v1109_v25 = vrot.slane %v1108_v17, 1  ;;  %v1115_v26 = vmax.f32 %v1113_v11, %v1114_v18  ;;  %v1121_v27 = vrot.slane %v1120_v19, 2  ;;  %v1183_v0 = vadd.f32 %v2180_v42, %v1167_v20  ;;  %v1156_v11 = vld [vmem:[%s1944_s19 + $0x89] sm:$0x7]  ;;  %v1157_v20 = vld [vmem:[%s1944_s19 + $0x99] sm:$0x7] }
  0xcf   : > { %v1103_v30 = vmax.f32 %v1101_v13, %v1102_v21  ;;  %v1219_v31 = vsel %vm443_vm2, %v1197_v23, -inf  ;;  %v1198_v32 = vmax.f32 %v1182_v24, 0.0  ;;  %v1214_v37 = vmax.f32 %v1212_v22, %v1213_v28 }
  0xd0   : > { %v1110_v33 = vmax.f32 %v1108_v17, %v1109_v25  ;;  %v1116_v34 = vrot.slane %v1115_v26, 1  ;;  %v1122_v36 = vmax.f32 %v1120_v19, %v1121_v27  ;;  %v1220_v39 = vrot.slane %v1219_v31, 4 }
  0xd1   : > { %1143 = vst.msk [vmem:[#allocation2 + $0x5c] sm:$0x1] %vm362_vm1, %v1103_v30  ;;  %v1226_v40 = vsel %vm443_vm2, %v1198_v32, -inf  ;;  %v1199_v1 = vmax.f32 %v1183_v0, 0.0  ;;  %v1168_v41 = vmul.f32 %v2173_v35, %v1152_v29  ;;  %v1215_v45 = vrot.slane %v1214_v37, 2 }
  0xd2   : > { %1144 = vst.msk [vmem:[#allocation2 + $0x64] sm:$0x1] %vm362_vm1, %v1110_v33  ;;  %v1117_v43 = vmax.f32 %v1115_v26, %v1116_v34  ;;  %v1123_v44 = vrot.slane %v1122_v36, 1  ;;  %v1227_v46 = vrot.slane %v1226_v40, 4  ;;  %v1221_v48 = vmax.f32 %v1219_v31, %v1220_v39  ;;  %v1158_v29 = vld [vmem:[%s1944_s19 + $0xa9] sm:$0x7] }
  0xd3   : > { %v1233_v49 = vsel %vm443_vm2, %v1199_v1, -inf  ;;  %v1184_v50 = vadd.f32 %v2180_v42, %v1168_v41  ;;  %v1169_v51 = vmul.f32 %v2173_v35, %v1153_v38  ;;  %v1216_v54 = vmax.f32 %v1214_v37, %v1215_v45  ;;  %v1159_v33 = vld [vmem:[%s1944_s19 + $0xb9] sm:$0x7] }
  0xd4   : > { %1145 = vst.msk [vmem:[#allocation2 + $0x6c] sm:$0x1] %vm362_vm1, %v1117_v43  ;;  %v1124_v53 = vmax.f32 %v1122_v36, %v1123_v44  ;;  %v1228_v55 = vmax.f32 %v1226_v40, %v1227_v46  ;;  %v1234_v56 = vrot.slane %v1233_v49, 4  ;;  %v1222_v57 = vrot.slane %v1221_v48, 2 }
  0xd5   : > { %v1200_v58 = vmax.f32 %v1184_v50, 0.0  ;;  %v1185_v59 = vadd.f32 %v2180_v42, %v1169_v51  ;;  %v1170_v60 = vmul.f32 %v2173_v35, %v1154_v47  ;;  %v1217_v61 = vrot.slane %v1216_v54, 1 }
  0xd6   : > { %1146 = vst.msk [vmem:[#allocation2 + $0x74] sm:$0x1] %vm362_vm1, %v1124_v53  ;;  %v1229_v62 = vrot.slane %v1228_v55, 2  ;;  %v1235_v63 = vmax.f32 %v1233_v49, %v1234_v56  ;;  %v1171_v2 = vmul.f32 %v2173_v35, %v1155_v52  ;;  %v1223_v3 = vmax.f32 %v1221_v48, %v1222_v57 }
  0xd7   : > { %v1240_v4 = vsel %vm443_vm2, %v1200_v58, -inf  ;;  %v1201_v5 = vmax.f32 %v1185_v59, 0.0  ;;  %v1186_v6 = vadd.f32 %v2180_v42, %v1170_v60  ;;  %v1218_v7 = vmax.f32 %v1216_v54, %v1217_v61 }
  0xd8   : > { %v1230_v8 = vmax.f32 %v1228_v55, %v1229_v62  ;;  %v1236_v9 = vrot.slane %v1235_v63, 2  ;;  %v1241_v10 = vrot.slane %v1240_v4, 4  ;;  %v1224_v12 = vrot.slane %v1223_v3, 1  ;;  %v1160_v55 = vld [vmem:[%s1944_s19 + $0xc9] sm:$0x7] }
  0xd9   : > { %v1247_v13 = vsel %vm443_vm2, %v1201_v5, -inf  ;;  %v1202_v14 = vmax.f32 %v1186_v6, 0.0  ;;  %v1187_v15 = vadd.f32 %v2180_v42, %v1171_v2  ;;  %1324 = vst.msk [vmem:[#allocation2 + $0x5] sm:$0x1] %vm362_vm1, %v1218_v7  ;;  %v1172_v24 = vmul.f32 %v2173_v35, %v1156_v11  ;;  %v1161_v2 = vld [vmem:[%s1944_s19 + $0xd9] sm:$0x7] }
  0xda   : > { %v1231_v16 = vrot.slane %v1230_v8, 1  ;;  %v1237_v17 = vmax.f32 %v1235_v63, %v1236_v9  ;;  %v1242_v18 = vmax.f32 %v1240_v4, %v1241_v10  ;;  %v1248_v19 = vrot.slane %v1247_v13, 4  ;;  %v1162_v11 = vld [vmem:[%s1944_s19 + $0xe9] sm:$0x7] }
  0xdb   : > { %v1225_v21 = vmax.f32 %v1223_v3, %v1224_v12  ;;  %v1254_v22 = vsel %vm443_vm2, %v1202_v14, -inf  ;;  %v1203_v23 = vmax.f32 %v1187_v15, 0.0  ;;  %v1188_v32 = vadd.f32 %v2180_v42, %v1172_v24  ;;  %v2398_v15 = vld [vmem:[%s2653_s1] ss:$0 sm:$0xff] }
  0xdc   : > { %v1232_v25 = vmax.f32 %v1230_v8, %v1231_v16  ;;  %v1238_v26 = vrot.slane %v1237_v17, 1  ;;  %v1243_v27 = vrot.slane %v1242_v18, 2  ;;  %v1249_v28 = vmax.f32 %v1247_v13, %v1248_v19 }
  0xdd   : > { %1325 = vst.msk [vmem:[#allocation2 + $0xd] sm:$0x1] %vm362_vm1, %v1225_v21  ;;  %v1255_v30 = vrot.slane %v1254_v22, 4  ;;  %v1261_v31 = vsel %vm443_vm2, %v1203_v23, -inf  ;;  %v1173_v0 = vmul.f32 %v2173_v35, %v1157_v20  ;;  %v1204_v40 = vmax.f32 %v1188_v32, 0.0 }
  0xde   : > { %1326 = vst.msk [vmem:[#allocation2 + $0x15] sm:$0x1] %vm362_vm1, %v1232_v25  ;;  %v1239_v34 = vmax.f32 %v1237_v17, %v1238_v26  ;;  %v1244_v36 = vmax.f32 %v1242_v18, %v1243_v27  ;;  %v1250_v37 = vrot.slane %v1249_v28, 2  ;;  %v1262_v38 = vrot.slane %v1261_v31, 4 }
  0xdf   : > { %v1256_v39 = vmax.f32 %v1254_v22, %v1255_v30  ;;  %v1189_v1 = vadd.f32 %v2180_v42, %v1173_v0  ;;  %v1174_v41 = vmul.f32 %v2173_v35, %v1158_v29  ;;  %v1175_v46 = vmul.f32 %v2173_v35, %v1159_v33 }
  0xe0   : > { %1327 = vst.msk [vmem:[#allocation2 + $0x1d] sm:$0x1] %vm362_vm1, %v1239_v34  ;;  %v1245_v43 = vrot.slane %v1244_v36, 1  ;;  %v1251_v44 = vmax.f32 %v1249_v28, %v1250_v37  ;;  %v1263_v45 = vmax.f32 %v1261_v31, %v1262_v38  ;;  %v1268_v48 = vsel %vm443_vm2, %v1204_v40, -inf  ;;  %v1341_v37 = vld [vmem:[%s1944_s19 + $0x1b] sm:$0x7] }
  0xe1   : > { %v1257_v47 = vrot.slane %v1256_v39, 2  ;;  %v1205_v49 = vmax.f32 %v1189_v1, 0.0  ;;  %v1190_v50 = vadd.f32 %v2180_v42, %v1174_v41  ;;  %v1269_v54 = vrot.slane %v1268_v48, 4 }
  0xe2   : > { %v1246_v51 = vmax.f32 %v1244_v36, %v1245_v43  ;;  %v1252_v52 = vrot.slane %v1251_v44, 1  ;;  %v1264_v53 = vrot.slane %v1263_v45, 2  ;;  %v1191_v59 = vadd.f32 %v2180_v42, %v1175_v46  ;;  %v1342_v46 = vld [vmem:[%s1944_s19 + $0x2b] sm:$0x7] }
  0xe3   : > { %v1258_v56 = vmax.f32 %v1256_v39, %v1257_v47  ;;  %v1275_v57 = vsel %vm443_vm2, %v1205_v49, -inf  ;;  %v1206_v58 = vmax.f32 %v1190_v50, 0.0  ;;  %v1270_v62 = vmax.f32 %v1268_v48, %v1269_v54 }
  0xe4   : > { %1328 = vst.msk [vmem:[#allocation2 + $0x25] sm:$0x1] %vm362_vm1, %v1246_v51  ;;  %v1253_v60 = vmax.f32 %v1251_v44, %v1252_v52  ;;  %v1265_v61 = vmax.f32 %v1263_v45, %v1264_v53  ;;  %v1276_v63 = vrot.slane %v1275_v57, 4  ;;  %v1207_v5 = vmax.f32 %v1191_v59, 0.0 }
  0xe5   : > { %v1259_v3 = vrot.slane %v1258_v56, 1  ;;  %v1282_v4 = vsel %vm443_vm2, %v1206_v58, -inf  ;;  %v1176_v6 = vmul.f32 %v2173_v35, %v1160_v55  ;;  %v1271_v8 = vrot.slane %v1270_v62, 2  ;;  %v1340_v35 = vld [vmem:[%s1944_s19 + $0xb] sm:$0x7] }
  0xe6   : > { %1329 = vst.msk [vmem:[#allocation2 + $0x2d] sm:$0x1] %vm362_vm1, %v1253_v60  ;;  %v1266_v7 = vrot.slane %v1265_v61, 1  ;;  %v1277_v9 = vmax.f32 %v1275_v57, %v1276_v63  ;;  %v1283_v10 = vrot.slane %v1282_v4, 4  ;;  %v1289_v13 = vsel %vm443_vm2, %v1207_v5, -inf }
  0xe7   : > { %v1260_v12 = vmax.f32 %v1258_v56, %v1259_v3  ;;  %v1192_v14 = vadd.f32 %v2180_v42, %v1176_v6  ;;  %v1177_v16 = vmul.f32 %v2398_v15, %v1161_v2  ;;  %v1272_v18 = vmax.f32 %v1270_v62, %v1271_v8  ;;  %v2406_v42 = vld [vmem:[%s2654_s2] ss:$0 sm:$0xff]  ;;  %v1343_v55 = vld [vmem:[%s1944_s19 + $0x3b] sm:$0x7]  ;;  %v1344_v2 = vld [vmem:[%s1944_s19 + $0x4b] sm:$0x7] }
  0xe8   : > { %v1267_v17 = vmax.f32 %v1265_v61, %v1266_v7  ;;  %v1278_v19 = vrot.slane %v1277_v9, 2  ;;  %v1284_v20 = vmax.f32 %v1282_v4, %v1283_v10  ;;  %v1290_v21 = vrot.slane %v1289_v13, 4 }
  0xe9   : > { %1330 = vst.msk [vmem:[#allocation2 + $0x35] sm:$0x1] %vm362_vm1, %v1260_v12  ;;  %v1208_v22 = vmax.f32 %v1192_v14, 0.0  ;;  %v1193_v23 = vadd.f32 %v2406_v42, %v1177_v16  ;;  %v1178_v24 = vmul.f32 %v2398_v15, %v1162_v11  ;;  %v1273_v25 = vrot.slane %v1272_v18, 1 }
  0xea   : > { %1331 = vst.msk [vmem:[#allocation2 + $0x3d] sm:$0x1] %vm362_vm1, %v1267_v17  ;;  %v1279_v26 = vmax.f32 %v1277_v9, %v1278_v19  ;;  %v1285_v27 = vrot.slane %v1284_v20, 2  ;;  %v1356_v28 = vmul.f32 %v2398_v15, %v1340_v35  ;;  %v1291_v29 = vmax.f32 %v1289_v13, %v1290_v21  ;;  %v1345_v19 = vld [vmem:[%s1944_s19 + $0x5b] sm:$0x7] }
  0xeb   : > { %v1296_v30 = vsel %vm443_vm2, %v1208_v22, -inf  ;;  %v1209_v31 = vmax.f32 %v1193_v23, 0.0  ;;  %v1194_v32 = vadd.f32 %v2406_v42, %v1178_v24  ;;  %v1274_v0 = vmax.f32 %v1272_v18, %v1273_v25 }
  0xec   : > { %v1280_v33 = vrot.slane %v1279_v26, 1  ;;  %v1286_v34 = vmax.f32 %v1284_v20, %v1285_v27  ;;  %v1297_v36 = vrot.slane %v1296_v30, 4  ;;  %v1292_v38 = vrot.slane %v1291_v29, 2 }
  0xed   : > { %v1303_v39 = vsel %vm443_vm2, %v1209_v31, -inf  ;;  %v1210_v40 = vmax.f32 %v1194_v32, 0.0  ;;  %v1372_v1 = vadd.f32 %v2406_v42, %v1356_v28  ;;  %1332 = vst.msk [vmem:[#allocation2 + $0x45] sm:$0x1] %vm362_vm1, %v1274_v0  ;;  %v1357_v50 = vmul.f32 %v2398_v15, %v1341_v37  ;;  %v1346_v28 = vld [vmem:[%s1944_s19 + $0x6b] sm:$0x7] }
  0xee   : > { %v1281_v41 = vmax.f32 %v1279_v26, %v1280_v33  ;;  %v1287_v43 = vrot.slane %v1286_v34, 1  ;;  %v1298_v44 = vmax.f32 %v1296_v30, %v1297_v36  ;;  %v1304_v45 = vrot.slane %v1303_v39, 4  ;;  %v1347_v37 = vld [vmem:[%s1944_s19 + $0x7b] sm:$0x7] }
  0xef   : > { %v1293_v47 = vmax.f32 %v1291_v29, %v1292_v38  ;;  %v1310_v48 = vsel %vm443_vm2, %v1210_v40, -inf  ;;  %v1388_v49 = vmax.f32 %v1372_v1, 0.0  ;;  %v1373_v58 = vadd.f32 %v2406_v42, %v1357_v50 }
  0xf0   : > { %1333 = vst.msk [vmem:[#allocation2 + $0x4d] sm:$0x1] %vm362_vm1, %v1281_v41  ;;  %v1288_v51 = vmax.f32 %v1286_v34, %v1287_v43  ;;  %v1299_v52 = vrot.slane %v1298_v44, 2  ;;  %v1305_v53 = vmax.f32 %v1303_v39, %v1304_v45  ;;  %v1311_v54 = vrot.slane %v1310_v48, 4  ;;  %v1348_v41 = vld [vmem:[%s1944_s19 + $0x8b] sm:$0x7] }
  0xf1   : > { %v1294_v56 = vrot.slane %v1293_v47, 1  ;;  %v1404_v57 = vsel %vm443_vm2, %v1388_v49, -inf  ;;  %v1358_v59 = vmul.f32 %v2398_v15, %v1342_v46  ;;  %v1389_v4 = vmax.f32 %v1373_v58, 0.0 }
  0xf2   : > { %1334 = vst.msk [vmem:[#allocation2 + $0x55] sm:$0x1] %vm362_vm1, %v1288_v51  ;;  %v1300_v60 = vmax.f32 %v1298_v44, %v1299_v52  ;;  %v1306_v61 = vrot.slane %v1305_v53, 2  ;;  %v1312_v62 = vmax.f32 %v1310_v48, %v1311_v54  ;;  %v1405_v63 = vrot.slane %v1404_v57, 4 }
  0xf3   : > { %v1295_v3 = vmax.f32 %v1293_v47, %v1294_v56  ;;  %v1374_v5 = vadd.f32 %v2406_v42, %v1358_v59  ;;  %v1359_v6 = vmul.f32 %v2398_v15, %v1343_v55  ;;  %v1411_v11 = vsel %vm443_vm2, %v1389_v4, -inf }
  0xf4   : > { %v1301_v7 = vrot.slane %v1300_v60, 1  ;;  %v1307_v8 = vmax.f32 %v1305_v53, %v1306_v61  ;;  %v1313_v9 = vrot.slane %v1312_v62, 2  ;;  %v1406_v10 = vmax.f32 %v1404_v57, %v1405_v63  ;;  %v1349_v63 = vld [vmem:[%s1944_s19 + $0x9b] sm:$0x7] }
  0xf5   : > { %1335 = vst.msk [vmem:[#allocation2 + $0x5d] sm:$0x1] %vm362_vm1, %v1295_v3  ;;  %v1390_v12 = vmax.f32 %v1374_v5, 0.0  ;;  %v1375_v13 = vadd.f32 %v2406_v42, %v1359_v6  ;;  %v1360_v14 = vmul.f32 %v2398_v15, %v1344_v2  ;;  %v1412_v20 = vrot.slane %v1411_v11, 4 }
  0xf6   : > { %v1302_v16 = vmax.f32 %v1300_v60, %v1301_v7  ;;  %v1308_v35 = vrot.slane %v1307_v8, 1  ;;  %v1314_v17 = vmax.f32 %v1312_v62, %v1313_v9  ;;  %v1407_v18 = vrot.slane %v1406_v10, 2 }
  0xf7   : > { %v1418_v21 = vsel %vm443_vm2, %v1390_v12, -inf  ;;  %v1391_v22 = vmax.f32 %v1375_v13, 0.0  ;;  %v1376_v23 = vadd.f32 %v2406_v42, %v1360_v14  ;;  %v1413_v29 = vmax.f32 %v1411_v11, %v1412_v20 }
  0xf8   : > { %1336 = vst.msk [vmem:[#allocation2 + $0x65] sm:$0x1] %vm362_vm1, %v1302_v16  ;;  %v1309_v24 = vmax.f32 %v1307_v8, %v1308_v35  ;;  %v1315_v25 = vrot.slane %v1314_v17, 1  ;;  %v1408_v26 = vmax.f32 %v1406_v10, %v1407_v18  ;;  %v1419_v27 = vrot.slane %v1418_v21, 4  ;;  %v1350_v10 = vld [vmem:[%s1944_s19 + $0xab] sm:$0x7] }
  0xf9   : > { %v1425_v30 = vsel %vm443_vm2, %v1391_v22, -inf  ;;  %v1392_v31 = vmax.f32 %v1376_v23, 0.0  ;;  %v1361_v32 = vmul.f32 %v2398_v15, %v1345_v19  ;;  %v1414_v38 = vrot.slane %v1413_v29, 2  ;;  %v1351_v19 = vld [vmem:[%s1944_s19 + $0xbb] sm:$0x7] }
  0xfa   : > { %1337 = vst.msk [vmem:[#allocation2 + $0x6d] sm:$0x1] %vm362_vm1, %v1309_v24  ;;  %v1316_v0 = vmax.f32 %v1314_v17, %v1315_v25  ;;  %v1409_v33 = vrot.slane %v1408_v26, 1  ;;  %v1420_v34 = vmax.f32 %v1418_v21, %v1419_v27  ;;  %v1426_v36 = vrot.slane %v1425_v30, 4  ;;  %v1352_v24 = vld [vmem:[%s1944_s19 + $0xcb] sm:$0x7] }
  0xfb   : > { %v1432_v39 = vsel %vm443_vm2, %v1392_v31, -inf  ;;  %v1377_v40 = vadd.f32 %v2406_v42, %v1361_v32  ;;  %v1362_v1 = vmul.f32 %v2398_v15, %v1346_v28  ;;  %v1415_v47 = vmax.f32 %v1413_v29, %v1414_v38 }
  0xfc   : > { %1338 = vst.msk [vmem:[#allocation2 + $0x75] sm:$0x1] %vm362_vm1, %v1316_v0  ;;  %v1410_v43 = vmax.f32 %v1408_v26, %v1409_v33  ;;  %v1421_v44 = vrot.slane %v1420_v34, 2  ;;  %v1427_v45 = vmax.f32 %v1425_v30, %v1426_v36  ;;  %v1433_v46 = vrot.slane %v1432_v39, 4 }
  0xfd   : > { %v1393_v48 = vmax.f32 %v1377_v40, 0.0  ;;  %v1378_v49 = vadd.f32 %v2406_v42, %v1362_v1  ;;  %v1363_v50 = vmul.f32 %v2398_v15, %v1347_v37  ;;  %v1364_v54 = vmul.f32 %v2398_v15, %v1348_v41 }
  0xfe   : > { %1516 = vst.msk [vmem:[#allocation2 + $0x6] sm:$0x1] %vm362_vm1, %v1410_v43  ;;  %v1422_v51 = vmax.f32 %v1420_v34, %v1421_v44  ;;  %v1428_v52 = vrot.slane %v1427_v45, 2  ;;  %v1434_v53 = vmax.f32 %v1432_v39, %v1433_v46  ;;  %v1416_v55 = vrot.slane %v1415_v47, 1 }
  0xff   : > { %v1439_v56 = vsel %vm443_vm2, %v1393_v48, -inf  ;;  %v1394_v57 = vmax.f32 %v1378_v49, 0.0  ;;  %v1379_v58 = vadd.f32 %v2406_v42, %v1363_v50  ;;  %v1380_v5 = vadd.f32 %v2406_v42, %v1364_v54  ;;  %v1354_v54 = vld [vmem:[%s1944_s19 + $0xeb] sm:$0x7] }
 0x100   : > { %v1423_v59 = vrot.slane %v1422_v51, 1  ;;  %v1429_v60 = vmax.f32 %v1427_v45, %v1428_v52  ;;  %v1435_v61 = vrot.slane %v1434_v53, 2  ;;  %v1440_v62 = vrot.slane %v1439_v56, 4  ;;  %v1353_v45 = vld [vmem:[%s1944_s19 + $0xdb] sm:$0x7] }
 0x101   : > { %v1417_v2 = vmax.f32 %v1415_v47, %v1416_v55  ;;  %v1446_v3 = vsel %vm443_vm2, %v1394_v57, -inf  ;;  %v1395_v4 = vmax.f32 %v1379_v58, 0.0  ;;  %v1396_v13 = vmax.f32 %v1380_v5, 0.0 }
 0x102   : > { %v1424_v6 = vmax.f32 %v1422_v51, %v1423_v59  ;;  %v1430_v7 = vrot.slane %v1429_v60, 1  ;;  %v1436_v8 = vmax.f32 %v1434_v53, %v1435_v61  ;;  %v1441_v9 = vmax.f32 %v1439_v56, %v1440_v62 }
 0x103   : > { %1517 = vst.msk [vmem:[#allocation2 + $0xe] sm:$0x1] %vm362_vm1, %v1417_v2  ;;  %v1447_v11 = vrot.slane %v1446_v3, 4  ;;  %v1453_v12 = vsel %vm443_vm2, %v1395_v4, -inf  ;;  %v1365_v14 = vmul.f32 %v2398_v15, %v1349_v63  ;;  %v1460_v21 = vsel %vm443_vm2, %v1396_v13, -inf }
 0x104   : > { %1518 = vst.msk [vmem:[#allocation2 + $0x16] sm:$0x1] %vm362_vm1, %v1424_v6  ;;  %v1431_v16 = vmax.f32 %v1429_v60, %v1430_v7  ;;  %v1437_v35 = vrot.slane %v1436_v8, 1  ;;  %v1442_v17 = vrot.slane %v1441_v9, 2  ;;  %v1454_v18 = vrot.slane %v1453_v12, 4 }
 0x105   : > { %v1448_v20 = vmax.f32 %v1446_v3, %v1447_v11  ;;  %v1381_v22 = vadd.f32 %v2406_v42, %v1365_v14  ;;  %v1366_v23 = vmul.f32 %v2398_v15, %v1350_v10  ;;  %v1461_v28 = vrot.slane %v1460_v21, 4  ;;  %v1532_v63 = vld [vmem:[%s1944_s19 + $0xd] sm:$0x7]  ;;  %v1533_v6 = vld [vmem:[%s1944_s19 + $0x1d] sm:$0x7] }
 0x106   : > { %1519 = vst.msk [vmem:[#allocation2 + $0x1e] sm:$0x1] %vm362_vm1, %v1431_v16  ;;  %v1438_v25 = vmax.f32 %v1436_v8, %v1437_v35  ;;  %v1443_v26 = vmax.f32 %v1441_v9, %v1442_v17  ;;  %v1455_v27 = vmax.f32 %v1453_v12, %v1454_v18  ;;  %v1367_v32 = vmul.f32 %v2398_v15, %v1351_v19 }
 0x107   : > { %v1449_v29 = vrot.slane %v1448_v20, 2  ;;  %v1397_v30 = vmax.f32 %v1381_v22, 0.0  ;;  %v1382_v31 = vadd.f32 %v2406_v42, %v1366_v23  ;;  %v1462_v34 = vmax.f32 %v1460_v21, %v1461_v28 }
 0x108   : > { %1520 = vst.msk [vmem:[#allocation2 + $0x26] sm:$0x1] %vm362_vm1, %v1438_v25  ;;  %v1444_v0 = vrot.slane %v1443_v26, 1  ;;  %v1456_v33 = vrot.slane %v1455_v27, 2  ;;  %v1368_v36 = vmul.f32 %v2398_v15, %v1352_v24  ;;  %v1383_v40 = vadd.f32 %v2406_v42, %v1367_v32 }
 0x109   : > { %v1450_v37 = vmax.f32 %v1448_v20, %v1449_v29  ;;  %v1467_v38 = vsel %vm443_vm2, %v1397_v30, -inf  ;;  %v1398_v39 = vmax.f32 %v1382_v31, 0.0  ;;  %v1463_v43 = vrot.slane %v1462_v34, 2 }
 0x10a   : > { %v1445_v1 = vmax.f32 %v1443_v26, %v1444_v0  ;;  %v1457_v41 = vmax.f32 %v1455_v27, %v1456_v33  ;;  %v1468_v44 = vrot.slane %v1467_v38, 4  ;;  %v1399_v48 = vmax.f32 %v1383_v40, 0.0  ;;  %v1534_v27 = vld [vmem:[%s1944_s19 + $0x2d] sm:$0x7] }
 0x10b   : > { %v1451_v46 = vrot.slane %v1450_v37, 1  ;;  %v1474_v47 = vsel %vm443_vm2, %v1398_v39, -inf  ;;  %v1384_v49 = vadd.f32 %v2406_v42, %v1368_v36  ;;  %v1464_v51 = vmax.f32 %v1462_v34, %v1463_v43  ;;  %v1535_v36 = vld [vmem:[%s1944_s19 + $0x3d] sm:$0x7] }
 0x10c   : > { %1521 = vst.msk [vmem:[#allocation2 + $0x2e] sm:$0x1] %vm362_vm1, %v1445_v1  ;;  %v1458_v50 = vrot.slane %v1457_v41, 1  ;;  %v1469_v52 = vmax.f32 %v1467_v38, %v1468_v44  ;;  %v1475_v53 = vrot.slane %v1474_v47, 4  ;;  %v1481_v56 = vsel %vm443_vm2, %v1399_v48, -inf }
 0x10d   : > { %v1452_v55 = vmax.f32 %v1450_v37, %v1451_v46  ;;  %v1400_v57 = vmax.f32 %v1384_v49, 0.0  ;;  %v1369_v58 = vmul.f32 %v2398_v15, %v1353_v45  ;;  %v1465_v60 = vrot.slane %v1464_v51, 1  ;;  %v1536_v45 = vld [vmem:[%s1944_s19 + $0x4d] sm:$0x7] }
 0x10e   : > { %v1459_v59 = vmax.f32 %v1457_v41, %v1458_v50  ;;  %v1470_v61 = vrot.slane %v1469_v52, 2  ;;  %v1476_v62 = vmax.f32 %v1474_v47, %v1475_v53  ;;  %v1482_v2 = vrot.slane %v1481_v56, 4  ;;  %v1537_v50 = vld [vmem:[%s1944_s19 + $0x5d] sm:$0x7] }
 0x10f   : > { %1522 = vst.msk [vmem:[#allocation2 + $0x36] sm:$0x1] %vm362_vm1, %v1452_v55  ;;  %v1488_v3 = vsel %vm443_vm2, %v1400_v57, -inf  ;;  %v1385_v4 = vadd.f32 %v2406_v42, %v1369_v58  ;;  %v1370_v5 = vmul.f32 %v2398_v15, %v1354_v54  ;;  %v1466_v7 = vmax.f32 %v1464_v51, %v1465_v60 }
 0x110   : > { %1523 = vst.msk [vmem:[#allocation2 + $0x3e] sm:$0x1] %vm362_vm1, %v1459_v59  ;;  %v1471_v8 = vmax.f32 %v1469_v52, %v1470_v61  ;;  %v1477_v9 = vrot.slane %v1476_v62, 2  ;;  %v1489_v10 = vrot.slane %v1488_v3, 4  ;;  %v1483_v11 = vmax.f32 %v1481_v56, %v1482_v2 }
 0x111   : > { %v1401_v12 = vmax.f32 %v1385_v4, 0.0  ;;  %v1386_v13 = vadd.f32 %v2406_v42, %v1370_v5  ;;  %v1548_v14 = vmul.f32 %v2398_v15, %v1532_v63  ;;  %1524 = vst.msk [vmem:[#allocation2 + $0x46] sm:$0x1] %vm362_vm1, %v1466_v7  ;;  %v1549_v18 = vmul.f32 %v2398_v15, %v1533_v6 }
 0x112   : > { %v1472_v16 = vrot.slane %v1471_v8, 1  ;;  %v1478_v35 = vmax.f32 %v1476_v62, %v1477_v9  ;;  %v1490_v17 = vmax.f32 %v1488_v3, %v1489_v10  ;;  %v1484_v19 = vrot.slane %v1483_v11, 2  ;;  %v1538_v9 = vld [vmem:[%s1944_s19 + $0x6d] sm:$0x7] }
 0x113   : > { %v1495_v20 = vsel %vm443_vm2, %v1401_v12, -inf  ;;  %v1402_v21 = vmax.f32 %v1386_v13, 0.0  ;;  %v1564_v22 = vadd.f32 %v2406_v42, %v1548_v14  ;;  %v1565_v31 = vadd.f32 %v2406_v42, %v1549_v18  ;;  %v1539_v18 = vld [vmem:[%s1944_s19 + $0x7d] sm:$0x7] }
 0x114   : > { %v1473_v23 = vmax.f32 %v1471_v8, %v1472_v16  ;;  %v1479_v24 = vrot.slane %v1478_v35, 1  ;;  %v1491_v25 = vrot.slane %v1490_v17, 2  ;;  %v1496_v26 = vrot.slane %v1495_v20, 4 }
 0x115   : > { %v1485_v28 = vmax.f32 %v1483_v11, %v1484_v19  ;;  %v1502_v29 = vsel %vm443_vm2, %v1402_v21, -inf  ;;  %v1580_v30 = vmax.f32 %v1564_v22, 0.0  ;;  %v1581_v39 = vmax.f32 %v1565_v31, 0.0 }
 0x116   : > { %1525 = vst.msk [vmem:[#allocation2 + $0x4e] sm:$0x1] %vm362_vm1, %v1473_v23  ;;  %v1480_v32 = vmax.f32 %v1478_v35, %v1479_v24  ;;  %v1492_v0 = vmax.f32 %v1490_v17, %v1491_v25  ;;  %v1497_v33 = vmax.f32 %v1495_v20, %v1496_v26  ;;  %v1503_v34 = vrot.slane %v1502_v29, 4 }
 0x117   : > { %v1486_v37 = vrot.slane %v1485_v28, 1  ;;  %v1596_v38 = vsel %vm443_vm2, %v1580_v30, -inf  ;;  %v1550_v40 = vmul.f32 %v2398_v15, %v1534_v27  ;;  %v1603_v47 = vsel %vm443_vm2, %v1581_v39, -inf  ;;  %v1540_v27 = vld [vmem:[%s1944_s19 + $0x8d] sm:$0x7] }
 0x118   : > { %1526 = vst.msk [vmem:[#allocation2 + $0x56] sm:$0x1] %vm362_vm1, %v1480_v32  ;;  %v1493_v1 = vrot.slane %v1492_v0, 1  ;;  %v1498_v41 = vrot.slane %v1497_v33, 2  ;;  %v1504_v43 = vmax.f32 %v1502_v29, %v1503_v34  ;;  %v1597_v44 = vrot.slane %v1596_v38, 4 }
 0x119   : > { %v1487_v46 = vmax.f32 %v1485_v28, %v1486_v37  ;;  %v1566_v48 = vadd.f32 %v2406_v42, %v1550_v40  ;;  %v1551_v49 = vmul.f32 %v2398_v15, %v1535_v36  ;;  %v1604_v55 = vrot.slane %v1603_v47, 4  ;;  %v1541_v36 = vld [vmem:[%s1944_s19 + $0x9d] sm:$0x7] }
 0x11a   : > { %v1494_v51 = vmax.f32 %v1492_v0, %v1493_v1  ;;  %v1499_v52 = vmax.f32 %v1497_v33, %v1498_v41  ;;  %v1505_v53 = vrot.slane %v1504_v43, 2  ;;  %v1598_v54 = vmax.f32 %v1596_v38, %v1597_v44 }
 0x11b   : > { %1527 = vst.msk [vmem:[#allocation2 + $0x5e] sm:$0x1] %vm362_vm1, %v1487_v46  ;;  %v1582_v56 = vmax.f32 %v1566_v48, 0.0  ;;  %v1567_v57 = vadd.f32 %v2406_v42, %v1551_v49  ;;  %v1552_v58 = vmul.f32 %v2398_v15, %v1536_v45  ;;  %v1553_v62 = vmul.f32 %v2398_v15, %v1537_v50 }
 0x11c   : > { %1528 = vst.msk [vmem:[#allocation2 + $0x66] sm:$0x1] %vm362_vm1, %v1494_v51  ;;  %v1500_v59 = vrot.slane %v1499_v52, 1  ;;  %v1506_v60 = vmax.f32 %v1504_v43, %v1505_v53  ;;  %v1599_v61 = vrot.slane %v1598_v54, 2  ;;  %v1605_v63 = vmax.f32 %v1603_v47, %v1604_v55  ;;  %v1542_v53 = vld [vmem:[%s1944_s19 + $0xad] sm:$0x7] }
 0x11d   : > { %v1610_v2 = vsel %vm443_vm2, %v1582_v56, -inf  ;;  %v1583_v3 = vmax.f32 %v1567_v57, 0.0  ;;  %v1568_v4 = vadd.f32 %v2406_v42, %v1552_v58  ;;  %v1569_v13 = vadd.f32 %v2406_v42, %v1553_v62  ;;  %v1543_v62 = vld [vmem:[%s1944_s19 + $0xbd] sm:$0x7] }
 0x11e   : > { %v1501_v5 = vmax.f32 %v1499_v52, %v1500_v59  ;;  %v1507_v6 = vrot.slane %v1506_v60, 1  ;;  %v1600_v7 = vmax.f32 %v1598_v54, %v1599_v61  ;;  %v1611_v8 = vrot.slane %v1610_v2, 4 }
 0x11f   : > { %v1606_v10 = vrot.slane %v1605_v63, 2  ;;  %v1617_v11 = vsel %vm443_vm2, %v1583_v3, -inf  ;;  %v1584_v12 = vmax.f32 %v1568_v4, 0.0  ;;  %v1585_v21 = vmax.f32 %v1569_v13, 0.0 }
 0x120   : > { %1529 = vst.msk [vmem:[#allocation2 + $0x6e] sm:$0x1] %vm362_vm1, %v1501_v5  ;;  %v1508_v14 = vmax.f32 %v1506_v60, %v1507_v6  ;;  %v1601_v16 = vrot.slane %v1600_v7, 1  ;;  %v1612_v35 = vmax.f32 %v1610_v2, %v1611_v8  ;;  %v1618_v17 = vrot.slane %v1617_v11, 4 }
 0x121   : > { %v1607_v19 = vmax.f32 %v1605_v63, %v1606_v10  ;;  %v1624_v20 = vsel %vm443_vm2, %v1584_v12, -inf  ;;  %v1554_v22 = vmul.f32 %v2398_v15, %v1538_v9  ;;  %v1631_v29 = vsel %vm443_vm2, %v1585_v21, -inf  ;;  %v1544_v9 = vld [vmem:[%s1944_s19 + $0xcd] sm:$0x7] }
 0x122   : > { %1530 = vst.msk [vmem:[#allocation2 + $0x76] sm:$0x1] %vm362_vm1, %v1508_v14  ;;  %v1602_v23 = vmax.f32 %v1600_v7, %v1601_v16  ;;  %v1613_v24 = vrot.slane %v1612_v35, 2  ;;  %v1619_v25 = vmax.f32 %v1617_v11, %v1618_v17  ;;  %v1625_v26 = vrot.slane %v1624_v20, 4  ;;  %v1545_v14 = vld [vmem:[%s1944_s19 + $0xdd] sm:$0x7] }
 0x123   : > { %v1608_v28 = vrot.slane %v1607_v19, 1  ;;  %v1570_v30 = vadd.f32 %v2406_v42, %v1554_v22  ;;  %v1555_v31 = vmul.f32 %v2398_v15, %v1539_v18  ;;  %v1632_v34 = vrot.slane %v1631_v29, 4 }
 0x124   : > { %1708 = vst.msk [vmem:[#allocation2 + $0x7] sm:$0x1] %vm362_vm1, %v1602_v23  ;;  %v1614_v32 = vmax.f32 %v1612_v35, %v1613_v24  ;;  %v1620_v0 = vrot.slane %v1619_v25, 2  ;;  %v1626_v33 = vmax.f32 %v1624_v20, %v1625_v26  ;;  %v1556_v40 = vmul.f32 %v2398_v15, %v1540_v27 }
 0x125   : > { %v1609_v37 = vmax.f32 %v1607_v19, %v1608_v28  ;;  %v1586_v38 = vmax.f32 %v1570_v30, 0.0  ;;  %v1571_v39 = vadd.f32 %v2406_v42, %v1555_v31  ;;  %v1633_v44 = vmax.f32 %v1631_v29, %v1632_v34  ;;  %v1546_v34 = vld [vmem:[%s1944_s19 + $0xed] sm:$0x7] }
 0x126   : > { %v1615_v1 = vrot.slane %v1614_v32, 1  ;;  %v1621_v41 = vmax.f32 %v1619_v25, %v1620_v0  ;;  %v1627_v43 = vrot.slane %v1626_v33, 2  ;;  %v1572_v47 = vadd.f32 %v2406_v42, %v1556_v40 }
 0x127   : > { %1709 = vst.msk [vmem:[#allocation2 + $0xf] sm:$0x1] %vm362_vm1, %v1609_v37  ;;  %v1638_v45 = vsel %vm443_vm2, %v1586_v38, -inf  ;;  %v1587_v46 = vmax.f32 %v1571_v39, 0.0  ;;  %v1557_v48 = vmul.f32 %v2398_v15, %v1541_v36  ;;  %v1634_v52 = vrot.slane %v1633_v44, 2 }
 0x128   : > { %v1616_v49 = vmax.f32 %v1614_v32, %v1615_v1  ;;  %v1622_v50 = vrot.slane %v1621_v41, 1  ;;  %v1628_v51 = vmax.f32 %v1626_v33, %v1627_v43  ;;  %v1639_v54 = vrot.slane %v1638_v45, 4 }
 0x129   : > { %v1645_v55 = vsel %vm443_vm2, %v1587_v46, -inf  ;;  %v1588_v56 = vmax.f32 %v1572_v47, 0.0  ;;  %v1573_v57 = vadd.f32 %v2406_v42, %v1557_v48  ;;  %v1635_v60 = vmax.f32 %v1633_v44, %v1634_v52  ;;  %v188_v44 = vld [vmem:[%s1944_s19 + $0xf0] sm:$0x3] }
 0x12a   : > { %1710 = vst.msk [vmem:[#allocation2 + $0x17] sm:$0x1] %vm362_vm1, %v1616_v49  ;;  %v1623_v58 = vmax.f32 %v1621_v41, %v1622_v50  ;;  %v1629_v59 = vrot.slane %v1628_v51, 1  ;;  %v1646_v61 = vrot.slane %v1645_v55, 4  ;;  %v1640_v63 = vmax.f32 %v1638_v45, %v1639_v54 }
 0x12b   : > { %v1652_v2 = vsel %vm443_vm2, %v1588_v56, -inf  ;;  %v1589_v3 = vmax.f32 %v1573_v57, 0.0  ;;  %v1558_v4 = vmul.f32 %v2398_v15, %v1542_v53  ;;  %v1636_v6 = vrot.slane %v1635_v60, 1  ;;  %v394_v53 = vld [vmem:[%s1944_s19 + $0xf1] sm:$0x7] }
 0x12c   : > { %1711 = vst.msk [vmem:[#allocation2 + $0x1f] sm:$0x1] %vm362_vm1, %v1623_v58  ;;  %v1630_v5 = vmax.f32 %v1628_v51, %v1629_v59  ;;  %v1647_v7 = vmax.f32 %v1645_v55, %v1646_v61  ;;  %v1653_v8 = vrot.slane %v1652_v2, 4  ;;  %v1641_v10 = vrot.slane %v1640_v63, 2  ;;  %v587_v58 = vld [vmem:[%s1944_s19 + $0xf3] sm:$0x7] }
 0x12d   : > { %v1659_v11 = vsel %vm443_vm2, %v1589_v3, -inf  ;;  %v1574_v12 = vadd.f32 %v2406_v42, %v1558_v4  ;;  %v1559_v13 = vmul.f32 %v2398_v15, %v1543_v62  ;;  %v1637_v16 = vmax.f32 %v1635_v60, %v1636_v6 }
 0x12e   : > { %1712 = vst.msk [vmem:[#allocation2 + $0x27] sm:$0x1] %vm362_vm1, %v1630_v5  ;;  %v1648_v35 = vrot.slane %v1647_v7, 2  ;;  %v1654_v17 = vmax.f32 %v1652_v2, %v1653_v8  ;;  %v1660_v18 = vrot.slane %v1659_v11, 4  ;;  %v1642_v19 = vmax.f32 %v1640_v63, %v1641_v10 }
 0x12f   : > { %v1590_v20 = vmax.f32 %v1574_v12, 0.0  ;;  %v1575_v21 = vadd.f32 %v2406_v42, %v1559_v13  ;;  %v1560_v22 = vmul.f32 %v2398_v15, %v1544_v9  ;;  %1713 = vst.msk [vmem:[#allocation2 + $0x2f] sm:$0x1] %vm362_vm1, %v1637_v16  ;;  %v1561_v26 = vmul.f32 %v2398_v15, %v1545_v14 }
 0x130   : > { %v1649_v23 = vmax.f32 %v1647_v7, %v1648_v35  ;;  %v1655_v24 = vrot.slane %v1654_v17, 2  ;;  %v1661_v25 = vmax.f32 %v1659_v11, %v1660_v18  ;;  %v1643_v27 = vrot.slane %v1642_v19, 1 }
 0x131   : > { %v1666_v28 = vsel %vm443_vm2, %v1590_v20, -inf  ;;  %v1591_v29 = vmax.f32 %v1575_v21, 0.0  ;;  %v1576_v30 = vadd.f32 %v2406_v42, %v1560_v22  ;;  %v1577_v39 = vadd.f32 %v2406_v42, %v1561_v26  ;;  %v971_v26 = vld [vmem:[%s1944_s19 + $0xf7] sm:$0x7] }
 0x132   : > { %v1650_v31 = vrot.slane %v1649_v23, 1  ;;  %v1656_v32 = vmax.f32 %v1654_v17, %v1655_v24  ;;  %v1662_v0 = vrot.slane %v1661_v25, 2  ;;  %v1667_v33 = vrot.slane %v1666_v28, 4  ;;  %v779_v17 = vld [vmem:[%s1944_s19 + $0xf5] sm:$0x7] }
 0x133   : > { %v1644_v36 = vmax.f32 %v1642_v19, %v1643_v27  ;;  %v1673_v37 = vsel %vm443_vm2, %v1591_v29, -inf  ;;  %v1592_v38 = vmax.f32 %v1576_v30, 0.0  ;;  %v1593_v47 = vmax.f32 %v1577_v39, 0.0 }
 0x134   : > { %v1651_v40 = vmax.f32 %v1649_v23, %v1650_v31  ;;  %v1657_v1 = vrot.slane %v1656_v32, 1  ;;  %v1663_v41 = vmax.f32 %v1661_v25, %v1662_v0  ;;  %v1668_v43 = vmax.f32 %v1666_v28, %v1667_v33 }
 0x135   : > { %1714 = vst.msk [vmem:[#allocation2 + $0x37] sm:$0x1] %vm362_vm1, %v1644_v36  ;;  %v1674_v45 = vrot.slane %v1673_v37, 4  ;;  %v1680_v46 = vsel %vm443_vm2, %v1592_v38, -inf  ;;  %v1562_v48 = vmul.f32 %v2398_v15, %v1546_v34  ;;  %v1687_v55 = vsel %vm443_vm2, %v1593_v47, -inf }
 0x136   : > { %1715 = vst.msk [vmem:[#allocation2 + $0x3f] sm:$0x1] %vm362_vm1, %v1651_v40  ;;  %v1658_v49 = vmax.f32 %v1656_v32, %v1657_v1  ;;  %v1664_v50 = vrot.slane %v1663_v41, 1  ;;  %v1669_v51 = vrot.slane %v1668_v43, 2  ;;  %v1681_v52 = vrot.slane %v1680_v46, 4 }
 0x137   : > { %v1675_v54 = vmax.f32 %v1673_v37, %v1674_v45  ;;  %v1578_v56 = vadd.f32 %v2406_v42, %v1562_v48  ;;  %v210_v57 = vmul.f32 %v2398_v15, %v188_v44  ;;  %v1688_v62 = vrot.slane %v1687_v55, 4  ;;  %v1163_v34 = vld [vmem:[%s1944_s19 + $0xf9] sm:$0x7] }
 0x138   : > { %1716 = vst.msk [vmem:[#allocation2 + $0x47] sm:$0x1] %vm362_vm1, %v1658_v49  ;;  %v1665_v59 = vmax.f32 %v1663_v41, %v1664_v50  ;;  %v1670_v60 = vmax.f32 %v1668_v43, %v1669_v51  ;;  %v1682_v61 = vmax.f32 %v1680_v46, %v1681_v52  ;;  %v410_v4 = vmul.f32 %v2398_v15, %v394_v53  ;;  %v1355_v40 = vld [vmem:[%s1944_s19 + $0xfb] sm:$0x7] }
 0x139   : > { %v1676_v63 = vrot.slane %v1675_v54, 2  ;;  %v1594_v2 = vmax.f32 %v1578_v56, 0.0  ;;  %v232_v3 = vadd.f32 %v2406_v42, %v210_v57  ;;  %v1689_v7 = vmax.f32 %v1687_v55, %v1688_v62 }
 0x13a   : > { %1717 = vst.msk [vmem:[#allocation2 + $0x4f] sm:$0x1] %vm362_vm1, %v1665_v59  ;;  %v1671_v5 = vrot.slane %v1670_v60, 1  ;;  %v1683_v6 = vrot.slane %v1682_v61, 2  ;;  %v603_v8 = vmul.f32 %v2398_v15, %v587_v58  ;;  %v426_v12 = vadd.f32 %v2406_v42, %v410_v4 }
 0x13b   : > { %v1677_v9 = vmax.f32 %v1675_v54, %v1676_v63  ;;  %v1694_v10 = vsel %vm443_vm2, %v1594_v2, -inf  ;;  %v248_v11 = vmax.f32 %v232_v3, 0.0  ;;  %v1690_v16 = vrot.slane %v1689_v7, 2 }
 0x13c   : > { %v1672_v13 = vmax.f32 %v1670_v60, %v1671_v5  ;;  %v1684_v14 = vmax.f32 %v1682_v61, %v1683_v6  ;;  %v1695_v35 = vrot.slane %v1694_v10, 4  ;;  %v442_v20 = vmax.f32 %v426_v12, 0.0  ;;  %v1547_v61 = vld [vmem:[%s1944_s19 + $0xfd] sm:$0x7] }
 0x13d   : > { %v1678_v18 = vrot.slane %v1677_v9, 1  ;;  %v355_v19 = vsel %vm249_vm0, %v248_v11, -inf  ;;  %v619_v21 = vadd.f32 %v2406_v42, %v603_v8  ;;  %v1691_v23 = vmax.f32 %v1689_v7, %v1690_v16 }
 0x13e   : > { %1718 = vst.msk [vmem:[#allocation2 + $0x57] sm:$0x1] %vm362_vm1, %v1672_v13  ;;  %v1685_v22 = vrot.slane %v1684_v14, 1  ;;  %v1696_v24 = vmax.f32 %v1694_v10, %v1695_v35  ;;  %v356_v25 = vrot.slane %v355_v19, 4  ;;  %v549_v28 = vsel %vm443_vm2, %v442_v20, -inf  ;;  %v1724_v35 = vld [vmem:[#allocation2] sm:$0xff] }
 0x13f   : > { %v1679_v27 = vmax.f32 %v1677_v9, %v1678_v18  ;;  %v635_v29 = vmax.f32 %v619_v21, 0.0  ;;  %v795_v30 = vmul.f32 %v2398_v15, %v779_v17  ;;  %v1692_v32 = vrot.slane %v1691_v23, 1  ;;  %v1725_v17 = vld [vmem:[#allocation2 + $0x8] sm:$0xff] }
 0x140   : > { %v1686_v31 = vmax.f32 %v1684_v14, %v1685_v22  ;;  %v1697_v0 = vrot.slane %v1696_v24, 2  ;;  %v357_v33 = vmax.f32 %v355_v19, %v356_v25  ;;  %v550_v36 = vrot.slane %v549_v28, 4  ;;  %v1734_v25 = vld [vmem:[#allocation2 + $0x18] sm:$0xff] }
 0x141   : > { %1719 = vst.msk [vmem:[#allocation2 + $0x5f] sm:$0x1] %vm362_vm1, %v1679_v27  ;;  %v741_v37 = vsel %vm443_vm2, %v635_v29, -inf  ;;  %v811_v38 = vadd.f32 %v2406_v42, %v795_v30  ;;  %v987_v39 = vmul.f32 %v2398_v15, %v971_v26  ;;  %v1693_v1 = vmax.f32 %v1691_v23, %v1692_v32 }
 0x142   : > { %1720 = vst.msk [vmem:[#allocation2 + $0x67] sm:$0x1] %vm362_vm1, %v1686_v31  ;;  %v1698_v41 = vmax.f32 %v1696_v24, %v1697_v0  ;;  %v358_v43 = vrot.slane %v357_v33, 2  ;;  %v742_v44 = vrot.slane %v741_v37, 4  ;;  %v551_v45 = vmax.f32 %v549_v28, %v550_v36  ;;  %v1744_v0 = vld [vmem:[#allocation2 + $0x20] sm:$0xff] }
 0x143   : > { %v827_v46 = vmax.f32 %v811_v38, 0.0  ;;  %v1003_v47 = vadd.f32 %v2406_v42, %v987_v39  ;;  %v1179_v48 = vmul.f32 %v2398_v15, %v1163_v34  ;;  %1721 = vst.msk [vmem:[#allocation2 + $0x6f] sm:$0x1] %vm362_vm1, %v1693_v1  ;;  %v1371_v52 = vmul.f32 %v2398_v15, %v1355_v40 }
 0x144   : > { %v1699_v49 = vrot.slane %v1698_v41, 1  ;;  %v359_v50 = vmax.f32 %v357_v33, %v358_v43  ;;  %v743_v51 = vmax.f32 %v741_v37, %v742_v44  ;;  %v552_v53 = vrot.slane %v551_v45, 2  ;;  %v1745_v33 = vld [vmem:[#allocation2 + $0x28] sm:$0xff]  ;;  %v1755_v43 = vld [vmem:[#allocation2 + $0x30] sm:$0xff]  ;;  %v1756_v44 = vld [vmem:[#allocation2 + $0x38] sm:$0xff] }
 0x145   : > { %v933_v54 = vsel %vm443_vm2, %v827_v46, -inf  ;;  %v1019_v55 = vmax.f32 %v1003_v47, 0.0  ;;  %v1195_v56 = vadd.f32 %v2406_v42, %v1179_v48  ;;  %v1387_v3 = vadd.f32 %v2406_v42, %v1371_v52 }
 0x146   : > { %v1700_v57 = vmax.f32 %v1698_v41, %v1699_v49  ;;  %v360_v58 = vrot.slane %v359_v50, 1  ;;  %v744_v59 = vrot.slane %v743_v51, 2  ;;  %v934_v60 = vrot.slane %v933_v54, 4 }
 0x147   : > { %v553_v62 = vmax.f32 %v551_v45, %v552_v53  ;;  %v1125_v63 = vsel %vm443_vm2, %v1019_v55, -inf  ;;  %v1211_v2 = vmax.f32 %v1195_v56, 0.0  ;;  %v1403_v10 = vmax.f32 %v1387_v3, 0.0  ;;  %v1766_v53 = vld [vmem:[#allocation2 + $0x40] sm:$0xff]  ;;  %v1777_v55 = vld [vmem:[#allocation2 + $0x50] sm:$0xff] }
 0x148   : > { %1722 = vst.msk [vmem:[#allocation2 + $0x77] sm:$0x1] %vm362_vm1, %v1700_v57  ;;  %v361_v4 = vmax.f32 %v359_v50, %v360_v58  ;;  %v745_v5 = vmax.f32 %v743_v51, %v744_v59  ;;  %v935_v6 = vmax.f32 %v933_v54, %v934_v60  ;;  %v1126_v7 = vrot.slane %v1125_v63, 4  ;;  %v1767_v54 = vld [vmem:[#allocation2 + $0x48] sm:$0xff]  ;;  %v1778_v60 = vld [vmem:[#allocation2 + $0x58] sm:$0xff] }
 0x149   : > { %v554_v8 = vrot.slane %v553_v62, 1  ;;  %v1317_v9 = vsel %vm443_vm2, %v1211_v2, -inf  ;;  %v1563_v11 = vmul.f32 %v2398_v15, %v1547_v61  ;;  %v1509_v19 = vsel %vm443_vm2, %v1403_v10, -inf  ;;  %v1733_v15 = vld [vmem:[#allocation2 + $0x10] sm:$0xff]  ;;  %v1788_v3 = vld [vmem:[#allocation2 + $0x60] sm:$0xff] }
 0x14a   : > { %378 = vst.msk [vmem:[#allocation2 + $0x78] sm:$0x1] %vm362_vm1, %v361_v4  ;;  %v746_v12 = vrot.slane %v745_v5, 1  ;;  %v936_v13 = vrot.slane %v935_v6, 2  ;;  %v1127_v14 = vmax.f32 %v1125_v63, %v1126_v7  ;;  %v1318_v16 = vrot.slane %v1317_v9, 4 }
 0x14b   : > { %v555_v18 = vmax.f32 %v553_v62, %v554_v8  ;;  %v1579_v20 = vadd.f32 %v2406_v42, %v1563_v11  ;;  %v1510_v26 = vrot.slane %v1509_v19, 4  ;;  %v1727_v28 = vsel %vm1726_vm3, %v1724_v35, -inf }
 0x14c   : > { %v747_v21 = vmax.f32 %v745_v5, %v746_v12  ;;  %v937_v22 = vmax.f32 %v935_v6, %v936_v13  ;;  %v1128_v23 = vrot.slane %v1127_v14, 2  ;;  %v1319_v24 = vmax.f32 %v1317_v9, %v1318_v16  ;;  %v1789_v12 = vld [vmem:[#allocation2 + $0x68] sm:$0xff] }
 0x14d   : > { %571 = vst.msk [vmem:[#allocation2 + $0x79] sm:$0x1] %vm362_vm1, %v555_v18  ;;  %v1595_v27 = vmax.f32 %v1579_v20, 0.0  ;;  %v1728_v42 = vsel %vm1726_vm3, %v1725_v17, -inf  ;;  %v1511_v34 = vmax.f32 %v1509_v19, %v1510_v26  ;;  %v1736_v37 = vsel %vm1726_vm3, %v1733_v15, -inf }
 0x14e   : > { %763 = vst.msk [vmem:[#allocation2 + $0x7a] sm:$0x1] %vm362_vm1, %v747_v21  ;;  %v938_v29 = vrot.slane %v937_v22, 1  ;;  %v1129_v30 = vmax.f32 %v1127_v14, %v1128_v23  ;;  %v1320_v31 = vrot.slane %v1319_v24, 2  ;;  %v1729_v32 = vmax.f32 %v1727_v28, %v1728_v42 }
 0x14f   : > { %v1701_v36 = vsel %vm443_vm2, %v1595_v27, -inf  ;;  %v1737_v38 = vsel %vm1726_vm3, %v1734_v25, -inf  ;;  %v1512_v45 = vrot.slane %v1511_v34, 2  ;;  %v1738_v46 = vmax.f32 %v1728_v42, %v1736_v37  ;;  %v1799_v23 = vld [vmem:[#allocation2 + $0x70] sm:$0xff] }
 0x150   : > { %v939_v39 = vmax.f32 %v937_v22, %v938_v29  ;;  %v1130_v40 = vrot.slane %v1129_v30, 1  ;;  %v1321_v1 = vmax.f32 %v1319_v24, %v1320_v31  ;;  %v1702_v41 = vrot.slane %v1701_v36, 4  ;;  %1730 = vst.msk [vmem:[%s2608_s6] sm:$0xff] %vm1726_vm3, %v1729_v32 }
 0x151   : > { %v1747_v47 = vsel %vm1726_vm3, %v1744_v0, -inf  ;;  %v1748_v48 = vsel %vm1726_vm3, %v1745_v33, -inf  ;;  %v1513_v56 = vmax.f32 %v1511_v34, %v1512_v45  ;;  %v1739_v57 = vmax.f32 %v1738_v46, %v1737_v38 }
 0x152   : > { %955 = vst.msk [vmem:[#allocation2 + $0x7b] sm:$0x1] %vm362_vm1, %v939_v39  ;;  %v1131_v49 = vmax.f32 %v1129_v30, %v1130_v40  ;;  %v1322_v50 = vrot.slane %v1321_v1, 1  ;;  %v1703_v51 = vmax.f32 %v1701_v36, %v1702_v41  ;;  %v1749_v52 = vmax.f32 %v1737_v38, %v1747_v47 }
 0x153   : > { %v1758_v58 = vsel %vm1726_vm3, %v1755_v43, -inf  ;;  %v1759_v59 = vsel %vm1726_vm3, %v1756_v44, -inf  ;;  %v1514_v4 = vrot.slane %v1513_v56, 1  ;;  %1874 = vst.msk [vmem:[%s2608_s6 + $0x8] sm:$0xff] %vm1726_vm3, %v1739_v57  ;;  %v1769_v5 = vsel %vm1726_vm3, %v1766_v53, -inf }
 0x154   : > { %1147 = vst.msk [vmem:[#allocation2 + $0x7c] sm:$0x1] %vm362_vm1, %v1131_v49  ;;  %v1323_v61 = vmax.f32 %v1321_v1, %v1322_v50  ;;  %v1704_v62 = vrot.slane %v1703_v51, 2  ;;  %v1750_v63 = vmax.f32 %v1749_v52, %v1748_v48  ;;  %v1760_v2 = vmax.f32 %v1748_v48, %v1758_v58 }
 0x155   : > { %v1770_v6 = vsel %vm1726_vm3, %v1767_v54, -inf  ;;  %v1780_v7 = vsel %vm1726_vm3, %v1777_v55, -inf  ;;  %v1771_v10 = vmax.f32 %v1759_v59, %v1769_v5  ;;  %v1781_v11 = vsel %vm1726_vm3, %v1778_v60, -inf }
 0x156   : > { %1339 = vst.msk [vmem:[#allocation2 + $0x7d] sm:$0x1] %vm362_vm1, %v1323_v61  ;;  %v1705_v8 = vmax.f32 %v1703_v51, %v1704_v62  ;;  %v1761_v9 = vmax.f32 %v1760_v2, %v1759_v59  ;;  %v1515_v13 = vmax.f32 %v1513_v56, %v1514_v4  ;;  %v1782_v14 = vmax.f32 %v1770_v6, %v1780_v7 }
 0x157   : > { %1875 = vst.msk [vmem:[%s2608_s6 + $0x10] sm:$0xff] %vm1726_vm3, %v1750_v63  ;;  %v1791_v16 = vsel %vm1726_vm3, %v1788_v3, -inf  ;;  %v1772_v17 = vmax.f32 %v1771_v10, %v1770_v6  ;;  %v1792_v20 = vsel %vm1726_vm3, %v1789_v12, -inf  ;;  %v1802_v24 = vsel %vm1726_vm3, %v1799_v23, -inf }
 0x158   : > { %v1706_v35 = vrot.slane %v1705_v8, 1  ;;  %1876 = vst.msk [vmem:[%s2608_s6 + $0x18] sm:$0xff] %vm1726_vm3, %v1761_v9  ;;  %v1793_v18 = vmax.f32 %v1781_v11, %v1791_v16  ;;  %v1783_v19 = vmax.f32 %v1782_v14, %v1781_v11  ;;  %v1804_v15 = vmax.f32 %v1792_v20, %v1802_v24 }
 0x159   : > { %1531 = vst.msk [vmem:[#allocation2 + $0x7e] sm:$0x1] %vm362_vm1, %v1515_v13 }
 0x15a   : > { %v1707_v21 = vmax.f32 %v1705_v8, %v1706_v35  ;;  %1877 = vst.msk [vmem:[%s2608_s6 + $0x20] sm:$0xff] %vm1726_vm3, %v1772_v17  ;;  %v1794_v22 = vmax.f32 %v1793_v18, %v1792_v20  ;;  %1878 = vst.msk [vmem:[%s2608_s6 + $0x28] sm:$0xff] %vm1726_vm3, %v1783_v19 }
 0x15c   : > { %1723 = vst.msk [vmem:[#allocation2 + $0x7f] sm:$0x1] %vm362_vm1, %v1707_v21 }
 0x15d   : > { %1879 = vst.msk [vmem:[%s2608_s6 + $0x30] sm:$0xff] %vm1726_vm3, %v1794_v22 }
 0x163   : > { %v1800_v25 = vld [vmem:[#allocation2 + $0x78] sm:$0xff] }
 0x164   : > { %v1803_v26 = vsel %vm1726_vm3, %v1800_v25, -inf }
 0x165   : > { %v1805_v27 = vmax.f32 %v1804_v15, %v1803_v26 }
 0x167   : > { %1880 = vst.msk [vmem:[%s2608_s6 + $0x38] sm:$0xff] %vm1726_vm3, %v1805_v27 }
 0x168 PF: > { %s13_s12 = sadd.s32 1, %s1903_s12  }
 0x169   : > { %p10_p4 = scmp.ge.s32.totalorder %s13_s12, 4  }
 0x16b   :  { %12 = sbr.rel (!%p10_p4) target bundleno = 1 (0x1), region = 76 }

// kernel: integer_pow.2
= control target key start
LH: loop header
LB: loop body
LE: loop exit
PB: predicated region body
PF: predicated region fallthrough
CT: control target
= control target key end

     0   :  { %s5952_s0 = inlined_call_operand.vmem [shape: f32[2,27,38,38], index: 0, kind: input, shape index: {}, may-alias: {0,1}]   ;;  %s5953_s1 = inlined_call_operand.vmem [shape: f32[2,27,38,38], index: 1, kind: input, shape index: {}, may-alias: {0,1}]   ;;  %s5954_s2 = inlined_call_operand.vmem [shape: f32[2,27,38,38], index: 2, kind: output, shape index: {}]  }
   0x1   :  { %v3_v0 = vld [vmem:[%s5952_s0] sm:$0xff]  ;;  %v2700_v2 = vld [vmem:[%s5952_s0 + $0x438] sm:$0xff]  ;;  %v2703_v5 = vld [vmem:[%s5952_s0 + $0x28] sm:$0xff] }
   0x2   :  { %v4_v1 = vld [vmem:[%s5953_s1] sm:$0xff]  ;;  %v2701_v4 = vld [vmem:[%s5953_s1 + $0x438] sm:$0xff]  ;;  %v2704_v6 = vld [vmem:[%s5953_s1 + $0x28] sm:$0xff] }
   0x3   :  { %v7_v3 = vmul.f32 %v4_v1, %v3_v0  ;;  %v16_v7 = vmul.f32 %v2701_v4, %v2700_v2  ;;  %v26_v8 = vmul.f32 %v2704_v6, %v2703_v5  ;;  %v2706_v9 = vld [vmem:[%s5952_s0 + $0x460] sm:$0xff]  ;;  %v2709_v11 = vld [vmem:[%s5952_s0 + $0x50] sm:$0xff]  ;;  %v2712_v14 = vld [vmem:[%s5952_s0 + $0x488] sm:$0xff] }
   0x4   :  { %v2707_v10 = vld [vmem:[%s5953_s1 + $0x460] sm:$0xff]  ;;  %v2710_v13 = vld [vmem:[%s5953_s1 + $0x50] sm:$0xff]  ;;  %v2713_v15 = vld [vmem:[%s5953_s1 + $0x488] sm:$0xff] }
   0x5   :  { %9 = vst [vmem:[%s5954_s2] sm:$0xff] %v7_v3  ;;  %v36_v12 = vmul.f32 %v2707_v10, %v2706_v9  ;;  %2702 = vst [vmem:[%s5954_s2 + $0x438] sm:$0xff] %v16_v7  ;;  %v46_v16 = vmul.f32 %v2710_v13, %v2709_v11  ;;  %v56_v17 = vmul.f32 %v2713_v15, %v2712_v14  ;;  %v2715_v18 = vld [vmem:[%s5952_s0 + $0x78] sm:$0xff]  ;;  %v2718_v20 = vld [vmem:[%s5952_s0 + $0x4b0] sm:$0xff] }
   0x6   :  { %2705 = vst [vmem:[%s5954_s2 + $0x28] sm:$0xff] %v26_v8  ;;  %v2716_v19 = vld [vmem:[%s5953_s1 + $0x78] sm:$0xff]  ;;  %v2719_v22 = vld [vmem:[%s5953_s1 + $0x4b0] sm:$0xff]  ;;  %v2721_v23 = vld [vmem:[%s5952_s0 + $0xa0] sm:$0xff] }
   0x7   :  { %2708 = vst [vmem:[%s5954_s2 + $0x460] sm:$0xff] %v36_v12  ;;  %v66_v21 = vmul.f32 %v2716_v19, %v2715_v18  ;;  %v2722_v24 = vld [vmem:[%s5953_s1 + $0xa0] sm:$0xff]  ;;  %2711 = vst [vmem:[%s5954_s2 + $0x50] sm:$0xff] %v46_v16  ;;  %v76_v25 = vmul.f32 %v2719_v22, %v2718_v20  ;;  %v2724_v27 = vld [vmem:[%s5952_s0 + $0x4d8] sm:$0xff] }
   0x8   :  { %2714 = vst [vmem:[%s5954_s2 + $0x488] sm:$0xff] %v56_v17  ;;  %v86_v26 = vmul.f32 %v2722_v24, %v2721_v23  ;;  %v2725_v28 = vld [vmem:[%s5953_s1 + $0x4d8] sm:$0xff]  ;;  %v2727_v29 = vld [vmem:[%s5952_s0 + $0xc8] sm:$0xff]  ;;  %v2730_v32 = vld [vmem:[%s5952_s0 + $0x500] sm:$0xff] }
   0x9   :  { %2717 = vst [vmem:[%s5954_s2 + $0x78] sm:$0xff] %v66_v21  ;;  %v96_v30 = vmul.f32 %v2725_v28, %v2724_v27  ;;  %v2728_v31 = vld [vmem:[%s5953_s1 + $0xc8] sm:$0xff]  ;;  %v2731_v33 = vld [vmem:[%s5953_s1 + $0x500] sm:$0xff]  ;;  %2720 = vst [vmem:[%s5954_s2 + $0x4b0] sm:$0xff] %v76_v25 }
   0xa   :  { %2723 = vst [vmem:[%s5954_s2 + $0xa0] sm:$0xff] %v86_v26  ;;  %v106_v34 = vmul.f32 %v2728_v31, %v2727_v29  ;;  %v116_v35 = vmul.f32 %v2731_v33, %v2730_v32  ;;  %v2733_v36 = vld [vmem:[%s5952_s0 + $0xf0] sm:$0xff]  ;;  %v2736_v38 = vld [vmem:[%s5952_s0 + $0x528] sm:$0xff]  ;;  %v2739_v41 = vld [vmem:[%s5952_s0 + $0x118] sm:$0xff] }
   0xb   :  { %v2734_v37 = vld [vmem:[%s5953_s1 + $0xf0] sm:$0xff]  ;;  %2726 = vst [vmem:[%s5954_s2 + $0x4d8] sm:$0xff] %v96_v30  ;;  %v2737_v40 = vld [vmem:[%s5953_s1 + $0x528] sm:$0xff]  ;;  %v2740_v42 = vld [vmem:[%s5953_s1 + $0x118] sm:$0xff] }
   0xc   :  { %v126_v39 = vmul.f32 %v2734_v37, %v2733_v36  ;;  %2729 = vst [vmem:[%s5954_s2 + $0xc8] sm:$0xff] %v106_v34  ;;  %2732 = vst [vmem:[%s5954_s2 + $0x500] sm:$0xff] %v116_v35  ;;  %v136_v43 = vmul.f32 %v2737_v40, %v2736_v38  ;;  %v146_v44 = vmul.f32 %v2740_v42, %v2739_v41  ;;  %v2742_v45 = vld [vmem:[%s5952_s0 + $0x550] sm:$0xff]  ;;  %v2745_v47 = vld [vmem:[%s5952_s0 + $0x140] sm:$0xff] }
   0xd   :  { %v2743_v46 = vld [vmem:[%s5953_s1 + $0x550] sm:$0xff]  ;;  %v2746_v49 = vld [vmem:[%s5953_s1 + $0x140] sm:$0xff]  ;;  %v2748_v50 = vld [vmem:[%s5952_s0 + $0x578] sm:$0xff] }
   0xe   :  { %2735 = vst [vmem:[%s5954_s2 + $0xf0] sm:$0xff] %v126_v39  ;;  %v156_v48 = vmul.f32 %v2743_v46, %v2742_v45  ;;  %v2749_v51 = vld [vmem:[%s5953_s1 + $0x578] sm:$0xff]  ;;  %2738 = vst [vmem:[%s5954_s2 + $0x528] sm:$0xff] %v136_v43  ;;  %v166_v52 = vmul.f32 %v2746_v49, %v2745_v47  ;;  %v2751_v54 = vld [vmem:[%s5952_s0 + $0x168] sm:$0xff] }
   0xf   :  { %2741 = vst [vmem:[%s5954_s2 + $0x118] sm:$0xff] %v146_v44  ;;  %v176_v53 = vmul.f32 %v2749_v51, %v2748_v50  ;;  %v2752_v55 = vld [vmem:[%s5953_s1 + $0x168] sm:$0xff]  ;;  %v2754_v56 = vld [vmem:[%s5952_s0 + $0x5a0] sm:$0xff]  ;;  %v2757_v59 = vld [vmem:[%s5952_s0 + $0x190] sm:$0xff] }
  0x10   :  { %2744 = vst [vmem:[%s5954_s2 + $0x550] sm:$0xff] %v156_v48  ;;  %v186_v57 = vmul.f32 %v2752_v55, %v2751_v54  ;;  %v2755_v58 = vld [vmem:[%s5953_s1 + $0x5a0] sm:$0xff]  ;;  %v2758_v60 = vld [vmem:[%s5953_s1 + $0x190] sm:$0xff]  ;;  %2747 = vst [vmem:[%s5954_s2 + $0x140] sm:$0xff] %v166_v52 }
  0x11   :  { %2750 = vst [vmem:[%s5954_s2 + $0x578] sm:$0xff] %v176_v53  ;;  %v196_v61 = vmul.f32 %v2755_v58, %v2754_v56  ;;  %v206_v62 = vmul.f32 %v2758_v60, %v2757_v59  ;;  %v2760_v63 = vld [vmem:[%s5952_s0 + $0x5c8] sm:$0xff]  ;;  %v2763_v1 = vld [vmem:[%s5952_s0 + $0x1b8] sm:$0xff]  ;;  %v2766_v4 = vld [vmem:[%s5952_s0 + $0x5f0] sm:$0xff] }
  0x12   :  { %v2761_v0 = vld [vmem:[%s5953_s1 + $0x5c8] sm:$0xff]  ;;  %2753 = vst [vmem:[%s5954_s2 + $0x168] sm:$0xff] %v186_v57  ;;  %v2764_v3 = vld [vmem:[%s5953_s1 + $0x1b8] sm:$0xff]  ;;  %v2767_v5 = vld [vmem:[%s5953_s1 + $0x5f0] sm:$0xff] }
  0x13   :  { %v216_v2 = vmul.f32 %v2761_v0, %v2760_v63  ;;  %2756 = vst [vmem:[%s5954_s2 + $0x5a0] sm:$0xff] %v196_v61  ;;  %2759 = vst [vmem:[%s5954_s2 + $0x190] sm:$0xff] %v206_v62  ;;  %v226_v6 = vmul.f32 %v2764_v3, %v2763_v1  ;;  %v236_v7 = vmul.f32 %v2767_v5, %v2766_v4  ;;  %v2769_v8 = vld [vmem:[%s5952_s0 + $0x1e0] sm:$0xff]  ;;  %v2772_v10 = vld [vmem:[%s5952_s0 + $0x618] sm:$0xff] }
  0x14   :  { %v2770_v9 = vld [vmem:[%s5953_s1 + $0x1e0] sm:$0xff]  ;;  %v2773_v12 = vld [vmem:[%s5953_s1 + $0x618] sm:$0xff]  ;;  %v2775_v13 = vld [vmem:[%s5952_s0 + $0x208] sm:$0xff] }
  0x15   :  { %2762 = vst [vmem:[%s5954_s2 + $0x5c8] sm:$0xff] %v216_v2  ;;  %v246_v11 = vmul.f32 %v2770_v9, %v2769_v8  ;;  %v2776_v14 = vld [vmem:[%s5953_s1 + $0x208] sm:$0xff]  ;;  %2765 = vst [vmem:[%s5954_s2 + $0x1b8] sm:$0xff] %v226_v6  ;;  %v256_v15 = vmul.f32 %v2773_v12, %v2772_v10  ;;  %v2778_v17 = vld [vmem:[%s5952_s0 + $0x640] sm:$0xff] }
  0x16   :  { %2768 = vst [vmem:[%s5954_s2 + $0x5f0] sm:$0xff] %v236_v7  ;;  %v266_v16 = vmul.f32 %v2776_v14, %v2775_v13  ;;  %v2779_v18 = vld [vmem:[%s5953_s1 + $0x640] sm:$0xff]  ;;  %v2781_v19 = vld [vmem:[%s5952_s0 + $0x230] sm:$0xff]  ;;  %v2784_v22 = vld [vmem:[%s5952_s0 + $0x668] sm:$0xff] }
  0x17   :  { %2771 = vst [vmem:[%s5954_s2 + $0x1e0] sm:$0xff] %v246_v11  ;;  %v276_v20 = vmul.f32 %v2779_v18, %v2778_v17  ;;  %v2782_v21 = vld [vmem:[%s5953_s1 + $0x230] sm:$0xff]  ;;  %v2785_v23 = vld [vmem:[%s5953_s1 + $0x668] sm:$0xff]  ;;  %2774 = vst [vmem:[%s5954_s2 + $0x618] sm:$0xff] %v256_v15 }
  0x18   :  { %2777 = vst [vmem:[%s5954_s2 + $0x208] sm:$0xff] %v266_v16  ;;  %v286_v24 = vmul.f32 %v2782_v21, %v2781_v19  ;;  %v296_v25 = vmul.f32 %v2785_v23, %v2784_v22  ;;  %v2787_v26 = vld [vmem:[%s5952_s0 + $0x258] sm:$0xff]  ;;  %v2790_v28 = vld [vmem:[%s5952_s0 + $0x690] sm:$0xff]  ;;  %v2793_v31 = vld [vmem:[%s5952_s0 + $0x280] sm:$0xff] }
  0x19   :  { %v2788_v27 = vld [vmem:[%s5953_s1 + $0x258] sm:$0xff]  ;;  %2780 = vst [vmem:[%s5954_s2 + $0x640] sm:$0xff] %v276_v20  ;;  %v2791_v30 = vld [vmem:[%s5953_s1 + $0x690] sm:$0xff]  ;;  %v2794_v32 = vld [vmem:[%s5953_s1 + $0x280] sm:$0xff] }
  0x1a   :  { %v306_v29 = vmul.f32 %v2788_v27, %v2787_v26  ;;  %2783 = vst [vmem:[%s5954_s2 + $0x230] sm:$0xff] %v286_v24  ;;  %2786 = vst [vmem:[%s5954_s2 + $0x668] sm:$0xff] %v296_v25  ;;  %v316_v33 = vmul.f32 %v2791_v30, %v2790_v28  ;;  %v326_v34 = vmul.f32 %v2794_v32, %v2793_v31  ;;  %v2796_v35 = vld [vmem:[%s5952_s0 + $0x6b8] sm:$0xff]  ;;  %v2799_v37 = vld [vmem:[%s5952_s0 + $0x2a8] sm:$0xff] }
  0x1b   :  { %v2797_v36 = vld [vmem:[%s5953_s1 + $0x6b8] sm:$0xff]  ;;  %v2800_v39 = vld [vmem:[%s5953_s1 + $0x2a8] sm:$0xff]  ;;  %v2802_v40 = vld [vmem:[%s5952_s0 + $0x6e0] sm:$0xff] }
  0x1c   :  { %2789 = vst [vmem:[%s5954_s2 + $0x258] sm:$0xff] %v306_v29  ;;  %v336_v38 = vmul.f32 %v2797_v36, %v2796_v35  ;;  %v2803_v41 = vld [vmem:[%s5953_s1 + $0x6e0] sm:$0xff]  ;;  %2792 = vst [vmem:[%s5954_s2 + $0x690] sm:$0xff] %v316_v33  ;;  %v346_v42 = vmul.f32 %v2800_v39, %v2799_v37  ;;  %v2805_v44 = vld [vmem:[%s5952_s0 + $0x2d0] sm:$0xff] }
  0x1d   :  { %2795 = vst [vmem:[%s5954_s2 + $0x280] sm:$0xff] %v326_v34  ;;  %v356_v43 = vmul.f32 %v2803_v41, %v2802_v40  ;;  %v2806_v45 = vld [vmem:[%s5953_s1 + $0x2d0] sm:$0xff]  ;;  %v2808_v46 = vld [vmem:[%s5952_s0 + $0x708] sm:$0xff]  ;;  %v2811_v49 = vld [vmem:[%s5952_s0 + $0x2f8] sm:$0xff] }
  0x1e   :  { %2798 = vst [vmem:[%s5954_s2 + $0x6b8] sm:$0xff] %v336_v38  ;;  %v366_v47 = vmul.f32 %v2806_v45, %v2805_v44  ;;  %v2809_v48 = vld [vmem:[%s5953_s1 + $0x708] sm:$0xff]  ;;  %v2812_v50 = vld [vmem:[%s5953_s1 + $0x2f8] sm:$0xff]  ;;  %2801 = vst [vmem:[%s5954_s2 + $0x2a8] sm:$0xff] %v346_v42 }
  0x1f   :  { %2804 = vst [vmem:[%s5954_s2 + $0x6e0] sm:$0xff] %v356_v43  ;;  %v376_v51 = vmul.f32 %v2809_v48, %v2808_v46  ;;  %v386_v52 = vmul.f32 %v2812_v50, %v2811_v49  ;;  %v2814_v53 = vld [vmem:[%s5952_s0 + $0x730] sm:$0xff]  ;;  %v2817_v55 = vld [vmem:[%s5952_s0 + $0x320] sm:$0xff]  ;;  %v2820_v58 = vld [vmem:[%s5952_s0 + $0x758] sm:$0xff] }
  0x20   :  { %v2815_v54 = vld [vmem:[%s5953_s1 + $0x730] sm:$0xff]  ;;  %2807 = vst [vmem:[%s5954_s2 + $0x2d0] sm:$0xff] %v366_v47  ;;  %v2818_v57 = vld [vmem:[%s5953_s1 + $0x320] sm:$0xff]  ;;  %v2821_v59 = vld [vmem:[%s5953_s1 + $0x758] sm:$0xff] }
  0x21   :  { %v396_v56 = vmul.f32 %v2815_v54, %v2814_v53  ;;  %2810 = vst [vmem:[%s5954_s2 + $0x708] sm:$0xff] %v376_v51  ;;  %2813 = vst [vmem:[%s5954_s2 + $0x2f8] sm:$0xff] %v386_v52  ;;  %v406_v60 = vmul.f32 %v2818_v57, %v2817_v55  ;;  %v416_v61 = vmul.f32 %v2821_v59, %v2820_v58  ;;  %v2823_v62 = vld [vmem:[%s5952_s0 + $0x348] sm:$0xff]  ;;  %v2826_v0 = vld [vmem:[%s5952_s0 + $0x780] sm:$0xff] }
  0x22   :  { %v2824_v63 = vld [vmem:[%s5953_s1 + $0x348] sm:$0xff]  ;;  %v2827_v2 = vld [vmem:[%s5953_s1 + $0x780] sm:$0xff]  ;;  %v2829_v3 = vld [vmem:[%s5952_s0 + $0x370] sm:$0xff] }
  0x23   :  { %2816 = vst [vmem:[%s5954_s2 + $0x730] sm:$0xff] %v396_v56  ;;  %v426_v1 = vmul.f32 %v2824_v63, %v2823_v62  ;;  %v2830_v4 = vld [vmem:[%s5953_s1 + $0x370] sm:$0xff]  ;;  %2819 = vst [vmem:[%s5954_s2 + $0x320] sm:$0xff] %v406_v60  ;;  %v436_v5 = vmul.f32 %v2827_v2, %v2826_v0  ;;  %v2832_v7 = vld [vmem:[%s5952_s0 + $0x7a8] sm:$0xff] }
  0x24   :  { %2822 = vst [vmem:[%s5954_s2 + $0x758] sm:$0xff] %v416_v61  ;;  %v446_v6 = vmul.f32 %v2830_v4, %v2829_v3  ;;  %v2833_v8 = vld [vmem:[%s5953_s1 + $0x7a8] sm:$0xff]  ;;  %v2835_v9 = vld [vmem:[%s5952_s0 + $0x398] sm:$0xff]  ;;  %v2838_v12 = vld [vmem:[%s5952_s0 + $0x7d0] sm:$0xff] }
  0x25   :  { %2825 = vst [vmem:[%s5954_s2 + $0x348] sm:$0xff] %v426_v1  ;;  %v456_v10 = vmul.f32 %v2833_v8, %v2832_v7  ;;  %v2836_v11 = vld [vmem:[%s5953_s1 + $0x398] sm:$0xff]  ;;  %v2839_v13 = vld [vmem:[%s5953_s1 + $0x7d0] sm:$0xff]  ;;  %2828 = vst [vmem:[%s5954_s2 + $0x780] sm:$0xff] %v436_v5 }
  0x26   :  { %2831 = vst [vmem:[%s5954_s2 + $0x370] sm:$0xff] %v446_v6  ;;  %v466_v14 = vmul.f32 %v2836_v11, %v2835_v9  ;;  %v476_v15 = vmul.f32 %v2839_v13, %v2838_v12  ;;  %v2841_v16 = vld [vmem:[%s5952_s0 + $0x3c0] sm:$0xff]  ;;  %v2844_v18 = vld [vmem:[%s5952_s0 + $0x7f8] sm:$0xff]  ;;  %v2847_v21 = vld [vmem:[%s5952_s0 + $0x3e8] sm:$0xff] }
  0x27   :  { %v2842_v17 = vld [vmem:[%s5953_s1 + $0x3c0] sm:$0xff]  ;;  %2834 = vst [vmem:[%s5954_s2 + $0x7a8] sm:$0xff] %v456_v10  ;;  %v2845_v20 = vld [vmem:[%s5953_s1 + $0x7f8] sm:$0xff]  ;;  %v2848_v22 = vld [vmem:[%s5953_s1 + $0x3e8] sm:$0xff] }
  0x28   :  { %v486_v19 = vmul.f32 %v2842_v17, %v2841_v16  ;;  %2837 = vst [vmem:[%s5954_s2 + $0x398] sm:$0xff] %v466_v14  ;;  %2840 = vst [vmem:[%s5954_s2 + $0x7d0] sm:$0xff] %v476_v15  ;;  %v496_v23 = vmul.f32 %v2845_v20, %v2844_v18  ;;  %v506_v24 = vmul.f32 %v2848_v22, %v2847_v21  ;;  %v2850_v25 = vld [vmem:[%s5952_s0 + $0x820] sm:$0xff]  ;;  %v2853_v27 = vld [vmem:[%s5952_s0 + $0x410] sm:$0xff] }
  0x29   :  { %v2851_v26 = vld [vmem:[%s5953_s1 + $0x820] sm:$0xff]  ;;  %v2854_v29 = vld [vmem:[%s5953_s1 + $0x410] sm:$0xff]  ;;  %v2856_v30 = vld [vmem:[%s5952_s0 + $0x848] sm:$0xff] }
  0x2a   :  { %2843 = vst [vmem:[%s5954_s2 + $0x3c0] sm:$0xff] %v486_v19  ;;  %v516_v28 = vmul.f32 %v2851_v26, %v2850_v25  ;;  %v2857_v31 = vld [vmem:[%s5953_s1 + $0x848] sm:$0xff]  ;;  %2846 = vst [vmem:[%s5954_s2 + $0x7f8] sm:$0xff] %v496_v23  ;;  %v526_v32 = vmul.f32 %v2854_v29, %v2853_v27  ;;  %v2862_v36 = vld [vmem:[%s5952_s0 + $0x440] sm:$0xff] }
  0x2b   :  { %2849 = vst [vmem:[%s5954_s2 + $0x3e8] sm:$0xff] %v506_v24  ;;  %v536_v33 = vmul.f32 %v2857_v31, %v2856_v30  ;;  %v2859_v34 = vld [vmem:[%s5952_s0 + $0x8] sm:$0xff]  ;;  %v2863_v38 = vld [vmem:[%s5953_s1 + $0x440] sm:$0xff]  ;;  %v2865_v39 = vld [vmem:[%s5952_s0 + $0x30] sm:$0xff] }
  0x2c   :  { %v2860_v35 = vld [vmem:[%s5953_s1 + $0x8] sm:$0xff]  ;;  %2852 = vst [vmem:[%s5954_s2 + $0x820] sm:$0xff] %v516_v28  ;;  %v2866_v40 = vld [vmem:[%s5953_s1 + $0x30] sm:$0xff]  ;;  %2855 = vst [vmem:[%s5954_s2 + $0x410] sm:$0xff] %v526_v32  ;;  %v556_v41 = vmul.f32 %v2863_v38, %v2862_v36 }
  0x2d   :  { %v546_v37 = vmul.f32 %v2860_v35, %v2859_v34  ;;  %2858 = vst [vmem:[%s5954_s2 + $0x848] sm:$0xff] %v536_v33  ;;  %v566_v42 = vmul.f32 %v2866_v40, %v2865_v39  ;;  %v2868_v43 = vld [vmem:[%s5952_s0 + $0x468] sm:$0xff]  ;;  %v2871_v45 = vld [vmem:[%s5952_s0 + $0x58] sm:$0xff]  ;;  %v2874_v48 = vld [vmem:[%s5952_s0 + $0x490] sm:$0xff] }
  0x2e   :  { %v2869_v44 = vld [vmem:[%s5953_s1 + $0x468] sm:$0xff]  ;;  %v2872_v47 = vld [vmem:[%s5953_s1 + $0x58] sm:$0xff]  ;;  %v2875_v49 = vld [vmem:[%s5953_s1 + $0x490] sm:$0xff]  ;;  %2864 = vst [vmem:[%s5954_s2 + $0x440] sm:$0xff] %v556_v41 }
  0x2f   :  { %2861 = vst [vmem:[%s5954_s2 + $0x8] sm:$0xff] %v546_v37  ;;  %v576_v46 = vmul.f32 %v2869_v44, %v2868_v43  ;;  %2867 = vst [vmem:[%s5954_s2 + $0x30] sm:$0xff] %v566_v42  ;;  %v586_v50 = vmul.f32 %v2872_v47, %v2871_v45  ;;  %v596_v51 = vmul.f32 %v2875_v49, %v2874_v48  ;;  %v2877_v52 = vld [vmem:[%s5952_s0 + $0x80] sm:$0xff]  ;;  %v2880_v54 = vld [vmem:[%s5952_s0 + $0x4b8] sm:$0xff] }
  0x30   :  { %v2878_v53 = vld [vmem:[%s5953_s1 + $0x80] sm:$0xff]  ;;  %v2881_v56 = vld [vmem:[%s5953_s1 + $0x4b8] sm:$0xff]  ;;  %v2883_v57 = vld [vmem:[%s5952_s0 + $0xa8] sm:$0xff] }
  0x31   :  { %2870 = vst [vmem:[%s5954_s2 + $0x468] sm:$0xff] %v576_v46  ;;  %v606_v55 = vmul.f32 %v2878_v53, %v2877_v52  ;;  %v2884_v58 = vld [vmem:[%s5953_s1 + $0xa8] sm:$0xff]  ;;  %2873 = vst [vmem:[%s5954_s2 + $0x58] sm:$0xff] %v586_v50  ;;  %v616_v59 = vmul.f32 %v2881_v56, %v2880_v54  ;;  %v2886_v61 = vld [vmem:[%s5952_s0 + $0x4e0] sm:$0xff] }
  0x32   :  { %2876 = vst [vmem:[%s5954_s2 + $0x490] sm:$0xff] %v596_v51  ;;  %v626_v60 = vmul.f32 %v2884_v58, %v2883_v57  ;;  %v2887_v62 = vld [vmem:[%s5953_s1 + $0x4e0] sm:$0xff]  ;;  %v2889_v63 = vld [vmem:[%s5952_s0 + $0xd0] sm:$0xff]  ;;  %v2892_v2 = vld [vmem:[%s5952_s0 + $0x508] sm:$0xff] }
  0x33   :  { %2879 = vst [vmem:[%s5954_s2 + $0x80] sm:$0xff] %v606_v55  ;;  %v636_v0 = vmul.f32 %v2887_v62, %v2886_v61  ;;  %v2890_v1 = vld [vmem:[%s5953_s1 + $0xd0] sm:$0xff]  ;;  %v2893_v3 = vld [vmem:[%s5953_s1 + $0x508] sm:$0xff]  ;;  %2882 = vst [vmem:[%s5954_s2 + $0x4b8] sm:$0xff] %v616_v59 }
  0x34   :  { %2885 = vst [vmem:[%s5954_s2 + $0xa8] sm:$0xff] %v626_v60  ;;  %v646_v4 = vmul.f32 %v2890_v1, %v2889_v63  ;;  %v656_v5 = vmul.f32 %v2893_v3, %v2892_v2  ;;  %v2895_v6 = vld [vmem:[%s5952_s0 + $0xf8] sm:$0xff]  ;;  %v2898_v8 = vld [vmem:[%s5952_s0 + $0x530] sm:$0xff]  ;;  %v2901_v11 = vld [vmem:[%s5952_s0 + $0x120] sm:$0xff] }
  0x35   :  { %v2896_v7 = vld [vmem:[%s5953_s1 + $0xf8] sm:$0xff]  ;;  %2888 = vst [vmem:[%s5954_s2 + $0x4e0] sm:$0xff] %v636_v0  ;;  %v2899_v10 = vld [vmem:[%s5953_s1 + $0x530] sm:$0xff]  ;;  %v2902_v12 = vld [vmem:[%s5953_s1 + $0x120] sm:$0xff] }
  0x36   :  { %v666_v9 = vmul.f32 %v2896_v7, %v2895_v6  ;;  %2891 = vst [vmem:[%s5954_s2 + $0xd0] sm:$0xff] %v646_v4  ;;  %2894 = vst [vmem:[%s5954_s2 + $0x508] sm:$0xff] %v656_v5  ;;  %v676_v13 = vmul.f32 %v2899_v10, %v2898_v8  ;;  %v686_v14 = vmul.f32 %v2902_v12, %v2901_v11  ;;  %v2904_v15 = vld [vmem:[%s5952_s0 + $0x558] sm:$0xff]  ;;  %v2907_v17 = vld [vmem:[%s5952_s0 + $0x148] sm:$0xff] }
  0x37   :  { %v2905_v16 = vld [vmem:[%s5953_s1 + $0x558] sm:$0xff]  ;;  %v2908_v19 = vld [vmem:[%s5953_s1 + $0x148] sm:$0xff]  ;;  %v2910_v20 = vld [vmem:[%s5952_s0 + $0x580] sm:$0xff] }
  0x38   :  { %2897 = vst [vmem:[%s5954_s2 + $0xf8] sm:$0xff] %v666_v9  ;;  %v696_v18 = vmul.f32 %v2905_v16, %v2904_v15  ;;  %v2911_v21 = vld [vmem:[%s5953_s1 + $0x580] sm:$0xff]  ;;  %2900 = vst [vmem:[%s5954_s2 + $0x530] sm:$0xff] %v676_v13  ;;  %v706_v22 = vmul.f32 %v2908_v19, %v2907_v17  ;;  %v2913_v24 = vld [vmem:[%s5952_s0 + $0x170] sm:$0xff] }
  0x39   :  { %2903 = vst [vmem:[%s5954_s2 + $0x120] sm:$0xff] %v686_v14  ;;  %v716_v23 = vmul.f32 %v2911_v21, %v2910_v20  ;;  %v2914_v25 = vld [vmem:[%s5953_s1 + $0x170] sm:$0xff]  ;;  %v2916_v26 = vld [vmem:[%s5952_s0 + $0x5a8] sm:$0xff]  ;;  %v2919_v29 = vld [vmem:[%s5952_s0 + $0x198] sm:$0xff] }
  0x3a   :  { %2906 = vst [vmem:[%s5954_s2 + $0x558] sm:$0xff] %v696_v18  ;;  %v726_v27 = vmul.f32 %v2914_v25, %v2913_v24  ;;  %v2917_v28 = vld [vmem:[%s5953_s1 + $0x5a8] sm:$0xff]  ;;  %v2920_v30 = vld [vmem:[%s5953_s1 + $0x198] sm:$0xff]  ;;  %2909 = vst [vmem:[%s5954_s2 + $0x148] sm:$0xff] %v706_v22 }
  0x3b   :  { %2912 = vst [vmem:[%s5954_s2 + $0x580] sm:$0xff] %v716_v23  ;;  %v736_v31 = vmul.f32 %v2917_v28, %v2916_v26  ;;  %v746_v32 = vmul.f32 %v2920_v30, %v2919_v29  ;;  %v2922_v33 = vld [vmem:[%s5952_s0 + $0x5d0] sm:$0xff]  ;;  %v2925_v35 = vld [vmem:[%s5952_s0 + $0x1c0] sm:$0xff]  ;;  %v2928_v38 = vld [vmem:[%s5952_s0 + $0x5f8] sm:$0xff] }
  0x3c   :  { %v2923_v34 = vld [vmem:[%s5953_s1 + $0x5d0] sm:$0xff]  ;;  %2915 = vst [vmem:[%s5954_s2 + $0x170] sm:$0xff] %v726_v27  ;;  %v2926_v37 = vld [vmem:[%s5953_s1 + $0x1c0] sm:$0xff]  ;;  %v2929_v39 = vld [vmem:[%s5953_s1 + $0x5f8] sm:$0xff] }
  0x3d   :  { %v756_v36 = vmul.f32 %v2923_v34, %v2922_v33  ;;  %2918 = vst [vmem:[%s5954_s2 + $0x5a8] sm:$0xff] %v736_v31  ;;  %2921 = vst [vmem:[%s5954_s2 + $0x198] sm:$0xff] %v746_v32  ;;  %v766_v40 = vmul.f32 %v2926_v37, %v2925_v35  ;;  %v776_v41 = vmul.f32 %v2929_v39, %v2928_v38  ;;  %v2931_v42 = vld [vmem:[%s5952_s0 + $0x1e8] sm:$0xff]  ;;  %v2934_v44 = vld [vmem:[%s5952_s0 + $0x620] sm:$0xff] }
  0x3e   :  { %v2932_v43 = vld [vmem:[%s5953_s1 + $0x1e8] sm:$0xff]  ;;  %v2935_v46 = vld [vmem:[%s5953_s1 + $0x620] sm:$0xff]  ;;  %v2937_v47 = vld [vmem:[%s5952_s0 + $0x210] sm:$0xff] }
  0x3f   :  { %2924 = vst [vmem:[%s5954_s2 + $0x5d0] sm:$0xff] %v756_v36  ;;  %v786_v45 = vmul.f32 %v2932_v43, %v2931_v42  ;;  %v2938_v48 = vld [vmem:[%s5953_s1 + $0x210] sm:$0xff]  ;;  %2927 = vst [vmem:[%s5954_s2 + $0x1c0] sm:$0xff] %v766_v40  ;;  %v796_v49 = vmul.f32 %v2935_v46, %v2934_v44  ;;  %v2940_v51 = vld [vmem:[%s5952_s0 + $0x648] sm:$0xff] }
  0x40   :  { %2930 = vst [vmem:[%s5954_s2 + $0x5f8] sm:$0xff] %v776_v41  ;;  %v806_v50 = vmul.f32 %v2938_v48, %v2937_v47  ;;  %v2941_v52 = vld [vmem:[%s5953_s1 + $0x648] sm:$0xff]  ;;  %v2943_v53 = vld [vmem:[%s5952_s0 + $0x238] sm:$0xff]  ;;  %v2946_v56 = vld [vmem:[%s5952_s0 + $0x670] sm:$0xff] }
  0x41   :  { %2933 = vst [vmem:[%s5954_s2 + $0x1e8] sm:$0xff] %v786_v45  ;;  %v816_v54 = vmul.f32 %v2941_v52, %v2940_v51  ;;  %v2944_v55 = vld [vmem:[%s5953_s1 + $0x238] sm:$0xff]  ;;  %v2947_v57 = vld [vmem:[%s5953_s1 + $0x670] sm:$0xff]  ;;  %2936 = vst [vmem:[%s5954_s2 + $0x620] sm:$0xff] %v796_v49 }
  0x42   :  { %2939 = vst [vmem:[%s5954_s2 + $0x210] sm:$0xff] %v806_v50  ;;  %v826_v58 = vmul.f32 %v2944_v55, %v2943_v53  ;;  %v836_v59 = vmul.f32 %v2947_v57, %v2946_v56  ;;  %v2949_v60 = vld [vmem:[%s5952_s0 + $0x260] sm:$0xff]  ;;  %v2952_v62 = vld [vmem:[%s5952_s0 + $0x698] sm:$0xff]  ;;  %v2955_v1 = vld [vmem:[%s5952_s0 + $0x288] sm:$0xff] }
  0x43   :  { %v2950_v61 = vld [vmem:[%s5953_s1 + $0x260] sm:$0xff]  ;;  %2942 = vst [vmem:[%s5954_s2 + $0x648] sm:$0xff] %v816_v54  ;;  %v2953_v0 = vld [vmem:[%s5953_s1 + $0x698] sm:$0xff]  ;;  %v2956_v2 = vld [vmem:[%s5953_s1 + $0x288] sm:$0xff] }
  0x44   :  { %v846_v63 = vmul.f32 %v2950_v61, %v2949_v60  ;;  %2945 = vst [vmem:[%s5954_s2 + $0x238] sm:$0xff] %v826_v58  ;;  %2948 = vst [vmem:[%s5954_s2 + $0x670] sm:$0xff] %v836_v59  ;;  %v856_v3 = vmul.f32 %v2953_v0, %v2952_v62  ;;  %v866_v4 = vmul.f32 %v2956_v2, %v2955_v1  ;;  %v2958_v5 = vld [vmem:[%s5952_s0 + $0x6c0] sm:$0xff]  ;;  %v2961_v7 = vld [vmem:[%s5952_s0 + $0x2b0] sm:$0xff] }
  0x45   :  { %v2959_v6 = vld [vmem:[%s5953_s1 + $0x6c0] sm:$0xff]  ;;  %v2962_v9 = vld [vmem:[%s5953_s1 + $0x2b0] sm:$0xff]  ;;  %v2964_v10 = vld [vmem:[%s5952_s0 + $0x6e8] sm:$0xff] }
  0x46   :  { %2951 = vst [vmem:[%s5954_s2 + $0x260] sm:$0xff] %v846_v63  ;;  %v876_v8 = vmul.f32 %v2959_v6, %v2958_v5  ;;  %v2965_v11 = vld [vmem:[%s5953_s1 + $0x6e8] sm:$0xff]  ;;  %2954 = vst [vmem:[%s5954_s2 + $0x698] sm:$0xff] %v856_v3  ;;  %v886_v12 = vmul.f32 %v2962_v9, %v2961_v7  ;;  %v2967_v14 = vld [vmem:[%s5952_s0 + $0x2d8] sm:$0xff] }
  0x47   :  { %2957 = vst [vmem:[%s5954_s2 + $0x288] sm:$0xff] %v866_v4  ;;  %v896_v13 = vmul.f32 %v2965_v11, %v2964_v10  ;;  %v2968_v15 = vld [vmem:[%s5953_s1 + $0x2d8] sm:$0xff]  ;;  %v2970_v16 = vld [vmem:[%s5952_s0 + $0x710] sm:$0xff]  ;;  %v2973_v19 = vld [vmem:[%s5952_s0 + $0x300] sm:$0xff] }
  0x48   :  { %2960 = vst [vmem:[%s5954_s2 + $0x6c0] sm:$0xff] %v876_v8  ;;  %v906_v17 = vmul.f32 %v2968_v15, %v2967_v14  ;;  %v2971_v18 = vld [vmem:[%s5953_s1 + $0x710] sm:$0xff]  ;;  %v2974_v20 = vld [vmem:[%s5953_s1 + $0x300] sm:$0xff]  ;;  %2963 = vst [vmem:[%s5954_s2 + $0x2b0] sm:$0xff] %v886_v12 }
  0x49   :  { %2966 = vst [vmem:[%s5954_s2 + $0x6e8] sm:$0xff] %v896_v13  ;;  %v916_v21 = vmul.f32 %v2971_v18, %v2970_v16  ;;  %v926_v22 = vmul.f32 %v2974_v20, %v2973_v19  ;;  %v2976_v23 = vld [vmem:[%s5952_s0 + $0x738] sm:$0xff]  ;;  %v2979_v25 = vld [vmem:[%s5952_s0 + $0x328] sm:$0xff]  ;;  %v2982_v28 = vld [vmem:[%s5952_s0 + $0x760] sm:$0xff] }
  0x4a   :  { %v2977_v24 = vld [vmem:[%s5953_s1 + $0x738] sm:$0xff]  ;;  %2969 = vst [vmem:[%s5954_s2 + $0x2d8] sm:$0xff] %v906_v17  ;;  %v2980_v27 = vld [vmem:[%s5953_s1 + $0x328] sm:$0xff]  ;;  %v2983_v29 = vld [vmem:[%s5953_s1 + $0x760] sm:$0xff] }
  0x4b   :  { %v936_v26 = vmul.f32 %v2977_v24, %v2976_v23  ;;  %2972 = vst [vmem:[%s5954_s2 + $0x710] sm:$0xff] %v916_v21  ;;  %2975 = vst [vmem:[%s5954_s2 + $0x300] sm:$0xff] %v926_v22  ;;  %v946_v30 = vmul.f32 %v2980_v27, %v2979_v25  ;;  %v956_v31 = vmul.f32 %v2983_v29, %v2982_v28  ;;  %v2985_v32 = vld [vmem:[%s5952_s0 + $0x350] sm:$0xff]  ;;  %v2988_v34 = vld [vmem:[%s5952_s0 + $0x788] sm:$0xff] }
  0x4c   :  { %v2986_v33 = vld [vmem:[%s5953_s1 + $0x350] sm:$0xff]  ;;  %v2989_v36 = vld [vmem:[%s5953_s1 + $0x788] sm:$0xff]  ;;  %v2991_v37 = vld [vmem:[%s5952_s0 + $0x378] sm:$0xff] }
  0x4d   :  { %2978 = vst [vmem:[%s5954_s2 + $0x738] sm:$0xff] %v936_v26  ;;  %v966_v35 = vmul.f32 %v2986_v33, %v2985_v32  ;;  %v2992_v38 = vld [vmem:[%s5953_s1 + $0x378] sm:$0xff]  ;;  %2981 = vst [vmem:[%s5954_s2 + $0x328] sm:$0xff] %v946_v30  ;;  %v976_v39 = vmul.f32 %v2989_v36, %v2988_v34  ;;  %v2994_v41 = vld [vmem:[%s5952_s0 + $0x7b0] sm:$0xff] }
  0x4e   :  { %2984 = vst [vmem:[%s5954_s2 + $0x760] sm:$0xff] %v956_v31  ;;  %v986_v40 = vmul.f32 %v2992_v38, %v2991_v37  ;;  %v2995_v42 = vld [vmem:[%s5953_s1 + $0x7b0] sm:$0xff]  ;;  %v2997_v43 = vld [vmem:[%s5952_s0 + $0x3a0] sm:$0xff]  ;;  %v3000_v46 = vld [vmem:[%s5952_s0 + $0x7d8] sm:$0xff] }
  0x4f   :  { %2987 = vst [vmem:[%s5954_s2 + $0x350] sm:$0xff] %v966_v35  ;;  %v996_v44 = vmul.f32 %v2995_v42, %v2994_v41  ;;  %v2998_v45 = vld [vmem:[%s5953_s1 + $0x3a0] sm:$0xff]  ;;  %v3001_v47 = vld [vmem:[%s5953_s1 + $0x7d8] sm:$0xff]  ;;  %2990 = vst [vmem:[%s5954_s2 + $0x788] sm:$0xff] %v976_v39 }
  0x50   :  { %2993 = vst [vmem:[%s5954_s2 + $0x378] sm:$0xff] %v986_v40  ;;  %v1006_v48 = vmul.f32 %v2998_v45, %v2997_v43  ;;  %v1016_v49 = vmul.f32 %v3001_v47, %v3000_v46  ;;  %v3003_v50 = vld [vmem:[%s5952_s0 + $0x3c8] sm:$0xff]  ;;  %v3006_v52 = vld [vmem:[%s5952_s0 + $0x800] sm:$0xff]  ;;  %v3009_v55 = vld [vmem:[%s5952_s0 + $0x3f0] sm:$0xff] }
  0x51   :  { %v3004_v51 = vld [vmem:[%s5953_s1 + $0x3c8] sm:$0xff]  ;;  %2996 = vst [vmem:[%s5954_s2 + $0x7b0] sm:$0xff] %v996_v44  ;;  %v3007_v54 = vld [vmem:[%s5953_s1 + $0x800] sm:$0xff]  ;;  %v3010_v56 = vld [vmem:[%s5953_s1 + $0x3f0] sm:$0xff] }
  0x52   :  { %v1026_v53 = vmul.f32 %v3004_v51, %v3003_v50  ;;  %2999 = vst [vmem:[%s5954_s2 + $0x3a0] sm:$0xff] %v1006_v48  ;;  %3002 = vst [vmem:[%s5954_s2 + $0x7d8] sm:$0xff] %v1016_v49  ;;  %v1036_v57 = vmul.f32 %v3007_v54, %v3006_v52  ;;  %v1046_v58 = vmul.f32 %v3010_v56, %v3009_v55  ;;  %v3012_v59 = vld [vmem:[%s5952_s0 + $0x828] sm:$0xff]  ;;  %v3015_v61 = vld [vmem:[%s5952_s0 + $0x418] sm:$0xff] }
  0x53   :  { %v3013_v60 = vld [vmem:[%s5953_s1 + $0x828] sm:$0xff]  ;;  %v3016_v63 = vld [vmem:[%s5953_s1 + $0x418] sm:$0xff]  ;;  %v3018_v0 = vld [vmem:[%s5952_s0 + $0x850] sm:$0xff] }
  0x54   :  { %3005 = vst [vmem:[%s5954_s2 + $0x3c8] sm:$0xff] %v1026_v53  ;;  %v1056_v62 = vmul.f32 %v3013_v60, %v3012_v59  ;;  %v3019_v1 = vld [vmem:[%s5953_s1 + $0x850] sm:$0xff]  ;;  %3008 = vst [vmem:[%s5954_s2 + $0x800] sm:$0xff] %v1036_v57  ;;  %v1066_v2 = vmul.f32 %v3016_v63, %v3015_v61  ;;  %v3024_v6 = vld [vmem:[%s5952_s0 + $0x448] sm:$0xff] }
  0x55   :  { %3011 = vst [vmem:[%s5954_s2 + $0x3f0] sm:$0xff] %v1046_v58  ;;  %v1076_v3 = vmul.f32 %v3019_v1, %v3018_v0  ;;  %v3021_v4 = vld [vmem:[%s5952_s0 + $0x10] sm:$0xff]  ;;  %v3025_v8 = vld [vmem:[%s5953_s1 + $0x448] sm:$0xff]  ;;  %v3027_v9 = vld [vmem:[%s5952_s0 + $0x38] sm:$0xff] }
  0x56   :  { %v3022_v5 = vld [vmem:[%s5953_s1 + $0x10] sm:$0xff]  ;;  %3014 = vst [vmem:[%s5954_s2 + $0x828] sm:$0xff] %v1056_v62  ;;  %v3028_v10 = vld [vmem:[%s5953_s1 + $0x38] sm:$0xff]  ;;  %3017 = vst [vmem:[%s5954_s2 + $0x418] sm:$0xff] %v1066_v2  ;;  %v1096_v11 = vmul.f32 %v3025_v8, %v3024_v6 }
  0x57   :  { %v1086_v7 = vmul.f32 %v3022_v5, %v3021_v4  ;;  %3020 = vst [vmem:[%s5954_s2 + $0x850] sm:$0xff] %v1076_v3  ;;  %v1106_v12 = vmul.f32 %v3028_v10, %v3027_v9  ;;  %v3030_v13 = vld [vmem:[%s5952_s0 + $0x470] sm:$0xff]  ;;  %v3033_v15 = vld [vmem:[%s5952_s0 + $0x60] sm:$0xff]  ;;  %v3036_v18 = vld [vmem:[%s5952_s0 + $0x498] sm:$0xff] }
  0x58   :  { %v3031_v14 = vld [vmem:[%s5953_s1 + $0x470] sm:$0xff]  ;;  %v3034_v17 = vld [vmem:[%s5953_s1 + $0x60] sm:$0xff]  ;;  %v3037_v19 = vld [vmem:[%s5953_s1 + $0x498] sm:$0xff]  ;;  %3026 = vst [vmem:[%s5954_s2 + $0x448] sm:$0xff] %v1096_v11 }
  0x59   :  { %3023 = vst [vmem:[%s5954_s2 + $0x10] sm:$0xff] %v1086_v7  ;;  %v1116_v16 = vmul.f32 %v3031_v14, %v3030_v13  ;;  %3029 = vst [vmem:[%s5954_s2 + $0x38] sm:$0xff] %v1106_v12  ;;  %v1126_v20 = vmul.f32 %v3034_v17, %v3033_v15  ;;  %v1136_v21 = vmul.f32 %v3037_v19, %v3036_v18  ;;  %v3039_v22 = vld [vmem:[%s5952_s0 + $0x88] sm:$0xff]  ;;  %v3042_v24 = vld [vmem:[%s5952_s0 + $0x4c0] sm:$0xff] }
  0x5a   :  { %v3040_v23 = vld [vmem:[%s5953_s1 + $0x88] sm:$0xff]  ;;  %v3043_v26 = vld [vmem:[%s5953_s1 + $0x4c0] sm:$0xff]  ;;  %v3045_v27 = vld [vmem:[%s5952_s0 + $0xb0] sm:$0xff] }
  0x5b   :  { %3032 = vst [vmem:[%s5954_s2 + $0x470] sm:$0xff] %v1116_v16  ;;  %v1146_v25 = vmul.f32 %v3040_v23, %v3039_v22  ;;  %v3046_v28 = vld [vmem:[%s5953_s1 + $0xb0] sm:$0xff]  ;;  %3035 = vst [vmem:[%s5954_s2 + $0x60] sm:$0xff] %v1126_v20  ;;  %v1156_v29 = vmul.f32 %v3043_v26, %v3042_v24  ;;  %v3048_v31 = vld [vmem:[%s5952_s0 + $0x4e8] sm:$0xff] }
  0x5c   :  { %3038 = vst [vmem:[%s5954_s2 + $0x498] sm:$0xff] %v1136_v21  ;;  %v1166_v30 = vmul.f32 %v3046_v28, %v3045_v27  ;;  %v3049_v32 = vld [vmem:[%s5953_s1 + $0x4e8] sm:$0xff]  ;;  %v3051_v33 = vld [vmem:[%s5952_s0 + $0xd8] sm:$0xff]  ;;  %v3054_v36 = vld [vmem:[%s5952_s0 + $0x510] sm:$0xff] }
  0x5d   :  { %3041 = vst [vmem:[%s5954_s2 + $0x88] sm:$0xff] %v1146_v25  ;;  %v1176_v34 = vmul.f32 %v3049_v32, %v3048_v31  ;;  %v3052_v35 = vld [vmem:[%s5953_s1 + $0xd8] sm:$0xff]  ;;  %v3055_v37 = vld [vmem:[%s5953_s1 + $0x510] sm:$0xff]  ;;  %3044 = vst [vmem:[%s5954_s2 + $0x4c0] sm:$0xff] %v1156_v29 }
  0x5e   :  { %3047 = vst [vmem:[%s5954_s2 + $0xb0] sm:$0xff] %v1166_v30  ;;  %v1186_v38 = vmul.f32 %v3052_v35, %v3051_v33  ;;  %v1196_v39 = vmul.f32 %v3055_v37, %v3054_v36  ;;  %v3057_v40 = vld [vmem:[%s5952_s0 + $0x100] sm:$0xff]  ;;  %v3060_v42 = vld [vmem:[%s5952_s0 + $0x538] sm:$0xff]  ;;  %v3063_v45 = vld [vmem:[%s5952_s0 + $0x128] sm:$0xff] }
  0x5f   :  { %v3058_v41 = vld [vmem:[%s5953_s1 + $0x100] sm:$0xff]  ;;  %3050 = vst [vmem:[%s5954_s2 + $0x4e8] sm:$0xff] %v1176_v34  ;;  %v3061_v44 = vld [vmem:[%s5953_s1 + $0x538] sm:$0xff]  ;;  %v3064_v46 = vld [vmem:[%s5953_s1 + $0x128] sm:$0xff] }
  0x60   :  { %v1206_v43 = vmul.f32 %v3058_v41, %v3057_v40  ;;  %3053 = vst [vmem:[%s5954_s2 + $0xd8] sm:$0xff] %v1186_v38  ;;  %3056 = vst [vmem:[%s5954_s2 + $0x510] sm:$0xff] %v1196_v39  ;;  %v1216_v47 = vmul.f32 %v3061_v44, %v3060_v42  ;;  %v1226_v48 = vmul.f32 %v3064_v46, %v3063_v45  ;;  %v3066_v49 = vld [vmem:[%s5952_s0 + $0x560] sm:$0xff]  ;;  %v3069_v51 = vld [vmem:[%s5952_s0 + $0x150] sm:$0xff] }
  0x61   :  { %v3067_v50 = vld [vmem:[%s5953_s1 + $0x560] sm:$0xff]  ;;  %v3070_v53 = vld [vmem:[%s5953_s1 + $0x150] sm:$0xff]  ;;  %v3072_v54 = vld [vmem:[%s5952_s0 + $0x588] sm:$0xff] }
  0x62   :  { %3059 = vst [vmem:[%s5954_s2 + $0x100] sm:$0xff] %v1206_v43  ;;  %v1236_v52 = vmul.f32 %v3067_v50, %v3066_v49  ;;  %v3073_v55 = vld [vmem:[%s5953_s1 + $0x588] sm:$0xff]  ;;  %3062 = vst [vmem:[%s5954_s2 + $0x538] sm:$0xff] %v1216_v47  ;;  %v1246_v56 = vmul.f32 %v3070_v53, %v3069_v51  ;;  %v3075_v58 = vld [vmem:[%s5952_s0 + $0x178] sm:$0xff] }
  0x63   :  { %3065 = vst [vmem:[%s5954_s2 + $0x128] sm:$0xff] %v1226_v48  ;;  %v1256_v57 = vmul.f32 %v3073_v55, %v3072_v54  ;;  %v3076_v59 = vld [vmem:[%s5953_s1 + $0x178] sm:$0xff]  ;;  %v3078_v60 = vld [vmem:[%s5952_s0 + $0x5b0] sm:$0xff]  ;;  %v3081_v63 = vld [vmem:[%s5952_s0 + $0x1a0] sm:$0xff] }
  0x64   :  { %3068 = vst [vmem:[%s5954_s2 + $0x560] sm:$0xff] %v1236_v52  ;;  %v1266_v61 = vmul.f32 %v3076_v59, %v3075_v58  ;;  %v3079_v62 = vld [vmem:[%s5953_s1 + $0x5b0] sm:$0xff]  ;;  %v3082_v0 = vld [vmem:[%s5953_s1 + $0x1a0] sm:$0xff]  ;;  %3071 = vst [vmem:[%s5954_s2 + $0x150] sm:$0xff] %v1246_v56 }
  0x65   :  { %3074 = vst [vmem:[%s5954_s2 + $0x588] sm:$0xff] %v1256_v57  ;;  %v1276_v1 = vmul.f32 %v3079_v62, %v3078_v60  ;;  %v1286_v2 = vmul.f32 %v3082_v0, %v3081_v63  ;;  %v3084_v3 = vld [vmem:[%s5952_s0 + $0x5d8] sm:$0xff]  ;;  %v3087_v5 = vld [vmem:[%s5952_s0 + $0x1c8] sm:$0xff]  ;;  %v3090_v8 = vld [vmem:[%s5952_s0 + $0x600] sm:$0xff] }
  0x66   :  { %v3085_v4 = vld [vmem:[%s5953_s1 + $0x5d8] sm:$0xff]  ;;  %3077 = vst [vmem:[%s5954_s2 + $0x178] sm:$0xff] %v1266_v61  ;;  %v3088_v7 = vld [vmem:[%s5953_s1 + $0x1c8] sm:$0xff]  ;;  %v3091_v9 = vld [vmem:[%s5953_s1 + $0x600] sm:$0xff] }
  0x67   :  { %v1296_v6 = vmul.f32 %v3085_v4, %v3084_v3  ;;  %3080 = vst [vmem:[%s5954_s2 + $0x5b0] sm:$0xff] %v1276_v1  ;;  %3083 = vst [vmem:[%s5954_s2 + $0x1a0] sm:$0xff] %v1286_v2  ;;  %v1306_v10 = vmul.f32 %v3088_v7, %v3087_v5  ;;  %v1316_v11 = vmul.f32 %v3091_v9, %v3090_v8  ;;  %v3093_v12 = vld [vmem:[%s5952_s0 + $0x1f0] sm:$0xff]  ;;  %v3096_v14 = vld [vmem:[%s5952_s0 + $0x628] sm:$0xff] }
  0x68   :  { %v3094_v13 = vld [vmem:[%s5953_s1 + $0x1f0] sm:$0xff]  ;;  %v3097_v16 = vld [vmem:[%s5953_s1 + $0x628] sm:$0xff]  ;;  %v3099_v17 = vld [vmem:[%s5952_s0 + $0x218] sm:$0xff] }
  0x69   :  { %3086 = vst [vmem:[%s5954_s2 + $0x5d8] sm:$0xff] %v1296_v6  ;;  %v1326_v15 = vmul.f32 %v3094_v13, %v3093_v12  ;;  %v3100_v18 = vld [vmem:[%s5953_s1 + $0x218] sm:$0xff]  ;;  %3089 = vst [vmem:[%s5954_s2 + $0x1c8] sm:$0xff] %v1306_v10  ;;  %v1336_v19 = vmul.f32 %v3097_v16, %v3096_v14  ;;  %v3102_v21 = vld [vmem:[%s5952_s0 + $0x650] sm:$0xff] }
  0x6a   :  { %3092 = vst [vmem:[%s5954_s2 + $0x600] sm:$0xff] %v1316_v11  ;;  %v1346_v20 = vmul.f32 %v3100_v18, %v3099_v17  ;;  %v3103_v22 = vld [vmem:[%s5953_s1 + $0x650] sm:$0xff]  ;;  %v3105_v23 = vld [vmem:[%s5952_s0 + $0x240] sm:$0xff]  ;;  %v3108_v26 = vld [vmem:[%s5952_s0 + $0x678] sm:$0xff] }
  0x6b   :  { %3095 = vst [vmem:[%s5954_s2 + $0x1f0] sm:$0xff] %v1326_v15  ;;  %v1356_v24 = vmul.f32 %v3103_v22, %v3102_v21  ;;  %v3106_v25 = vld [vmem:[%s5953_s1 + $0x240] sm:$0xff]  ;;  %v3109_v27 = vld [vmem:[%s5953_s1 + $0x678] sm:$0xff]  ;;  %3098 = vst [vmem:[%s5954_s2 + $0x628] sm:$0xff] %v1336_v19 }
  0x6c   :  { %3101 = vst [vmem:[%s5954_s2 + $0x218] sm:$0xff] %v1346_v20  ;;  %v1366_v28 = vmul.f32 %v3106_v25, %v3105_v23  ;;  %v1376_v29 = vmul.f32 %v3109_v27, %v3108_v26  ;;  %v3111_v30 = vld [vmem:[%s5952_s0 + $0x268] sm:$0xff]  ;;  %v3114_v32 = vld [vmem:[%s5952_s0 + $0x6a0] sm:$0xff]  ;;  %v3117_v35 = vld [vmem:[%s5952_s0 + $0x290] sm:$0xff] }
  0x6d   :  { %v3112_v31 = vld [vmem:[%s5953_s1 + $0x268] sm:$0xff]  ;;  %3104 = vst [vmem:[%s5954_s2 + $0x650] sm:$0xff] %v1356_v24  ;;  %v3115_v34 = vld [vmem:[%s5953_s1 + $0x6a0] sm:$0xff]  ;;  %v3118_v36 = vld [vmem:[%s5953_s1 + $0x290] sm:$0xff] }
  0x6e   :  { %v1386_v33 = vmul.f32 %v3112_v31, %v3111_v30  ;;  %3107 = vst [vmem:[%s5954_s2 + $0x240] sm:$0xff] %v1366_v28  ;;  %3110 = vst [vmem:[%s5954_s2 + $0x678] sm:$0xff] %v1376_v29  ;;  %v1396_v37 = vmul.f32 %v3115_v34, %v3114_v32  ;;  %v1406_v38 = vmul.f32 %v3118_v36, %v3117_v35  ;;  %v3120_v39 = vld [vmem:[%s5952_s0 + $0x6c8] sm:$0xff]  ;;  %v3123_v41 = vld [vmem:[%s5952_s0 + $0x2b8] sm:$0xff] }
  0x6f   :  { %v3121_v40 = vld [vmem:[%s5953_s1 + $0x6c8] sm:$0xff]  ;;  %v3124_v43 = vld [vmem:[%s5953_s1 + $0x2b8] sm:$0xff]  ;;  %v3126_v44 = vld [vmem:[%s5952_s0 + $0x6f0] sm:$0xff] }
  0x70   :  { %3113 = vst [vmem:[%s5954_s2 + $0x268] sm:$0xff] %v1386_v33  ;;  %v1416_v42 = vmul.f32 %v3121_v40, %v3120_v39  ;;  %v3127_v45 = vld [vmem:[%s5953_s1 + $0x6f0] sm:$0xff]  ;;  %3116 = vst [vmem:[%s5954_s2 + $0x6a0] sm:$0xff] %v1396_v37  ;;  %v1426_v46 = vmul.f32 %v3124_v43, %v3123_v41  ;;  %v3129_v48 = vld [vmem:[%s5952_s0 + $0x2e0] sm:$0xff] }
  0x71   :  { %3119 = vst [vmem:[%s5954_s2 + $0x290] sm:$0xff] %v1406_v38  ;;  %v1436_v47 = vmul.f32 %v3127_v45, %v3126_v44  ;;  %v3130_v49 = vld [vmem:[%s5953_s1 + $0x2e0] sm:$0xff]  ;;  %v3132_v50 = vld [vmem:[%s5952_s0 + $0x718] sm:$0xff]  ;;  %v3135_v53 = vld [vmem:[%s5952_s0 + $0x308] sm:$0xff] }
  0x72   :  { %3122 = vst [vmem:[%s5954_s2 + $0x6c8] sm:$0xff] %v1416_v42  ;;  %v1446_v51 = vmul.f32 %v3130_v49, %v3129_v48  ;;  %v3133_v52 = vld [vmem:[%s5953_s1 + $0x718] sm:$0xff]  ;;  %v3136_v54 = vld [vmem:[%s5953_s1 + $0x308] sm:$0xff]  ;;  %3125 = vst [vmem:[%s5954_s2 + $0x2b8] sm:$0xff] %v1426_v46 }
  0x73   :  { %3128 = vst [vmem:[%s5954_s2 + $0x6f0] sm:$0xff] %v1436_v47  ;;  %v1456_v55 = vmul.f32 %v3133_v52, %v3132_v50  ;;  %v1466_v56 = vmul.f32 %v3136_v54, %v3135_v53  ;;  %v3138_v57 = vld [vmem:[%s5952_s0 + $0x740] sm:$0xff]  ;;  %v3141_v59 = vld [vmem:[%s5952_s0 + $0x330] sm:$0xff]  ;;  %v3144_v62 = vld [vmem:[%s5952_s0 + $0x768] sm:$0xff] }
  0x74   :  { %v3139_v58 = vld [vmem:[%s5953_s1 + $0x740] sm:$0xff]  ;;  %3131 = vst [vmem:[%s5954_s2 + $0x2e0] sm:$0xff] %v1446_v51  ;;  %v3142_v61 = vld [vmem:[%s5953_s1 + $0x330] sm:$0xff]  ;;  %v3145_v63 = vld [vmem:[%s5953_s1 + $0x768] sm:$0xff] }
  0x75   :  { %v1476_v60 = vmul.f32 %v3139_v58, %v3138_v57  ;;  %3134 = vst [vmem:[%s5954_s2 + $0x718] sm:$0xff] %v1456_v55  ;;  %3137 = vst [vmem:[%s5954_s2 + $0x308] sm:$0xff] %v1466_v56  ;;  %v1486_v0 = vmul.f32 %v3142_v61, %v3141_v59  ;;  %v1496_v1 = vmul.f32 %v3145_v63, %v3144_v62  ;;  %v3147_v2 = vld [vmem:[%s5952_s0 + $0x358] sm:$0xff]  ;;  %v3150_v4 = vld [vmem:[%s5952_s0 + $0x790] sm:$0xff] }
  0x76   :  { %v3148_v3 = vld [vmem:[%s5953_s1 + $0x358] sm:$0xff]  ;;  %v3151_v6 = vld [vmem:[%s5953_s1 + $0x790] sm:$0xff]  ;;  %v3153_v7 = vld [vmem:[%s5952_s0 + $0x380] sm:$0xff] }
  0x77   :  { %3140 = vst [vmem:[%s5954_s2 + $0x740] sm:$0xff] %v1476_v60  ;;  %v1506_v5 = vmul.f32 %v3148_v3, %v3147_v2  ;;  %v3154_v8 = vld [vmem:[%s5953_s1 + $0x380] sm:$0xff]  ;;  %3143 = vst [vmem:[%s5954_s2 + $0x330] sm:$0xff] %v1486_v0  ;;  %v1516_v9 = vmul.f32 %v3151_v6, %v3150_v4  ;;  %v3156_v11 = vld [vmem:[%s5952_s0 + $0x7b8] sm:$0xff] }
  0x78   :  { %3146 = vst [vmem:[%s5954_s2 + $0x768] sm:$0xff] %v1496_v1  ;;  %v1526_v10 = vmul.f32 %v3154_v8, %v3153_v7  ;;  %v3157_v12 = vld [vmem:[%s5953_s1 + $0x7b8] sm:$0xff]  ;;  %v3159_v13 = vld [vmem:[%s5952_s0 + $0x3a8] sm:$0xff]  ;;  %v3162_v16 = vld [vmem:[%s5952_s0 + $0x7e0] sm:$0xff] }
  0x79   :  { %3149 = vst [vmem:[%s5954_s2 + $0x358] sm:$0xff] %v1506_v5  ;;  %v1536_v14 = vmul.f32 %v3157_v12, %v3156_v11  ;;  %v3160_v15 = vld [vmem:[%s5953_s1 + $0x3a8] sm:$0xff]  ;;  %v3163_v17 = vld [vmem:[%s5953_s1 + $0x7e0] sm:$0xff]  ;;  %3152 = vst [vmem:[%s5954_s2 + $0x790] sm:$0xff] %v1516_v9 }
  0x7a   :  { %3155 = vst [vmem:[%s5954_s2 + $0x380] sm:$0xff] %v1526_v10  ;;  %v1546_v18 = vmul.f32 %v3160_v15, %v3159_v13  ;;  %v1556_v19 = vmul.f32 %v3163_v17, %v3162_v16  ;;  %v3165_v20 = vld [vmem:[%s5952_s0 + $0x3d0] sm:$0xff]  ;;  %v3168_v22 = vld [vmem:[%s5952_s0 + $0x808] sm:$0xff]  ;;  %v3171_v25 = vld [vmem:[%s5952_s0 + $0x3f8] sm:$0xff] }
  0x7b   :  { %v3166_v21 = vld [vmem:[%s5953_s1 + $0x3d0] sm:$0xff]  ;;  %3158 = vst [vmem:[%s5954_s2 + $0x7b8] sm:$0xff] %v1536_v14  ;;  %v3169_v24 = vld [vmem:[%s5953_s1 + $0x808] sm:$0xff]  ;;  %v3172_v26 = vld [vmem:[%s5953_s1 + $0x3f8] sm:$0xff] }
  0x7c   :  { %v1566_v23 = vmul.f32 %v3166_v21, %v3165_v20  ;;  %3161 = vst [vmem:[%s5954_s2 + $0x3a8] sm:$0xff] %v1546_v18  ;;  %3164 = vst [vmem:[%s5954_s2 + $0x7e0] sm:$0xff] %v1556_v19  ;;  %v1576_v27 = vmul.f32 %v3169_v24, %v3168_v22  ;;  %v1586_v28 = vmul.f32 %v3172_v26, %v3171_v25  ;;  %v3174_v29 = vld [vmem:[%s5952_s0 + $0x830] sm:$0xff]  ;;  %v3177_v31 = vld [vmem:[%s5952_s0 + $0x420] sm:$0xff] }
  0x7d   :  { %v3175_v30 = vld [vmem:[%s5953_s1 + $0x830] sm:$0xff]  ;;  %v3178_v33 = vld [vmem:[%s5953_s1 + $0x420] sm:$0xff]  ;;  %v3180_v34 = vld [vmem:[%s5952_s0 + $0x858] sm:$0xff] }
  0x7e   :  { %3167 = vst [vmem:[%s5954_s2 + $0x3d0] sm:$0xff] %v1566_v23  ;;  %v1596_v32 = vmul.f32 %v3175_v30, %v3174_v29  ;;  %v3181_v35 = vld [vmem:[%s5953_s1 + $0x858] sm:$0xff]  ;;  %3170 = vst [vmem:[%s5954_s2 + $0x808] sm:$0xff] %v1576_v27  ;;  %v1606_v36 = vmul.f32 %v3178_v33, %v3177_v31  ;;  %v3186_v40 = vld [vmem:[%s5952_s0 + $0x450] sm:$0xff] }
  0x7f   :  { %3173 = vst [vmem:[%s5954_s2 + $0x3f8] sm:$0xff] %v1586_v28  ;;  %v1616_v37 = vmul.f32 %v3181_v35, %v3180_v34  ;;  %v3183_v38 = vld [vmem:[%s5952_s0 + $0x18] sm:$0xff]  ;;  %v3187_v42 = vld [vmem:[%s5953_s1 + $0x450] sm:$0xff]  ;;  %v3189_v43 = vld [vmem:[%s5952_s0 + $0x40] sm:$0xff] }
  0x80   :  { %v3184_v39 = vld [vmem:[%s5953_s1 + $0x18] sm:$0xff]  ;;  %3176 = vst [vmem:[%s5954_s2 + $0x830] sm:$0xff] %v1596_v32  ;;  %v3190_v44 = vld [vmem:[%s5953_s1 + $0x40] sm:$0xff]  ;;  %3179 = vst [vmem:[%s5954_s2 + $0x420] sm:$0xff] %v1606_v36  ;;  %v1636_v45 = vmul.f32 %v3187_v42, %v3186_v40 }
  0x81   :  { %v1626_v41 = vmul.f32 %v3184_v39, %v3183_v38  ;;  %3182 = vst [vmem:[%s5954_s2 + $0x858] sm:$0xff] %v1616_v37  ;;  %v1646_v46 = vmul.f32 %v3190_v44, %v3189_v43  ;;  %v3192_v47 = vld [vmem:[%s5952_s0 + $0x478] sm:$0xff]  ;;  %v3195_v49 = vld [vmem:[%s5952_s0 + $0x68] sm:$0xff]  ;;  %v3198_v52 = vld [vmem:[%s5952_s0 + $0x4a0] sm:$0xff] }
  0x82   :  { %v3193_v48 = vld [vmem:[%s5953_s1 + $0x478] sm:$0xff]  ;;  %v3196_v51 = vld [vmem:[%s5953_s1 + $0x68] sm:$0xff]  ;;  %v3199_v53 = vld [vmem:[%s5953_s1 + $0x4a0] sm:$0xff]  ;;  %3188 = vst [vmem:[%s5954_s2 + $0x450] sm:$0xff] %v1636_v45 }
  0x83   :  { %3185 = vst [vmem:[%s5954_s2 + $0x18] sm:$0xff] %v1626_v41  ;;  %v1656_v50 = vmul.f32 %v3193_v48, %v3192_v47  ;;  %3191 = vst [vmem:[%s5954_s2 + $0x40] sm:$0xff] %v1646_v46  ;;  %v1666_v54 = vmul.f32 %v3196_v51, %v3195_v49  ;;  %v1676_v55 = vmul.f32 %v3199_v53, %v3198_v52  ;;  %v3201_v56 = vld [vmem:[%s5952_s0 + $0x90] sm:$0xff]  ;;  %v3204_v58 = vld [vmem:[%s5952_s0 + $0x4c8] sm:$0xff] }
  0x84   :  { %v3202_v57 = vld [vmem:[%s5953_s1 + $0x90] sm:$0xff]  ;;  %v3205_v60 = vld [vmem:[%s5953_s1 + $0x4c8] sm:$0xff]  ;;  %v3207_v61 = vld [vmem:[%s5952_s0 + $0xb8] sm:$0xff] }
  0x85   :  { %3194 = vst [vmem:[%s5954_s2 + $0x478] sm:$0xff] %v1656_v50  ;;  %v1686_v59 = vmul.f32 %v3202_v57, %v3201_v56  ;;  %v3208_v62 = vld [vmem:[%s5953_s1 + $0xb8] sm:$0xff]  ;;  %3197 = vst [vmem:[%s5954_s2 + $0x68] sm:$0xff] %v1666_v54  ;;  %v1696_v63 = vmul.f32 %v3205_v60, %v3204_v58  ;;  %v3210_v1 = vld [vmem:[%s5952_s0 + $0x4f0] sm:$0xff] }
  0x86   :  { %3200 = vst [vmem:[%s5954_s2 + $0x4a0] sm:$0xff] %v1676_v55  ;;  %v1706_v0 = vmul.f32 %v3208_v62, %v3207_v61  ;;  %v3211_v2 = vld [vmem:[%s5953_s1 + $0x4f0] sm:$0xff]  ;;  %v3213_v3 = vld [vmem:[%s5952_s0 + $0xe0] sm:$0xff]  ;;  %v3216_v6 = vld [vmem:[%s5952_s0 + $0x518] sm:$0xff] }
  0x87   :  { %3203 = vst [vmem:[%s5954_s2 + $0x90] sm:$0xff] %v1686_v59  ;;  %v1716_v4 = vmul.f32 %v3211_v2, %v3210_v1  ;;  %v3214_v5 = vld [vmem:[%s5953_s1 + $0xe0] sm:$0xff]  ;;  %v3217_v7 = vld [vmem:[%s5953_s1 + $0x518] sm:$0xff]  ;;  %3206 = vst [vmem:[%s5954_s2 + $0x4c8] sm:$0xff] %v1696_v63 }
  0x88   :  { %3209 = vst [vmem:[%s5954_s2 + $0xb8] sm:$0xff] %v1706_v0  ;;  %v1726_v8 = vmul.f32 %v3214_v5, %v3213_v3  ;;  %v1736_v9 = vmul.f32 %v3217_v7, %v3216_v6  ;;  %v3219_v10 = vld [vmem:[%s5952_s0 + $0x108] sm:$0xff]  ;;  %v3222_v12 = vld [vmem:[%s5952_s0 + $0x540] sm:$0xff]  ;;  %v3225_v15 = vld [vmem:[%s5952_s0 + $0x130] sm:$0xff] }
  0x89   :  { %v3220_v11 = vld [vmem:[%s5953_s1 + $0x108] sm:$0xff]  ;;  %3212 = vst [vmem:[%s5954_s2 + $0x4f0] sm:$0xff] %v1716_v4  ;;  %v3223_v14 = vld [vmem:[%s5953_s1 + $0x540] sm:$0xff]  ;;  %v3226_v16 = vld [vmem:[%s5953_s1 + $0x130] sm:$0xff] }
  0x8a   :  { %v1746_v13 = vmul.f32 %v3220_v11, %v3219_v10  ;;  %3215 = vst [vmem:[%s5954_s2 + $0xe0] sm:$0xff] %v1726_v8  ;;  %3218 = vst [vmem:[%s5954_s2 + $0x518] sm:$0xff] %v1736_v9  ;;  %v1756_v17 = vmul.f32 %v3223_v14, %v3222_v12  ;;  %v1766_v18 = vmul.f32 %v3226_v16, %v3225_v15  ;;  %v3228_v19 = vld [vmem:[%s5952_s0 + $0x568] sm:$0xff]  ;;  %v3231_v21 = vld [vmem:[%s5952_s0 + $0x158] sm:$0xff] }
  0x8b   :  { %v3229_v20 = vld [vmem:[%s5953_s1 + $0x568] sm:$0xff]  ;;  %v3232_v23 = vld [vmem:[%s5953_s1 + $0x158] sm:$0xff]  ;;  %v3234_v24 = vld [vmem:[%s5952_s0 + $0x590] sm:$0xff] }
  0x8c   :  { %3221 = vst [vmem:[%s5954_s2 + $0x108] sm:$0xff] %v1746_v13  ;;  %v1776_v22 = vmul.f32 %v3229_v20, %v3228_v19  ;;  %v3235_v25 = vld [vmem:[%s5953_s1 + $0x590] sm:$0xff]  ;;  %3224 = vst [vmem:[%s5954_s2 + $0x540] sm:$0xff] %v1756_v17  ;;  %v1786_v26 = vmul.f32 %v3232_v23, %v3231_v21  ;;  %v3237_v28 = vld [vmem:[%s5952_s0 + $0x180] sm:$0xff] }
  0x8d   :  { %3227 = vst [vmem:[%s5954_s2 + $0x130] sm:$0xff] %v1766_v18  ;;  %v1796_v27 = vmul.f32 %v3235_v25, %v3234_v24  ;;  %v3238_v29 = vld [vmem:[%s5953_s1 + $0x180] sm:$0xff]  ;;  %v3240_v30 = vld [vmem:[%s5952_s0 + $0x5b8] sm:$0xff]  ;;  %v3243_v33 = vld [vmem:[%s5952_s0 + $0x1a8] sm:$0xff] }
  0x8e   :  { %3230 = vst [vmem:[%s5954_s2 + $0x568] sm:$0xff] %v1776_v22  ;;  %v1806_v31 = vmul.f32 %v3238_v29, %v3237_v28  ;;  %v3241_v32 = vld [vmem:[%s5953_s1 + $0x5b8] sm:$0xff]  ;;  %v3244_v34 = vld [vmem:[%s5953_s1 + $0x1a8] sm:$0xff]  ;;  %3233 = vst [vmem:[%s5954_s2 + $0x158] sm:$0xff] %v1786_v26 }
  0x8f   :  { %3236 = vst [vmem:[%s5954_s2 + $0x590] sm:$0xff] %v1796_v27  ;;  %v1816_v35 = vmul.f32 %v3241_v32, %v3240_v30  ;;  %v1826_v36 = vmul.f32 %v3244_v34, %v3243_v33  ;;  %v3246_v37 = vld [vmem:[%s5952_s0 + $0x5e0] sm:$0xff]  ;;  %v3249_v39 = vld [vmem:[%s5952_s0 + $0x1d0] sm:$0xff]  ;;  %v3252_v42 = vld [vmem:[%s5952_s0 + $0x608] sm:$0xff] }
  0x90   :  { %v3247_v38 = vld [vmem:[%s5953_s1 + $0x5e0] sm:$0xff]  ;;  %3239 = vst [vmem:[%s5954_s2 + $0x180] sm:$0xff] %v1806_v31  ;;  %v3250_v41 = vld [vmem:[%s5953_s1 + $0x1d0] sm:$0xff]  ;;  %v3253_v43 = vld [vmem:[%s5953_s1 + $0x608] sm:$0xff] }
  0x91   :  { %v1836_v40 = vmul.f32 %v3247_v38, %v3246_v37  ;;  %3242 = vst [vmem:[%s5954_s2 + $0x5b8] sm:$0xff] %v1816_v35  ;;  %3245 = vst [vmem:[%s5954_s2 + $0x1a8] sm:$0xff] %v1826_v36  ;;  %v1846_v44 = vmul.f32 %v3250_v41, %v3249_v39  ;;  %v1856_v45 = vmul.f32 %v3253_v43, %v3252_v42  ;;  %v3255_v46 = vld [vmem:[%s5952_s0 + $0x1f8] sm:$0xff]  ;;  %v3258_v48 = vld [vmem:[%s5952_s0 + $0x630] sm:$0xff] }
  0x92   :  { %v3256_v47 = vld [vmem:[%s5953_s1 + $0x1f8] sm:$0xff]  ;;  %v3259_v50 = vld [vmem:[%s5953_s1 + $0x630] sm:$0xff]  ;;  %v3261_v51 = vld [vmem:[%s5952_s0 + $0x220] sm:$0xff] }
  0x93   :  { %3248 = vst [vmem:[%s5954_s2 + $0x5e0] sm:$0xff] %v1836_v40  ;;  %v1866_v49 = vmul.f32 %v3256_v47, %v3255_v46  ;;  %v3262_v52 = vld [vmem:[%s5953_s1 + $0x220] sm:$0xff]  ;;  %3251 = vst [vmem:[%s5954_s2 + $0x1d0] sm:$0xff] %v1846_v44  ;;  %v1876_v53 = vmul.f32 %v3259_v50, %v3258_v48  ;;  %v3264_v55 = vld [vmem:[%s5952_s0 + $0x658] sm:$0xff] }
  0x94   :  { %3254 = vst [vmem:[%s5954_s2 + $0x608] sm:$0xff] %v1856_v45  ;;  %v1886_v54 = vmul.f32 %v3262_v52, %v3261_v51  ;;  %v3265_v56 = vld [vmem:[%s5953_s1 + $0x658] sm:$0xff]  ;;  %v3267_v57 = vld [vmem:[%s5952_s0 + $0x248] sm:$0xff]  ;;  %v3270_v60 = vld [vmem:[%s5952_s0 + $0x680] sm:$0xff] }
  0x95   :  { %3257 = vst [vmem:[%s5954_s2 + $0x1f8] sm:$0xff] %v1866_v49  ;;  %v1896_v58 = vmul.f32 %v3265_v56, %v3264_v55  ;;  %v3268_v59 = vld [vmem:[%s5953_s1 + $0x248] sm:$0xff]  ;;  %v3271_v61 = vld [vmem:[%s5953_s1 + $0x680] sm:$0xff]  ;;  %3260 = vst [vmem:[%s5954_s2 + $0x630] sm:$0xff] %v1876_v53 }
  0x96   :  { %3263 = vst [vmem:[%s5954_s2 + $0x220] sm:$0xff] %v1886_v54  ;;  %v1906_v62 = vmul.f32 %v3268_v59, %v3267_v57  ;;  %v1916_v63 = vmul.f32 %v3271_v61, %v3270_v60  ;;  %v3273_v0 = vld [vmem:[%s5952_s0 + $0x270] sm:$0xff]  ;;  %v3276_v2 = vld [vmem:[%s5952_s0 + $0x6a8] sm:$0xff]  ;;  %v3279_v5 = vld [vmem:[%s5952_s0 + $0x298] sm:$0xff] }
  0x97   :  { %v3274_v1 = vld [vmem:[%s5953_s1 + $0x270] sm:$0xff]  ;;  %3266 = vst [vmem:[%s5954_s2 + $0x658] sm:$0xff] %v1896_v58  ;;  %v3277_v4 = vld [vmem:[%s5953_s1 + $0x6a8] sm:$0xff]  ;;  %v3280_v6 = vld [vmem:[%s5953_s1 + $0x298] sm:$0xff] }
  0x98   :  { %v1926_v3 = vmul.f32 %v3274_v1, %v3273_v0  ;;  %3269 = vst [vmem:[%s5954_s2 + $0x248] sm:$0xff] %v1906_v62  ;;  %3272 = vst [vmem:[%s5954_s2 + $0x680] sm:$0xff] %v1916_v63  ;;  %v1936_v7 = vmul.f32 %v3277_v4, %v3276_v2  ;;  %v1946_v8 = vmul.f32 %v3280_v6, %v3279_v5  ;;  %v3282_v9 = vld [vmem:[%s5952_s0 + $0x6d0] sm:$0xff]  ;;  %v3285_v11 = vld [vmem:[%s5952_s0 + $0x2c0] sm:$0xff] }
  0x99   :  { %v3283_v10 = vld [vmem:[%s5953_s1 + $0x6d0] sm:$0xff]  ;;  %v3286_v13 = vld [vmem:[%s5953_s1 + $0x2c0] sm:$0xff]  ;;  %v3288_v14 = vld [vmem:[%s5952_s0 + $0x6f8] sm:$0xff] }
  0x9a   :  { %3275 = vst [vmem:[%s5954_s2 + $0x270] sm:$0xff] %v1926_v3  ;;  %v1956_v12 = vmul.f32 %v3283_v10, %v3282_v9  ;;  %v3289_v15 = vld [vmem:[%s5953_s1 + $0x6f8] sm:$0xff]  ;;  %3278 = vst [vmem:[%s5954_s2 + $0x6a8] sm:$0xff] %v1936_v7  ;;  %v1966_v16 = vmul.f32 %v3286_v13, %v3285_v11  ;;  %v3291_v18 = vld [vmem:[%s5952_s0 + $0x2e8] sm:$0xff] }
  0x9b   :  { %3281 = vst [vmem:[%s5954_s2 + $0x298] sm:$0xff] %v1946_v8  ;;  %v1976_v17 = vmul.f32 %v3289_v15, %v3288_v14  ;;  %v3292_v19 = vld [vmem:[%s5953_s1 + $0x2e8] sm:$0xff]  ;;  %v3294_v20 = vld [vmem:[%s5952_s0 + $0x720] sm:$0xff]  ;;  %v3297_v23 = vld [vmem:[%s5952_s0 + $0x310] sm:$0xff] }
  0x9c   :  { %3284 = vst [vmem:[%s5954_s2 + $0x6d0] sm:$0xff] %v1956_v12  ;;  %v1986_v21 = vmul.f32 %v3292_v19, %v3291_v18  ;;  %v3295_v22 = vld [vmem:[%s5953_s1 + $0x720] sm:$0xff]  ;;  %v3298_v24 = vld [vmem:[%s5953_s1 + $0x310] sm:$0xff]  ;;  %3287 = vst [vmem:[%s5954_s2 + $0x2c0] sm:$0xff] %v1966_v16 }
  0x9d   :  { %3290 = vst [vmem:[%s5954_s2 + $0x6f8] sm:$0xff] %v1976_v17  ;;  %v1996_v25 = vmul.f32 %v3295_v22, %v3294_v20  ;;  %v2006_v26 = vmul.f32 %v3298_v24, %v3297_v23  ;;  %v3300_v27 = vld [vmem:[%s5952_s0 + $0x748] sm:$0xff]  ;;  %v3303_v29 = vld [vmem:[%s5952_s0 + $0x338] sm:$0xff]  ;;  %v3306_v32 = vld [vmem:[%s5952_s0 + $0x770] sm:$0xff] }
  0x9e   :  { %v3301_v28 = vld [vmem:[%s5953_s1 + $0x748] sm:$0xff]  ;;  %3293 = vst [vmem:[%s5954_s2 + $0x2e8] sm:$0xff] %v1986_v21  ;;  %v3304_v31 = vld [vmem:[%s5953_s1 + $0x338] sm:$0xff]  ;;  %v3307_v33 = vld [vmem:[%s5953_s1 + $0x770] sm:$0xff] }
  0x9f   :  { %v2016_v30 = vmul.f32 %v3301_v28, %v3300_v27  ;;  %3296 = vst [vmem:[%s5954_s2 + $0x720] sm:$0xff] %v1996_v25  ;;  %3299 = vst [vmem:[%s5954_s2 + $0x310] sm:$0xff] %v2006_v26  ;;  %v2026_v34 = vmul.f32 %v3304_v31, %v3303_v29  ;;  %v2036_v35 = vmul.f32 %v3307_v33, %v3306_v32  ;;  %v3309_v36 = vld [vmem:[%s5952_s0 + $0x360] sm:$0xff]  ;;  %v3312_v38 = vld [vmem:[%s5952_s0 + $0x798] sm:$0xff] }
  0xa0   :  { %v3310_v37 = vld [vmem:[%s5953_s1 + $0x360] sm:$0xff]  ;;  %v3313_v40 = vld [vmem:[%s5953_s1 + $0x798] sm:$0xff]  ;;  %v3315_v41 = vld [vmem:[%s5952_s0 + $0x388] sm:$0xff] }
  0xa1   :  { %3302 = vst [vmem:[%s5954_s2 + $0x748] sm:$0xff] %v2016_v30  ;;  %v2046_v39 = vmul.f32 %v3310_v37, %v3309_v36  ;;  %v3316_v42 = vld [vmem:[%s5953_s1 + $0x388] sm:$0xff]  ;;  %3305 = vst [vmem:[%s5954_s2 + $0x338] sm:$0xff] %v2026_v34  ;;  %v2056_v43 = vmul.f32 %v3313_v40, %v3312_v38  ;;  %v3318_v45 = vld [vmem:[%s5952_s0 + $0x7c0] sm:$0xff] }
  0xa2   :  { %3308 = vst [vmem:[%s5954_s2 + $0x770] sm:$0xff] %v2036_v35  ;;  %v2066_v44 = vmul.f32 %v3316_v42, %v3315_v41  ;;  %v3319_v46 = vld [vmem:[%s5953_s1 + $0x7c0] sm:$0xff]  ;;  %v3321_v47 = vld [vmem:[%s5952_s0 + $0x3b0] sm:$0xff]  ;;  %v3324_v50 = vld [vmem:[%s5952_s0 + $0x7e8] sm:$0xff] }
  0xa3   :  { %3311 = vst [vmem:[%s5954_s2 + $0x360] sm:$0xff] %v2046_v39  ;;  %v2076_v48 = vmul.f32 %v3319_v46, %v3318_v45  ;;  %v3322_v49 = vld [vmem:[%s5953_s1 + $0x3b0] sm:$0xff]  ;;  %v3325_v51 = vld [vmem:[%s5953_s1 + $0x7e8] sm:$0xff]  ;;  %3314 = vst [vmem:[%s5954_s2 + $0x798] sm:$0xff] %v2056_v43 }
  0xa4   :  { %3317 = vst [vmem:[%s5954_s2 + $0x388] sm:$0xff] %v2066_v44  ;;  %v2086_v52 = vmul.f32 %v3322_v49, %v3321_v47  ;;  %v2096_v53 = vmul.f32 %v3325_v51, %v3324_v50  ;;  %v3327_v54 = vld [vmem:[%s5952_s0 + $0x3d8] sm:$0xff]  ;;  %v3330_v56 = vld [vmem:[%s5952_s0 + $0x810] sm:$0xff]  ;;  %v3333_v59 = vld [vmem:[%s5952_s0 + $0x400] sm:$0xff] }
  0xa5   :  { %v3328_v55 = vld [vmem:[%s5953_s1 + $0x3d8] sm:$0xff]  ;;  %3320 = vst [vmem:[%s5954_s2 + $0x7c0] sm:$0xff] %v2076_v48  ;;  %v3331_v58 = vld [vmem:[%s5953_s1 + $0x810] sm:$0xff]  ;;  %v3334_v60 = vld [vmem:[%s5953_s1 + $0x400] sm:$0xff] }
  0xa6   :  { %v2106_v57 = vmul.f32 %v3328_v55, %v3327_v54  ;;  %3323 = vst [vmem:[%s5954_s2 + $0x3b0] sm:$0xff] %v2086_v52  ;;  %3326 = vst [vmem:[%s5954_s2 + $0x7e8] sm:$0xff] %v2096_v53  ;;  %v2116_v61 = vmul.f32 %v3331_v58, %v3330_v56  ;;  %v2126_v62 = vmul.f32 %v3334_v60, %v3333_v59  ;;  %v3336_v63 = vld [vmem:[%s5952_s0 + $0x838] sm:$0xff]  ;;  %v3339_v1 = vld [vmem:[%s5952_s0 + $0x428] sm:$0xff] }
  0xa7   :  { %v3337_v0 = vld [vmem:[%s5953_s1 + $0x838] sm:$0xff]  ;;  %v3340_v3 = vld [vmem:[%s5953_s1 + $0x428] sm:$0xff]  ;;  %v3342_v4 = vld [vmem:[%s5952_s0 + $0x860] sm:$0xff] }
  0xa8   :  { %3329 = vst [vmem:[%s5954_s2 + $0x3d8] sm:$0xff] %v2106_v57  ;;  %v2136_v2 = vmul.f32 %v3337_v0, %v3336_v63  ;;  %v3343_v5 = vld [vmem:[%s5953_s1 + $0x860] sm:$0xff]  ;;  %3332 = vst [vmem:[%s5954_s2 + $0x810] sm:$0xff] %v2116_v61  ;;  %v2146_v6 = vmul.f32 %v3340_v3, %v3339_v1  ;;  %v3348_v10 = vld [vmem:[%s5952_s0 + $0x458] sm:$0xff] }
  0xa9   :  { %3335 = vst [vmem:[%s5954_s2 + $0x400] sm:$0xff] %v2126_v62  ;;  %v2156_v7 = vmul.f32 %v3343_v5, %v3342_v4  ;;  %v3345_v8 = vld [vmem:[%s5952_s0 + $0x20] sm:$0xff]  ;;  %v3349_v12 = vld [vmem:[%s5953_s1 + $0x458] sm:$0xff]  ;;  %v3351_v13 = vld [vmem:[%s5952_s0 + $0x48] sm:$0xff] }
  0xaa   :  { %v3346_v9 = vld [vmem:[%s5953_s1 + $0x20] sm:$0xff]  ;;  %3338 = vst [vmem:[%s5954_s2 + $0x838] sm:$0xff] %v2136_v2  ;;  %v3352_v14 = vld [vmem:[%s5953_s1 + $0x48] sm:$0xff]  ;;  %3341 = vst [vmem:[%s5954_s2 + $0x428] sm:$0xff] %v2146_v6  ;;  %v2176_v15 = vmul.f32 %v3349_v12, %v3348_v10 }
  0xab   :  { %v2166_v11 = vmul.f32 %v3346_v9, %v3345_v8  ;;  %3344 = vst [vmem:[%s5954_s2 + $0x860] sm:$0xff] %v2156_v7  ;;  %v2186_v16 = vmul.f32 %v3352_v14, %v3351_v13  ;;  %v3354_v17 = vld [vmem:[%s5952_s0 + $0x480] sm:$0xff]  ;;  %v3357_v19 = vld [vmem:[%s5952_s0 + $0x70] sm:$0xff]  ;;  %v3360_v22 = vld [vmem:[%s5952_s0 + $0x4a8] sm:$0xff] }
  0xac   :  { %v3355_v18 = vld [vmem:[%s5953_s1 + $0x480] sm:$0xff]  ;;  %v3358_v21 = vld [vmem:[%s5953_s1 + $0x70] sm:$0xff]  ;;  %v3361_v23 = vld [vmem:[%s5953_s1 + $0x4a8] sm:$0xff]  ;;  %3350 = vst [vmem:[%s5954_s2 + $0x458] sm:$0xff] %v2176_v15 }
  0xad   :  { %3347 = vst [vmem:[%s5954_s2 + $0x20] sm:$0xff] %v2166_v11  ;;  %v2196_v20 = vmul.f32 %v3355_v18, %v3354_v17  ;;  %3353 = vst [vmem:[%s5954_s2 + $0x48] sm:$0xff] %v2186_v16  ;;  %v2206_v24 = vmul.f32 %v3358_v21, %v3357_v19  ;;  %v2216_v25 = vmul.f32 %v3361_v23, %v3360_v22  ;;  %v3363_v26 = vld [vmem:[%s5952_s0 + $0x98] sm:$0xff]  ;;  %v3366_v28 = vld [vmem:[%s5952_s0 + $0x4d0] sm:$0xff] }
  0xae   :  { %v3364_v27 = vld [vmem:[%s5953_s1 + $0x98] sm:$0xff]  ;;  %v3367_v30 = vld [vmem:[%s5953_s1 + $0x4d0] sm:$0xff]  ;;  %v3369_v31 = vld [vmem:[%s5952_s0 + $0xc0] sm:$0xff] }
  0xaf   :  { %3356 = vst [vmem:[%s5954_s2 + $0x480] sm:$0xff] %v2196_v20  ;;  %v2226_v29 = vmul.f32 %v3364_v27, %v3363_v26  ;;  %v3370_v32 = vld [vmem:[%s5953_s1 + $0xc0] sm:$0xff]  ;;  %3359 = vst [vmem:[%s5954_s2 + $0x70] sm:$0xff] %v2206_v24  ;;  %v2236_v33 = vmul.f32 %v3367_v30, %v3366_v28  ;;  %v3372_v35 = vld [vmem:[%s5952_s0 + $0x4f8] sm:$0xff] }
  0xb0   :  { %3362 = vst [vmem:[%s5954_s2 + $0x4a8] sm:$0xff] %v2216_v25  ;;  %v2246_v34 = vmul.f32 %v3370_v32, %v3369_v31  ;;  %v3373_v36 = vld [vmem:[%s5953_s1 + $0x4f8] sm:$0xff]  ;;  %v3375_v37 = vld [vmem:[%s5952_s0 + $0xe8] sm:$0xff]  ;;  %v3378_v40 = vld [vmem:[%s5952_s0 + $0x520] sm:$0xff] }
  0xb1   :  { %3365 = vst [vmem:[%s5954_s2 + $0x98] sm:$0xff] %v2226_v29  ;;  %v2256_v38 = vmul.f32 %v3373_v36, %v3372_v35  ;;  %v3376_v39 = vld [vmem:[%s5953_s1 + $0xe8] sm:$0xff]  ;;  %v3379_v41 = vld [vmem:[%s5953_s1 + $0x520] sm:$0xff]  ;;  %3368 = vst [vmem:[%s5954_s2 + $0x4d0] sm:$0xff] %v2236_v33 }
  0xb2   :  { %3371 = vst [vmem:[%s5954_s2 + $0xc0] sm:$0xff] %v2246_v34  ;;  %v2266_v42 = vmul.f32 %v3376_v39, %v3375_v37  ;;  %v2276_v43 = vmul.f32 %v3379_v41, %v3378_v40  ;;  %v3381_v44 = vld [vmem:[%s5952_s0 + $0x110] sm:$0xff]  ;;  %v3384_v46 = vld [vmem:[%s5952_s0 + $0x548] sm:$0xff]  ;;  %v3387_v49 = vld [vmem:[%s5952_s0 + $0x138] sm:$0xff] }
  0xb3   :  { %v3382_v45 = vld [vmem:[%s5953_s1 + $0x110] sm:$0xff]  ;;  %3374 = vst [vmem:[%s5954_s2 + $0x4f8] sm:$0xff] %v2256_v38  ;;  %v3385_v48 = vld [vmem:[%s5953_s1 + $0x548] sm:$0xff]  ;;  %v3388_v50 = vld [vmem:[%s5953_s1 + $0x138] sm:$0xff] }
  0xb4   :  { %v2286_v47 = vmul.f32 %v3382_v45, %v3381_v44  ;;  %3377 = vst [vmem:[%s5954_s2 + $0xe8] sm:$0xff] %v2266_v42  ;;  %3380 = vst [vmem:[%s5954_s2 + $0x520] sm:$0xff] %v2276_v43  ;;  %v2296_v51 = vmul.f32 %v3385_v48, %v3384_v46  ;;  %v2306_v52 = vmul.f32 %v3388_v50, %v3387_v49  ;;  %v3390_v53 = vld [vmem:[%s5952_s0 + $0x570] sm:$0xff]  ;;  %v3393_v55 = vld [vmem:[%s5952_s0 + $0x160] sm:$0xff] }
  0xb5   :  { %v3391_v54 = vld [vmem:[%s5953_s1 + $0x570] sm:$0xff]  ;;  %v3394_v57 = vld [vmem:[%s5953_s1 + $0x160] sm:$0xff]  ;;  %v3396_v58 = vld [vmem:[%s5952_s0 + $0x598] sm:$0xff] }
  0xb6   :  { %3383 = vst [vmem:[%s5954_s2 + $0x110] sm:$0xff] %v2286_v47  ;;  %v2316_v56 = vmul.f32 %v3391_v54, %v3390_v53  ;;  %v3397_v59 = vld [vmem:[%s5953_s1 + $0x598] sm:$0xff]  ;;  %3386 = vst [vmem:[%s5954_s2 + $0x548] sm:$0xff] %v2296_v51  ;;  %v2326_v60 = vmul.f32 %v3394_v57, %v3393_v55  ;;  %v3399_v62 = vld [vmem:[%s5952_s0 + $0x188] sm:$0xff] }
  0xb7   :  { %3389 = vst [vmem:[%s5954_s2 + $0x138] sm:$0xff] %v2306_v52  ;;  %v2336_v61 = vmul.f32 %v3397_v59, %v3396_v58  ;;  %v3400_v63 = vld [vmem:[%s5953_s1 + $0x188] sm:$0xff]  ;;  %v3402_v0 = vld [vmem:[%s5952_s0 + $0x5c0] sm:$0xff]  ;;  %v3405_v3 = vld [vmem:[%s5952_s0 + $0x1b0] sm:$0xff] }
  0xb8   :  { %3392 = vst [vmem:[%s5954_s2 + $0x570] sm:$0xff] %v2316_v56  ;;  %v2346_v1 = vmul.f32 %v3400_v63, %v3399_v62  ;;  %v3403_v2 = vld [vmem:[%s5953_s1 + $0x5c0] sm:$0xff]  ;;  %v3406_v4 = vld [vmem:[%s5953_s1 + $0x1b0] sm:$0xff]  ;;  %3395 = vst [vmem:[%s5954_s2 + $0x160] sm:$0xff] %v2326_v60 }
  0xb9   :  { %3398 = vst [vmem:[%s5954_s2 + $0x598] sm:$0xff] %v2336_v61  ;;  %v2356_v5 = vmul.f32 %v3403_v2, %v3402_v0  ;;  %v2366_v6 = vmul.f32 %v3406_v4, %v3405_v3  ;;  %v3408_v7 = vld [vmem:[%s5952_s0 + $0x5e8] sm:$0xff]  ;;  %v3411_v9 = vld [vmem:[%s5952_s0 + $0x1d8] sm:$0xff]  ;;  %v3414_v12 = vld [vmem:[%s5952_s0 + $0x610] sm:$0xff] }
  0xba   :  { %v3409_v8 = vld [vmem:[%s5953_s1 + $0x5e8] sm:$0xff]  ;;  %3401 = vst [vmem:[%s5954_s2 + $0x188] sm:$0xff] %v2346_v1  ;;  %v3412_v11 = vld [vmem:[%s5953_s1 + $0x1d8] sm:$0xff]  ;;  %v3415_v13 = vld [vmem:[%s5953_s1 + $0x610] sm:$0xff] }
  0xbb   :  { %v2376_v10 = vmul.f32 %v3409_v8, %v3408_v7  ;;  %3404 = vst [vmem:[%s5954_s2 + $0x5c0] sm:$0xff] %v2356_v5  ;;  %3407 = vst [vmem:[%s5954_s2 + $0x1b0] sm:$0xff] %v2366_v6  ;;  %v2386_v14 = vmul.f32 %v3412_v11, %v3411_v9  ;;  %v2396_v15 = vmul.f32 %v3415_v13, %v3414_v12  ;;  %v3417_v16 = vld [vmem:[%s5952_s0 + $0x200] sm:$0xff]  ;;  %v3420_v18 = vld [vmem:[%s5952_s0 + $0x638] sm:$0xff] }
  0xbc   :  { %v3418_v17 = vld [vmem:[%s5953_s1 + $0x200] sm:$0xff]  ;;  %v3421_v20 = vld [vmem:[%s5953_s1 + $0x638] sm:$0xff]  ;;  %v3423_v21 = vld [vmem:[%s5952_s0 + $0x228] sm:$0xff] }
  0xbd   :  { %3410 = vst [vmem:[%s5954_s2 + $0x5e8] sm:$0xff] %v2376_v10  ;;  %v2406_v19 = vmul.f32 %v3418_v17, %v3417_v16  ;;  %v3424_v22 = vld [vmem:[%s5953_s1 + $0x228] sm:$0xff]  ;;  %3413 = vst [vmem:[%s5954_s2 + $0x1d8] sm:$0xff] %v2386_v14  ;;  %v2416_v23 = vmul.f32 %v3421_v20, %v3420_v18  ;;  %v3426_v25 = vld [vmem:[%s5952_s0 + $0x660] sm:$0xff] }
  0xbe   :  { %3416 = vst [vmem:[%s5954_s2 + $0x610] sm:$0xff] %v2396_v15  ;;  %v2426_v24 = vmul.f32 %v3424_v22, %v3423_v21  ;;  %v3427_v26 = vld [vmem:[%s5953_s1 + $0x660] sm:$0xff]  ;;  %v3429_v27 = vld [vmem:[%s5952_s0 + $0x250] sm:$0xff]  ;;  %v3432_v30 = vld [vmem:[%s5952_s0 + $0x688] sm:$0xff] }
  0xbf   :  { %3419 = vst [vmem:[%s5954_s2 + $0x200] sm:$0xff] %v2406_v19  ;;  %v2436_v28 = vmul.f32 %v3427_v26, %v3426_v25  ;;  %v3430_v29 = vld [vmem:[%s5953_s1 + $0x250] sm:$0xff]  ;;  %v3433_v31 = vld [vmem:[%s5953_s1 + $0x688] sm:$0xff]  ;;  %3422 = vst [vmem:[%s5954_s2 + $0x638] sm:$0xff] %v2416_v23 }
  0xc0   :  { %3425 = vst [vmem:[%s5954_s2 + $0x228] sm:$0xff] %v2426_v24  ;;  %v2446_v32 = vmul.f32 %v3430_v29, %v3429_v27  ;;  %v2456_v33 = vmul.f32 %v3433_v31, %v3432_v30  ;;  %v3435_v34 = vld [vmem:[%s5952_s0 + $0x278] sm:$0xff]  ;;  %v3438_v36 = vld [vmem:[%s5952_s0 + $0x6b0] sm:$0xff]  ;;  %v3441_v39 = vld [vmem:[%s5952_s0 + $0x2a0] sm:$0xff] }
  0xc1   :  { %v3436_v35 = vld [vmem:[%s5953_s1 + $0x278] sm:$0xff]  ;;  %3428 = vst [vmem:[%s5954_s2 + $0x660] sm:$0xff] %v2436_v28  ;;  %v3439_v38 = vld [vmem:[%s5953_s1 + $0x6b0] sm:$0xff]  ;;  %v3442_v40 = vld [vmem:[%s5953_s1 + $0x2a0] sm:$0xff] }
  0xc2   :  { %v2466_v37 = vmul.f32 %v3436_v35, %v3435_v34  ;;  %3431 = vst [vmem:[%s5954_s2 + $0x250] sm:$0xff] %v2446_v32  ;;  %3434 = vst [vmem:[%s5954_s2 + $0x688] sm:$0xff] %v2456_v33  ;;  %v2476_v41 = vmul.f32 %v3439_v38, %v3438_v36  ;;  %v2486_v42 = vmul.f32 %v3442_v40, %v3441_v39  ;;  %v3444_v43 = vld [vmem:[%s5952_s0 + $0x6d8] sm:$0xff]  ;;  %v3447_v45 = vld [vmem:[%s5952_s0 + $0x2c8] sm:$0xff] }
  0xc3   :  { %v3445_v44 = vld [vmem:[%s5953_s1 + $0x6d8] sm:$0xff]  ;;  %v3448_v47 = vld [vmem:[%s5953_s1 + $0x2c8] sm:$0xff]  ;;  %v3450_v48 = vld [vmem:[%s5952_s0 + $0x700] sm:$0xff] }
  0xc4   :  { %3437 = vst [vmem:[%s5954_s2 + $0x278] sm:$0xff] %v2466_v37  ;;  %v2496_v46 = vmul.f32 %v3445_v44, %v3444_v43  ;;  %v3451_v49 = vld [vmem:[%s5953_s1 + $0x700] sm:$0xff]  ;;  %3440 = vst [vmem:[%s5954_s2 + $0x6b0] sm:$0xff] %v2476_v41  ;;  %v2506_v50 = vmul.f32 %v3448_v47, %v3447_v45  ;;  %v3453_v52 = vld [vmem:[%s5952_s0 + $0x2f0] sm:$0xff] }
  0xc5   :  { %3443 = vst [vmem:[%s5954_s2 + $0x2a0] sm:$0xff] %v2486_v42  ;;  %v2516_v51 = vmul.f32 %v3451_v49, %v3450_v48  ;;  %v3454_v53 = vld [vmem:[%s5953_s1 + $0x2f0] sm:$0xff]  ;;  %v3456_v54 = vld [vmem:[%s5952_s0 + $0x728] sm:$0xff]  ;;  %v3459_v57 = vld [vmem:[%s5952_s0 + $0x318] sm:$0xff] }
  0xc6   :  { %3446 = vst [vmem:[%s5954_s2 + $0x6d8] sm:$0xff] %v2496_v46  ;;  %v2526_v55 = vmul.f32 %v3454_v53, %v3453_v52  ;;  %v3457_v56 = vld [vmem:[%s5953_s1 + $0x728] sm:$0xff]  ;;  %v3460_v58 = vld [vmem:[%s5953_s1 + $0x318] sm:$0xff]  ;;  %3449 = vst [vmem:[%s5954_s2 + $0x2c8] sm:$0xff] %v2506_v50 }
  0xc7   :  { %3452 = vst [vmem:[%s5954_s2 + $0x700] sm:$0xff] %v2516_v51  ;;  %v2536_v59 = vmul.f32 %v3457_v56, %v3456_v54  ;;  %v2546_v60 = vmul.f32 %v3460_v58, %v3459_v57  ;;  %v3462_v61 = vld [vmem:[%s5952_s0 + $0x750] sm:$0xff]  ;;  %v3465_v63 = vld [vmem:[%s5952_s0 + $0x340] sm:$0xff]  ;;  %v3468_v2 = vld [vmem:[%s5952_s0 + $0x778] sm:$0xff] }
  0xc8   :  { %v3463_v62 = vld [vmem:[%s5953_s1 + $0x750] sm:$0xff]  ;;  %3455 = vst [vmem:[%s5954_s2 + $0x2f0] sm:$0xff] %v2526_v55  ;;  %v3466_v1 = vld [vmem:[%s5953_s1 + $0x340] sm:$0xff]  ;;  %v3469_v3 = vld [vmem:[%s5953_s1 + $0x778] sm:$0xff] }
  0xc9   :  { %v2556_v0 = vmul.f32 %v3463_v62, %v3462_v61  ;;  %3458 = vst [vmem:[%s5954_s2 + $0x728] sm:$0xff] %v2536_v59  ;;  %3461 = vst [vmem:[%s5954_s2 + $0x318] sm:$0xff] %v2546_v60  ;;  %v2566_v4 = vmul.f32 %v3466_v1, %v3465_v63  ;;  %v2576_v5 = vmul.f32 %v3469_v3, %v3468_v2  ;;  %v3471_v6 = vld [vmem:[%s5952_s0 + $0x368] sm:$0xff]  ;;  %v3474_v8 = vld [vmem:[%s5952_s0 + $0x7a0] sm:$0xff] }
  0xca   :  { %v3472_v7 = vld [vmem:[%s5953_s1 + $0x368] sm:$0xff]  ;;  %v3475_v10 = vld [vmem:[%s5953_s1 + $0x7a0] sm:$0xff]  ;;  %v3477_v11 = vld [vmem:[%s5952_s0 + $0x390] sm:$0xff] }
  0xcb   :  { %3464 = vst [vmem:[%s5954_s2 + $0x750] sm:$0xff] %v2556_v0  ;;  %v2586_v9 = vmul.f32 %v3472_v7, %v3471_v6  ;;  %v3478_v12 = vld [vmem:[%s5953_s1 + $0x390] sm:$0xff]  ;;  %3467 = vst [vmem:[%s5954_s2 + $0x340] sm:$0xff] %v2566_v4  ;;  %v2596_v13 = vmul.f32 %v3475_v10, %v3474_v8  ;;  %v3480_v15 = vld [vmem:[%s5952_s0 + $0x7c8] sm:$0xff] }
  0xcc   :  { %3470 = vst [vmem:[%s5954_s2 + $0x778] sm:$0xff] %v2576_v5  ;;  %v2606_v14 = vmul.f32 %v3478_v12, %v3477_v11  ;;  %v3481_v16 = vld [vmem:[%s5953_s1 + $0x7c8] sm:$0xff]  ;;  %v3483_v17 = vld [vmem:[%s5952_s0 + $0x3b8] sm:$0xff]  ;;  %v3486_v20 = vld [vmem:[%s5952_s0 + $0x7f0] sm:$0xff] }
  0xcd   :  { %3473 = vst [vmem:[%s5954_s2 + $0x368] sm:$0xff] %v2586_v9  ;;  %v2616_v18 = vmul.f32 %v3481_v16, %v3480_v15  ;;  %v3484_v19 = vld [vmem:[%s5953_s1 + $0x3b8] sm:$0xff]  ;;  %v3487_v21 = vld [vmem:[%s5953_s1 + $0x7f0] sm:$0xff]  ;;  %3476 = vst [vmem:[%s5954_s2 + $0x7a0] sm:$0xff] %v2596_v13 }
  0xce   :  { %3479 = vst [vmem:[%s5954_s2 + $0x390] sm:$0xff] %v2606_v14  ;;  %v2626_v22 = vmul.f32 %v3484_v19, %v3483_v17  ;;  %v2636_v23 = vmul.f32 %v3487_v21, %v3486_v20  ;;  %v3489_v24 = vld [vmem:[%s5952_s0 + $0x3e0] sm:$0xff]  ;;  %v3492_v26 = vld [vmem:[%s5952_s0 + $0x818] sm:$0xff]  ;;  %v3495_v29 = vld [vmem:[%s5952_s0 + $0x408] sm:$0xff] }
  0xcf   :  { %v3490_v25 = vld [vmem:[%s5953_s1 + $0x3e0] sm:$0xff]  ;;  %3482 = vst [vmem:[%s5954_s2 + $0x7c8] sm:$0xff] %v2616_v18  ;;  %v3493_v28 = vld [vmem:[%s5953_s1 + $0x818] sm:$0xff]  ;;  %v3496_v30 = vld [vmem:[%s5953_s1 + $0x408] sm:$0xff] }
  0xd0   :  { %v2646_v27 = vmul.f32 %v3490_v25, %v3489_v24  ;;  %3485 = vst [vmem:[%s5954_s2 + $0x3b8] sm:$0xff] %v2626_v22  ;;  %3488 = vst [vmem:[%s5954_s2 + $0x7f0] sm:$0xff] %v2636_v23  ;;  %v2656_v31 = vmul.f32 %v3493_v28, %v3492_v26  ;;  %v2666_v32 = vmul.f32 %v3496_v30, %v3495_v29  ;;  %v3498_v33 = vld [vmem:[%s5952_s0 + $0x840] sm:$0xff]  ;;  %v3501_v35 = vld [vmem:[%s5952_s0 + $0x430] sm:$0xff] }
  0xd1   :  { %v3499_v34 = vld [vmem:[%s5953_s1 + $0x840] sm:$0xff]  ;;  %v3502_v37 = vld [vmem:[%s5953_s1 + $0x430] sm:$0xff]  ;;  %v3504_v38 = vld [vmem:[%s5952_s0 + $0x868] sm:$0xff] }
  0xd2   :  { %3491 = vst [vmem:[%s5954_s2 + $0x3e0] sm:$0xff] %v2646_v27  ;;  %v2676_v36 = vmul.f32 %v3499_v34, %v3498_v33  ;;  %v3505_v39 = vld [vmem:[%s5953_s1 + $0x868] sm:$0xff]  ;;  %3494 = vst [vmem:[%s5954_s2 + $0x818] sm:$0xff] %v2656_v31  ;;  %v2686_v40 = vmul.f32 %v3502_v37, %v3501_v35 }
  0xd3   :  { %3497 = vst [vmem:[%s5954_s2 + $0x408] sm:$0xff] %v2666_v32  ;;  %v2696_v41 = vmul.f32 %v3505_v39, %v3504_v38 }
  0xd4   :  { %3500 = vst [vmem:[%s5954_s2 + $0x840] sm:$0xff] %v2676_v36  ;;  %3503 = vst [vmem:[%s5954_s2 + $0x430] sm:$0xff] %v2686_v40 }
  0xd5   :  { %3506 = vst [vmem:[%s5954_s2 + $0x868] sm:$0xff] %v2696_v41 }

// kernel: resnet_forward.5
= control target key start
LH: loop header
LB: loop body
LE: loop exit
PB: predicated region body
PF: predicated region fallthrough
CT: control target
= control target key end

     0   :  { %s134_s0 = inlined_call_operand.vmem [shape: f32[64,128], index: 0, kind: input, shape index: {}]   ;;  %s135_s1 = inlined_call_operand.vmem [shape: f32[64,128], index: 1, kind: input, shape index: {}]   ;;  %s136_s2 = inlined_call_operand.vmem [shape: f32[64,128], index: 2, kind: output, shape index: {}]  }
   0x1   :  { %v11_v0 = vld [vmem:[%s134_s0] sm:$0xff]  ;;  %v12_v2 = vld [vmem:[%s134_s0 + $0x8] sm:$0xff]  ;;  %v13_v5 = vld [vmem:[%s134_s0 + $0x10] sm:$0xff] }
   0x2   :  { %v19_v1 = vld [vmem:[%s135_s1] sm:$0xff]  ;;  %v20_v4 = vld [vmem:[%s135_s1 + $0x8] sm:$0xff]  ;;  %v21_v6 = vld [vmem:[%s135_s1 + $0x10] sm:$0xff] }
   0x3   :  { %v27_v3 = vmul.f32 %v19_v1, %v11_v0  ;;  %v28_v7 = vmul.f32 %v20_v4, %v12_v2  ;;  %v29_v8 = vmul.f32 %v21_v6, %v13_v5  ;;  %v14_v9 = vld [vmem:[%s134_s0 + $0x18] sm:$0xff]  ;;  %v15_v11 = vld [vmem:[%s134_s0 + $0x20] sm:$0xff]  ;;  %v16_v14 = vld [vmem:[%s134_s0 + $0x28] sm:$0xff] }
   0x4   :  { %v22_v10 = vld [vmem:[%s135_s1 + $0x18] sm:$0xff]  ;;  %v23_v13 = vld [vmem:[%s135_s1 + $0x20] sm:$0xff]  ;;  %v24_v15 = vld [vmem:[%s135_s1 + $0x28] sm:$0xff] }
   0x5   :  { %35 = vst [vmem:[%s136_s2] sm:$0xff] %v27_v3  ;;  %v30_v12 = vmul.f32 %v22_v10, %v14_v9  ;;  %36 = vst [vmem:[%s136_s2 + $0x8] sm:$0xff] %v28_v7  ;;  %v31_v16 = vmul.f32 %v23_v13, %v15_v11  ;;  %v32_v17 = vmul.f32 %v24_v15, %v16_v14  ;;  %v17_v18 = vld [vmem:[%s134_s0 + $0x30] sm:$0xff]  ;;  %v18_v20 = vld [vmem:[%s134_s0 + $0x38] sm:$0xff] }
   0x6   :  { %37 = vst [vmem:[%s136_s2 + $0x10] sm:$0xff] %v29_v8  ;;  %v25_v19 = vld [vmem:[%s135_s1 + $0x30] sm:$0xff]  ;;  %v26_v22 = vld [vmem:[%s135_s1 + $0x38] sm:$0xff] }
   0x7   :  { %38 = vst [vmem:[%s136_s2 + $0x18] sm:$0xff] %v30_v12  ;;  %v33_v21 = vmul.f32 %v25_v19, %v17_v18  ;;  %39 = vst [vmem:[%s136_s2 + $0x20] sm:$0xff] %v31_v16  ;;  %v34_v23 = vmul.f32 %v26_v22, %v18_v20 }
   0x8   :  { %40 = vst [vmem:[%s136_s2 + $0x28] sm:$0xff] %v32_v17 }
   0x9   :  { %41 = vst [vmem:[%s136_s2 + $0x30] sm:$0xff] %v33_v21  ;;  %42 = vst [vmem:[%s136_s2 + $0x38] sm:$0xff] %v34_v23 }

</bundles_post_ra>
